<compile_context>
chip_gen: v5e
topology: v5e:2x2
jax: 0.10.0
libtpu: 0.0.40
codegen_flags: <defaults>
</compile_context>

<pallas_src>
import jax
import jax.numpy as jnp
from jax.experimental import pallas as pl
from jax.experimental.pallas import tpu as pltpu

drn_channels = [16, 32, 64, 128, 256, 512, 512, 512, 512]
predict_source = [4, 5, 6, 7, 8, 9]


def _round_up(x, m):
    return (x + m - 1) // m * m


# ---------------------------------------------------------------------------
# Fused (optional L2Norm) + 3x3 'same' conv with loc||conf fused, 128-lane
# padded output.  One grid step per stacked source.
# ---------------------------------------------------------------------------
def _make_head_kernel(B, H, W, Cin, Cp, S, Wr, G, apply_l2norm):
    M = B * S
    # Interior input pixel (b, yy, xx) lives at slab row  G + b*S + yy*Wr + xx.
    # Output pixel  (b, y, x)  is computed at output row  b*S + y*Wr + x.
    # Tap (dy, dx) therefore reads slab rows starting at TBASE + dy*Wr + dx.
    TBASE = G - Wr - 1          # >= 0 and chosen so dx=1 tap reads are 8-aligned

    def kernel(*refs):
        if apply_l2norm:
            x_ref, w_ref, b_ref, l2w_ref, o_ref, pad_ref = refs
        else:
            x_ref, w_ref, b_ref, o_ref, pad_ref = refs

        # Zero the slab: conv zero border + inter-batch gaps + tap-read slack.
        # TODO(synk): at production sizes (tiled grid) zero only border/gap rows.
        pad_ref[...] = jnp.zeros_like(pad_ref)

        # Optionally L2-normalise (f32 math), then sublane-aligned scatter of
        # the interior rows from a flat (B*H*W, Cin) view.
        xall = x_ref[...]                                       # (B, H, W, Cin)
        if apply_l2norm:
            xf = xall.astype(jnp.float32)
            # TODO(synk): PyTorch L2Norm is x / (sqrt(sum x^2) + 1e-10) * w; we
            # use x * rsqrt(sum x^2 + 1e-20) * w (differs only for ~zero rows).
            inv = jax.lax.rsqrt(jnp.sum(xf * xf, axis=-1, keepdims=True) + 1e-20)
            xall = (xf * inv * l2w_ref[...]).astype(pad_ref.dtype)
        flat = xall.reshape(B * H * W, Cin)
        for b in range(B):
            base = G + b * S                                    # multiple of 8
            for y in range(H):
                row = (b * H + y) * W
                pad_ref[pl.ds(base + y * Wr, W), :] = flat[row:row + W, :]

        # Bias init, then 9 shifted bf16 MXU matmuls accumulated into o_ref (f32).
        o_ref[...] = jnp.broadcast_to(b_ref[...], (M, Cp))
        for dy in range(3):
            for dx in range(3):
                patch = pad_ref[pl.ds(TBASE + dy * Wr + dx, M), :]   # (M, Cin)
                o_ref[...] += jnp.dot(patch, w_ref[dy, dx],
                                      preferred_element_type=jnp.float32)

    return kernel


def _fused_head_conv(xs, ws, bs, l2_weight=None):
    """3x3 'same' conv, loc||conf fused + lane-padded Cout, stacked sources.

    xs: (NS, B, H, W, Cin) bf16; ws: (NS, 3, 3, Cin, Cp) bf16; bs: (NS, 1, Cp) f32.
    Returns (NS, B, H, W, Cp) f32.
    """
    NS, B, H, W, Cin = xs.shape
    Cp = ws.shape[-1]
    Wr = _round_up(W + 2, 8)               # padded row stride (sublane aligned)
    G = Wr + 8                             # header rows (top pad + alignment)
    S = (H + 1) * Wr                       # per-batch row stride (covers bottom pad)
    M = B * S                              # batch-stacked output rows (incl. junk)
    R = _round_up(B * S + 2 * Wr + 9, 8)   # slab rows incl. tap-read slack

    kernel = _make_head_kernel(B, H, W, Cin, Cp, S, Wr, G, l2_weight is not None)

    in_specs = [
        pl.BlockSpec((pl.Squeezed(), B, H, W, Cin), lambda s: (s, 0, 0, 0, 0)),
        pl.BlockSpec((pl.Squeezed(), 3, 3, Cin, Cp), lambda s: (s, 0, 0, 0, 0)),
        pl.BlockSpec((pl.Squeezed(), 1, Cp), lambda s: (s, 0, 0)),
    ]
    args = [xs, ws, bs]
    if l2_weight is not None:
        in_specs.append(pl.BlockSpec((1, Cin), lambda s: (0, 0)))
        args.append(l2_weight.reshape(1, Cin).astype(jnp.float32))

    out = pl.pallas_call(
        kernel,
        out_shape=jax.ShapeDtypeStruct((NS, M, Cp), jnp.float32),
        grid=(NS,),
        in_specs=in_specs,
        out_specs=pl.BlockSpec((pl.Squeezed(), M, Cp), lambda s: (s, 0, 0)),
        scratch_shapes=[pltpu.VMEM((R, Cin), jnp.bfloat16)],
        compiler_params=pltpu.CompilerParams(
            dimension_semantics=("parallel",)),   # v7x: split sources over 2 TCs
    )(*args)

    # Strip padded-layout junk rows (cheap at these sizes).
    # TODO(synk): at production sizes index_map the output compactly instead.
    out = out.reshape(NS, B, S, Cp)[:, :, :H * Wr, :]
    out = out.reshape(NS, B, H, Wr, Cp)[:, :, :, :W, :]
    return out


# ---------------------------------------------------------------------------
# 1x1 spatial sources: 3x3 'same' conv degenerates to the center tap.
# ---------------------------------------------------------------------------
def _head_conv_1x1(xs, ws_center, bs):
    """xs: (NS, B, Cin) bf16; ws_center: (NS, Cin, Cp) bf16; bs: (NS, 1, Cp) f32.
    Returns (NS, B, 1, 1, Cp) f32."""
    NS, B, Cin = xs.shape
    Cp = ws_center.shape[-1]

    def kernel(x_ref, w_ref, b_ref, o_ref):
        o_ref[...] = jnp.dot(x_ref[...], w_ref[...],
                             preferred_element_type=jnp.float32) + b_ref[...]

    out = pl.pallas_call(
        kernel,
        out_shape=jax.ShapeDtypeStruct((NS, B, Cp), jnp.float32),
        grid=(NS,),
        in_specs=[
            pl.BlockSpec((pl.Squeezed(), B, Cin), lambda s: (s, 0, 0)),
            pl.BlockSpec((pl.Squeezed(), Cin, Cp), lambda s: (s, 0, 0)),
            pl.BlockSpec((pl.Squeezed(), 1, Cp), lambda s: (s, 0, 0)),
        ],
        out_specs=pl.BlockSpec((pl.Squeezed(), B, Cp), lambda s: (s, 0, 0)),
        compiler_params=pltpu.CompilerParams(
            dimension_semantics=("parallel",)),
    )(xs, ws_center, bs)
    return out.reshape(NS, B, 1, 1, Cp)


# ---------------------------------------------------------------------------
# DRN_SSD multibox head
# ---------------------------------------------------------------------------
class DRNSSDPallas:
    def __init__(self, num_classes, num_priors, key):
        self.num_classes = num_classes
        self.num_priors = num_priors
        src_channels = [drn_channels[v - 1] for v in predict_source]
        # L2Norm(128, 20): per-channel scale initialized to 20
        self.l2_weight = jnp.full((drn_channels[3],), 20.0, jnp.float32)

        # Global lane-padded fused Cout (loc || conf || zero-pad) -> >= 128.
        couts = [num_priors[k] * 4 + num_priors[k] * num_classes
                 for k in range(len(src_channels))]
        self.cp = max(128, _round_up(max(couts), 128))

        self.head_params = []
        for k, cin in enumerate(src_channels):
            key, k1, k2, k3, k4 = jax.random.split(key, 5)
            bound = 1.0 / float((cin * 9) ** 0.5)             # Conv2d default-ish init
            cl = num_priors[k] * 4
            cc = num_priors[k] * num_classes
            wl = jax.random.uniform(k1, (3, 3, cin, cl), jnp.float32, -bound, bound)
            bl = jax.random.uniform(k2, (cl,), jnp.float32, -bound, bound)
            wc = jax.random.uniform(k3, (3, 3, cin, cc), jnp.float32, -bound, bound)
            bc = jax.random.uniform(k4, (cc,), jnp.float32, -bound, bound)
            # Fuse loc and conf heads along Cout and zero-pad to self.cp lanes.
            w = jnp.concatenate([wl, wc], axis=-1)
            w = jnp.pad(w, ((0, 0), (0, 0), (0, 0), (0, self.cp - (cl + cc))))
            b = jnp.concatenate([bl, bc], axis=0)
            b = jnp.pad(b, (0, self.cp - (cl + cc)))
            self.head_params.append((w.astype(jnp.bfloat16),
                                     b.reshape(1, self.cp).astype(jnp.float32),
                                     cl, cc))

    def forward(self, features_nchw, phase='train'):
        # features_nchw = y[3:] of the DRN backbone, NCHW like PyTorch.
        B = features_nchw[0].shape[0]
        n_src = len(features_nchw)
        # TODO(synk): at production sizes the backbone should emit NHWC bf16
        # directly; this transpose/cast is a separate HBM round trip.
        feats = [jnp.transpose(x, (0, 2, 3, 1)).astype(jnp.bfloat16)
                 for x in features_nchw]

        # Group consecutive sources with identical (B, H, W, Cin) into one
        # pallas_call (source 0 stays alone: its kernel fuses the L2Norm).
        groups, i = [], 0
        while i < n_src:
            shp, j = feats[i].shape, i + 1
            if i != 0:
                while j < n_src and feats[j].shape == shp:
                    j += 1
            groups.append(list(range(i, j)))
            i = j

        loc_list = [None] * n_src
        conf_list = [None] * n_src
        for grp in groups:
            xs = jnp.stack([feats[g] for g in grp], axis=0)      # (NS,B,H,W,Cin)
            ws = jnp.stack([self.head_params[g][0] for g in grp], axis=0)
            bs = jnp.stack([self.head_params[g][1] for g in grp], axis=0)
            _, _, H, W, _ = xs.shape
            l2 = self.l2_weight if grp[0] == 0 else None          # L2Norm fused in
            if H == 1 and W == 1 and l2 is None:
                # 3x3 'same' conv on a 1x1 map == center-tap matmul.
                out = _head_conv_1x1(xs[:, :, 0, 0, :], ws[:, 1, 1], bs)
            else:
                out = _fused_head_conv(xs, ws, bs, l2)            # (NS,B,H,W,Cp)
            for n, g in enumerate(grp):
                cl, cc = self.head_params[g][2], self.head_params[g][3]
                o = out[n]
                loc_list[g] = o[..., :cl].reshape(B, -1)
                conf_list[g] = o[..., cl:cl + cc].reshape(B, -1)

        loc = jnp.concatenate(loc_list, axis=1).reshape(B, -1, 4)
        conf = jnp.concatenate(conf_list, axis=1).reshape(B, -1, self.num_classes)
        if phase == 'eval':
            return loc, jax.nn.softmax(conf, axis=-1)
        return loc, conf


if __name__ == "__main__":
    key = jax.random.PRNGKey(0)
    B = 2
    num_classes = 5
    num_priors = [4, 6, 6, 6, 4, 4]

    # Small synthetic backbone feature maps y[3:9] (NCHW), channels per DRN cfg.
    feat_specs = [(drn_channels[v - 1], s)
                  for v, s in zip(predict_source, [8, 4, 2, 2, 1, 1])]
    features = []
    for c, s in feat_specs:
        key, sub = jax.random.split(key)
        features.append(jax.random.normal(sub, (B, c, s, s), jnp.float32))

    key, pkey = jax.random.split(key)
    model = DRNSSDPallas(num_classes, num_priors, pkey)

    loc, conf = model.forward(features, phase='train')
    loc = jax.block_until_ready(loc)
    conf = jax.block_until_ready(conf)

    total_priors = sum(npri * s * s for npri, (_, s) in zip(num_priors, feat_specs))
    assert loc.shape == (B, total_priors, 4), loc.shape
    assert conf.shape == (B, total_priors, num_classes), conf.shape
    assert bool(jnp.all(jnp.isfinite(loc))) and bool(jnp.all(jnp.isfinite(conf)))

    # Cross-check the aligned slab layout against a pure-JAX lax.conv reference
    # using the same bf16 inputs/weights and f32 accumulation.
    def reference_forward(feats_nchw):
        locs, confs = [], []
        for k, x in enumerate(feats_nchw):
            xh = jnp.transpose(x, (0, 2, 3, 1)).astype(jnp.bfloat16)
            if k == 0:
                xf = xh.astype(jnp.float32)
                inv = jax.lax.rsqrt(jnp.sum(xf * xf, axis=-1, keepdims=True) + 1e-20)
                xh = (xf * inv * model.l2_weight.reshape(1, 1, 1, -1)).astype(jnp.bfloat16)
            w, b, cl, cc = model.head_params[k]
            y = jax.lax.conv_general_dilated(
                xh, w, window_strides=(1, 1), padding='SAME',
                dimension_numbers=('NHWC', 'HWIO', 'NHWC'),
                preferred_element_type=jnp.float32) + b.reshape(1, 1, 1, -1)
            locs.append(y[..., :cl].reshape(B, -1))
            confs.append(y[..., cl:cl + cc].reshape(B, -1))
        return (jnp.concatenate(locs, axis=1).reshape(B, -1, 4),
                jnp.concatenate(confs, axis=1).reshape(B, -1, num_classes))

    loc_ref, conf_ref = reference_forward(features)
    assert bool(jnp.allclose(loc, loc_ref, atol=2e-2, rtol=2e-2)), \
        float(jnp.max(jnp.abs(loc - loc_ref)))
    assert bool(jnp.allclose(conf, conf_ref, atol=2e-2, rtol=2e-2)), \
        float(jnp.max(jnp.abs(conf - conf_ref)))

    print("KERNEL_OK")
</pallas_src>

<mosaic_0001>
module attributes {stable_mosaic.version = 11 : i64} {
  func.func @kernel(%arg0: i32, %arg1: memref<1x2x8x8x128xbf16, #tpu.memory_space<vmem>>, %arg2: memref<1x3x3x128x128xbf16, #tpu.memory_space<vmem>>, %arg3: memref<1x1x128xf32, #tpu.memory_space<vmem>>, %arg4: memref<1x128xf32, #tpu.memory_space<vmem>>, %arg5: memref<1x288x128xf32, #tpu.memory_space<vmem>>, %arg6: memref<336x128xbf16, #tpu.memory_space<vmem>>) attributes {dimension_semantics = [#tpu.dimension_semantics<parallel>], iteration_bounds = array<i64: 1>, scalar_prefetch = 0 : i64, scratch_operands = 1 : i64, tpu.core_type = #tpu.core_type<tc>, window_params = [{transform_indices = @transform_0, window_bounds = array<i64: 1, 2, 8, 8, 128>}, {transform_indices = @transform_1, window_bounds = array<i64: 1, 3, 3, 128, 128>}, {transform_indices = @transform_2, window_bounds = array<i64: 1, 1, 128>}, {pipeline_mode = #tpu.pipeline_mode<synchronous>, transform_indices = @transform_3, window_bounds = array<i64: 1, 128>}, {transform_indices = @transform_4, window_bounds = array<i64: 1, 288, 128>}]} {
    %cst = arith.constant 0.000000e+00 : bf16
    %0 = vector.broadcast %cst : bf16 to vector<336x128xbf16>
    %c0 = arith.constant 0 : index
    %c0_0 = arith.constant 0 : index
    %1 = vector.load %arg6[%c0, %c0_0] : memref<336x128xbf16, #tpu.memory_space<vmem>>, vector<336x128xbf16>
    tpu.vector_store %arg6[%c0, %c0_0], %0 {strides = array<i32>} : memref<336x128xbf16, #tpu.memory_space<vmem>>, vector<336x128xbf16>,
    %c0_1 = arith.constant 0 : index
    %c0_2 = arith.constant 0 : index
    %c0_3 = arith.constant 0 : index
    %c0_4 = arith.constant 0 : index
    %c0_5 = arith.constant 0 : index
    %2 = vector.load %arg1[%c0_1, %c0_2, %c0_3, %c0_4, %c0_5] : memref<1x2x8x8x128xbf16, #tpu.memory_space<vmem>>, vector<1x2x8x8x128xbf16>
    %3 = vector.shape_cast %2 : vector<1x2x8x8x128xbf16> to vector<2x8x8x128xbf16>
    %4 = arith.extf %3 : vector<2x8x8x128xbf16> to vector<2x8x8x128xf32>
    %5 = arith.mulf %4, %4 : vector<2x8x8x128xf32>
    %cst_6 = arith.constant dense<0.000000e+00> : vector<2x8x8xf32>
    %6 = vector.multi_reduction <add>, %5, %cst_6 [3] : vector<2x8x8x128xf32> to vector<2x8x8xf32>
    %7 = vector.shape_cast %6 : vector<2x8x8xf32> to vector<2x8x8x1xf32>
    %cst_7 = arith.constant 9.99999968E-21 : f32
    %8 = vector.broadcast %cst_7 : f32 to vector<2x8x8x1xf32>
    %9 = arith.addf %7, %8 : vector<2x8x8x1xf32>
    %10 = math.rsqrt %9 : vector<2x8x8x1xf32>
    %11 = vector.broadcast %10 : vector<2x8x8x1xf32> to vector<2x8x8x128xf32>
    %12 = arith.mulf %4, %11 : vector<2x8x8x128xf32>
    %c0_8 = arith.constant 0 : index
    %c0_9 = arith.constant 0 : index
    %13 = vector.load %arg4[%c0_8, %c0_9] : memref<1x128xf32, #tpu.memory_space<vmem>>, vector<1x128xf32>
    %14 = vector.shape_cast %13 : vector<1x128xf32> to vector<1x1x1x128xf32>
    %15 = vector.broadcast %14 : vector<1x1x1x128xf32> to vector<2x8x8x128xf32>
    %16 = arith.mulf %12, %15 : vector<2x8x8x128xf32>
    %17 = arith.truncf %16 : vector<2x8x8x128xf32> to vector<2x8x8x128xbf16>
    %18 = vector.shape_cast %17 : vector<2x8x8x128xbf16> to vector<128x128xbf16>
    %19 = vector.extract_strided_slice %18 {offsets = [0, 0], sizes = [8, 128], strides = [1, 1]} : vector<128x128xbf16> to vector<8x128xbf16>
    %c24 = arith.constant 24 : index
    %c0_10 = arith.constant 0 : index
    %20 = vector.load %arg6[%c24, %c0_10] : memref<336x128xbf16, #tpu.memory_space<vmem>>, vector<8x128xbf16>
    tpu.vector_store %arg6[%c24, %c0_10], %19 {strides = array<i32>} : memref<336x128xbf16, #tpu.memory_space<vmem>>, vector<8x128xbf16>,
    %21 = vector.extract_strided_slice %18 {offsets = [8, 0], sizes = [8, 128], strides = [1, 1]} : vector<128x128xbf16> to vector<8x128xbf16>
    %c40 = arith.constant 40 : index
    %c0_11 = arith.constant 0 : index
    %22 = vector.load %arg6[%c40, %c0_11] : memref<336x128xbf16, #tpu.memory_space<vmem>>, vector<8x128xbf16>
    tpu.vector_store %arg6[%c40, %c0_11], %21 {strides = array<i32>} : memref<336x128xbf16, #tpu.memory_space<vmem>>, vector<8x128xbf16>,
    %23 = vector.extract_strided_slice %18 {offsets = [16, 0], sizes = [8, 128], strides = [1, 1]} : vector<128x128xbf16> to vector<8x128xbf16>
    %c56 = arith.constant 56 : index
    %c0_12 = arith.constant 0 : index
    %24 = vector.load %arg6[%c56, %c0_12] : memref<336x128xbf16, #tpu.memory_space<vmem>>, vector<8x128xbf16>
    tpu.vector_store %arg6[%c56, %c0_12], %23 {strides = array<i32>} : memref<336x128xbf16, #tpu.memory_space<vmem>>, vector<8x128xbf16>,
    %25 = vector.extract_strided_slice %18 {offsets = [24, 0], sizes = [8, 128], strides = [1, 1]} : vector<128x128xbf16> to vector<8x128xbf16>
    %c72 = arith.constant 72 : index
    %c0_13 = arith.constant 0 : index
    %26 = vector.load %arg6[%c72, %c0_13] : memref<336x128xbf16, #tpu.memory_space<vmem>>, vector<8x128xbf16>
    tpu.vector_store %arg6[%c72, %c0_13], %25 {strides = array<i32>} : memref<336x128xbf16, #tpu.memory_space<vmem>>, vector<8x128xbf16>,
    %27 = vector.extract_strided_slice %18 {offsets = [32, 0], sizes = [8, 128], strides = [1, 1]} : vector<128x128xbf16> to vector<8x128xbf16>
    %c88 = arith.constant 88 : index
    %c0_14 = arith.constant 0 : index
    %28 = vector.load %arg6[%c88, %c0_14] : memref<336x128xbf16, #tpu.memory_space<vmem>>, vector<8x128xbf16>
    tpu.vector_store %arg6[%c88, %c0_14], %27 {strides = array<i32>} : memref<336x128xbf16, #tpu.memory_space<vmem>>, vector<8x128xbf16>,
    %29 = vector.extract_strided_slice %18 {offsets = [40, 0], sizes = [8, 128], strides = [1, 1]} : vector<128x128xbf16> to vector<8x128xbf16>
    %c104 = arith.constant 104 : index
    %c0_15 = arith.constant 0 : index
    %30 = vector.load %arg6[%c104, %c0_15] : memref<336x128xbf16, #tpu.memory_space<vmem>>, vector<8x128xbf16>
    tpu.vector_store %arg6[%c104, %c0_15], %29 {strides = array<i32>} : memref<336x128xbf16, #tpu.memory_space<vmem>>, vector<8x128xbf16>,
    %31 = vector.extract_strided_slice %18 {offsets = [48, 0], sizes = [8, 128], strides = [1, 1]} : vector<128x128xbf16> to vector<8x128xbf16>
    %c120 = arith.constant 120 : index
    %c0_16 = arith.constant 0 : index
    %32 = vector.load %arg6[%c120, %c0_16] : memref<336x128xbf16, #tpu.memory_space<vmem>>, vector<8x128xbf16>
    tpu.vector_store %arg6[%c120, %c0_16], %31 {strides = array<i32>} : memref<336x128xbf16, #tpu.memory_space<vmem>>, vector<8x128xbf16>,
    %33 = vector.extract_strided_slice %18 {offsets = [56, 0], sizes = [8, 128], strides = [1, 1]} : vector<128x128xbf16> to vector<8x128xbf16>
    %c136 = arith.constant 136 : index
    %c0_17 = arith.constant 0 : index
    %34 = vector.load %arg6[%c136, %c0_17] : memref<336x128xbf16, #tpu.memory_space<vmem>>, vector<8x128xbf16>
    tpu.vector_store %arg6[%c136, %c0_17], %33 {strides = array<i32>} : memref<336x128xbf16, #tpu.memory_space<vmem>>, vector<8x128xbf16>,
    %35 = vector.extract_strided_slice %18 {offsets = [64, 0], sizes = [8, 128], strides = [1, 1]} : vector<128x128xbf16> to vector<8x128xbf16>
    %c168 = arith.constant 168 : index
    %c0_18 = arith.constant 0 : index
    %36 = vector.load %arg6[%c168, %c0_18] : memref<336x128xbf16, #tpu.memory_space<vmem>>, vector<8x128xbf16>
    tpu.vector_store %arg6[%c168, %c0_18], %35 {strides = array<i32>} : memref<336x128xbf16, #tpu.memory_space<vmem>>, vector<8x128xbf16>,
    %37 = vector.extract_strided_slice %18 {offsets = [72, 0], sizes = [8, 128], strides = [1, 1]} : vector<128x128xbf16> to vector<8x128xbf16>
    %c184 = arith.constant 184 : index
    %c0_19 = arith.constant 0 : index
    %38 = vector.load %arg6[%c184, %c0_19] : memref<336x128xbf16, #tpu.memory_space<vmem>>, vector<8x128xbf16>
    tpu.vector_store %arg6[%c184, %c0_19], %37 {strides = array<i32>} : memref<336x128xbf16, #tpu.memory_space<vmem>>, vector<8x128xbf16>,
    %39 = vector.extract_strided_slice %18 {offsets = [80, 0], sizes = [8, 128], strides = [1, 1]} : vector<128x128xbf16> to vector<8x128xbf16>
    %c200 = arith.constant 200 : index
    %c0_20 = arith.constant 0 : index
    %40 = vector.load %arg6[%c200, %c0_20] : memref<336x128xbf16, #tpu.memory_space<vmem>>, vector<8x128xbf16>
    tpu.vector_store %arg6[%c200, %c0_20], %39 {strides = array<i32>} : memref<336x128xbf16, #tpu.memory_space<vmem>>, vector<8x128xbf16>,
    %41 = vector.extract_strided_slice %18 {offsets = [88, 0], sizes = [8, 128], strides = [1, 1]} : vector<128x128xbf16> to vector<8x128xbf16>
    %c216 = arith.constant 216 : index
    %c0_21 = arith.constant 0 : index
    %42 = vector.load %arg6[%c216, %c0_21] : memref<336x128xbf16, #tpu.memory_space<vmem>>, vector<8x128xbf16>
    tpu.vector_store %arg6[%c216, %c0_21], %41 {strides = array<i32>} : memref<336x128xbf16, #tpu.memory_space<vmem>>, vector<8x128xbf16>,
    %43 = vector.extract_strided_slice %18 {offsets = [96, 0], sizes = [8, 128], strides = [1, 1]} : vector<128x128xbf16> to vector<8x128xbf16>
    %c232 = arith.constant 232 : index
    %c0_22 = arith.constant 0 : index
    %44 = vector.load %arg6[%c232, %c0_22] : memref<336x128xbf16, #tpu.memory_space<vmem>>, vector<8x128xbf16>
    tpu.vector_store %arg6[%c232, %c0_22], %43 {strides = array<i32>} : memref<336x128xbf16, #tpu.memory_space<vmem>>, vector<8x128xbf16>,
    %45 = vector.extract_strided_slice %18 {offsets = [104, 0], sizes = [8, 128], strides = [1, 1]} : vector<128x128xbf16> to vector<8x128xbf16>
    %c248 = arith.constant 248 : index
    %c0_23 = arith.constant 0 : index
    %46 = vector.load %arg6[%c248, %c0_23] : memref<336x128xbf16, #tpu.memory_space<vmem>>, vector<8x128xbf16>
    tpu.vector_store %arg6[%c248, %c0_23], %45 {strides = array<i32>} : memref<336x128xbf16, #tpu.memory_space<vmem>>, vector<8x128xbf16>,
    %47 = vector.extract_strided_slice %18 {offsets = [112, 0], sizes = [8, 128], strides = [1, 1]} : vector<128x128xbf16> to vector<8x128xbf16>
    %c264 = arith.constant 264 : index
    %c0_24 = arith.constant 0 : index
    %48 = vector.load %arg6[%c264, %c0_24] : memref<336x128xbf16, #tpu.memory_space<vmem>>, vector<8x128xbf16>
    tpu.vector_store %arg6[%c264, %c0_24], %47 {strides = array<i32>} : memref<336x128xbf16, #tpu.memory_space<vmem>>, vector<8x128xbf16>,
    %49 = vector.extract_strided_slice %18 {offsets = [120, 0], sizes = [8, 128], strides = [1, 1]} : vector<128x128xbf16> to vector<8x128xbf16>
    %c280 = arith.constant 280 : index
    %c0_25 = arith.constant 0 : index
    %50 = vector.load %arg6[%c280, %c0_25] : memref<336x128xbf16, #tpu.memory_space<vmem>>, vector<8x128xbf16>
    tpu.vector_store %arg6[%c280, %c0_25], %49 {strides = array<i32>} : memref<336x128xbf16, #tpu.memory_space<vmem>>, vector<8x128xbf16>,
    %c0_26 = arith.constant 0 : index
    %c0_27 = arith.constant 0 : index
    %c0_28 = arith.constant 0 : index
    %51 = vector.load %arg3[%c0_26, %c0_27, %c0_28] : memref<1x1x128xf32, #tpu.memory_space<vmem>>, vector<1x1x128xf32>
    %52 = vector.shape_cast %51 : vector<1x1x128xf32> to vector<1x128xf32>
    %53 = vector.shape_cast %52 : vector<1x128xf32> to vector<1x128xf32>
    %54 = vector.broadcast %53 : vector<1x128xf32> to vector<288x128xf32>
    %c0_29 = arith.constant 0 : index
    %c0_30 = arith.constant 0 : index
    %c0_31 = arith.constant 0 : index
    %55 = vector.load %arg5[%c0_29, %c0_30, %c0_31] : memref<1x288x128xf32, #tpu.memory_space<vmem>>, vector<1x288x128xf32>
    %56 = vector.shape_cast %55 : vector<1x288x128xf32> to vector<288x128xf32>
    %57 = vector.shape_cast %54 : vector<288x128xf32> to vector<1x288x128xf32>
    tpu.vector_store %arg5[%c0_29, %c0_30, %c0_31], %57 {strides = array<i32>} : memref<1x288x128xf32, #tpu.memory_space<vmem>>, vector<1x288x128xf32>,
    %c7 = arith.constant 7 : index
    %c0_32 = arith.constant 0 : index
    %58 = vector.load %arg6[%c7, %c0_32] : memref<336x128xbf16, #tpu.memory_space<vmem>>, vector<288x128xbf16>
    %c0_33 = arith.constant 0 : index
    %c0_34 = arith.constant 0 : index
    %c0_35 = arith.constant 0 : index
    %59 = vector.load %arg5[%c0_33, %c0_34, %c0_35] : memref<1x288x128xf32, #tpu.memory_space<vmem>>, vector<1x288x128xf32>
    %60 = vector.shape_cast %59 : vector<1x288x128xf32> to vector<288x128xf32>
    %c0_36 = arith.constant 0 : index
    %c0_37 = arith.constant 0 : index
    %c0_38 = arith.constant 0 : index
    %c0_39 = arith.constant 0 : index
    %c0_40 = arith.constant 0 : index
    %61 = vector.load %arg2[%c0_36, %c0_37, %c0_38, %c0_39, %c0_40] : memref<1x3x3x128x128xbf16, #tpu.memory_space<vmem>>, vector<1x1x1x128x128xbf16>
    %62 = vector.shape_cast %61 : vector<1x1x1x128x128xbf16> to vector<128x128xbf16>
    %cst_41 = arith.constant dense<0.000000e+00> : vector<288x128xf32>
    %63 = tpu.matmul %58, %62, %cst_41 {dimension_numbers = #tpu.dot_dimension_numbers<[1], [0], [0], [1], [0, 0, 1, 1], [], []>} : vector<288x128xbf16>, vector<128x128xbf16>, vector<288x128xf32> -> vector<288x128xf32>
    %64 = arith.addf %60, %63 : vector<288x128xf32>
    %c0_42 = arith.constant 0 : index
    %c0_43 = arith.constant 0 : index
    %c0_44 = arith.constant 0 : index
    %65 = vector.load %arg5[%c0_42, %c0_43, %c0_44] : memref<1x288x128xf32, #tpu.memory_space<vmem>>, vector<1x288x128xf32>
    %66 = vector.shape_cast %65 : vector<1x288x128xf32> to vector<288x128xf32>
    %67 = vector.shape_cast %64 : vector<288x128xf32> to vector<1x288x128xf32>
    tpu.vector_store %arg5[%c0_42, %c0_43, %c0_44], %67 {strides = array<i32>} : memref<1x288x128xf32, #tpu.memory_space<vmem>>, vector<1x288x128xf32>,
    %c8 = arith.constant 8 : index
    %c0_45 = arith.constant 0 : index
    %68 = vector.load %arg6[%c8, %c0_45] : memref<336x128xbf16, #tpu.memory_space<vmem>>, vector<288x128xbf16>
    %c0_46 = arith.constant 0 : index
    %c0_47 = arith.constant 0 : index
    %c0_48 = arith.constant 0 : index
    %69 = vector.load %arg5[%c0_46, %c0_47, %c0_48] : memref<1x288x128xf32, #tpu.memory_space<vmem>>, vector<1x288x128xf32>
    %70 = vector.shape_cast %69 : vector<1x288x128xf32> to vector<288x128xf32>
    %c0_49 = arith.constant 0 : index
    %c0_50 = arith.constant 0 : index
    %c1 = arith.constant 1 : index
    %c0_51 = arith.constant 0 : index
    %c0_52 = arith.constant 0 : index
    %71 = vector.load %arg2[%c0_49, %c0_50, %c1, %c0_51, %c0_52] : memref<1x3x3x128x128xbf16, #tpu.memory_space<vmem>>, vector<1x1x1x128x128xbf16>
    %72 = vector.shape_cast %71 : vector<1x1x1x128x128xbf16> to vector<128x128xbf16>
    %cst_53 = arith.constant dense<0.000000e+00> : vector<288x128xf32>
    %73 = tpu.matmul %68, %72, %cst_53 {dimension_numbers = #tpu.dot_dimension_numbers<[1], [0], [0], [1], [0, 0, 1, 1], [], []>} : vector<288x128xbf16>, vector<128x128xbf16>, vector<288x128xf32> -> vector<288x128xf32>
    %74 = arith.addf %70, %73 : vector<288x128xf32>
    %c0_54 = arith.constant 0 : index
    %c0_55 = arith.constant 0 : index
    %c0_56 = arith.constant 0 : index
    %75 = vector.load %arg5[%c0_54, %c0_55, %c0_56] : memref<1x288x128xf32, #tpu.memory_space<vmem>>, vector<1x288x128xf32>
    %76 = vector.shape_cast %75 : vector<1x288x128xf32> to vector<288x128xf32>
    %77 = vector.shape_cast %74 : vector<288x128xf32> to vector<1x288x128xf32>
    tpu.vector_store %arg5[%c0_54, %c0_55, %c0_56], %77 {strides = array<i32>} : memref<1x288x128xf32, #tpu.memory_space<vmem>>, vector<1x288x128xf32>,
    %c9 = arith.constant 9 : index
    %c0_57 = arith.constant 0 : index
    %78 = vector.load %arg6[%c9, %c0_57] : memref<336x128xbf16, #tpu.memory_space<vmem>>, vector<288x128xbf16>
    %c0_58 = arith.constant 0 : index
    %c0_59 = arith.constant 0 : index
    %c0_60 = arith.constant 0 : index
    %79 = vector.load %arg5[%c0_58, %c0_59, %c0_60] : memref<1x288x128xf32, #tpu.memory_space<vmem>>, vector<1x288x128xf32>
    %80 = vector.shape_cast %79 : vector<1x288x128xf32> to vector<288x128xf32>
    %c0_61 = arith.constant 0 : index
    %c0_62 = arith.constant 0 : index
    %c2 = arith.constant 2 : index
    %c0_63 = arith.constant 0 : index
    %c0_64 = arith.constant 0 : index
    %81 = vector.load %arg2[%c0_61, %c0_62, %c2, %c0_63, %c0_64] : memref<1x3x3x128x128xbf16, #tpu.memory_space<vmem>>, vector<1x1x1x128x128xbf16>
    %82 = vector.shape_cast %81 : vector<1x1x1x128x128xbf16> to vector<128x128xbf16>
    %cst_65 = arith.constant dense<0.000000e+00> : vector<288x128xf32>
    %83 = tpu.matmul %78, %82, %cst_65 {dimension_numbers = #tpu.dot_dimension_numbers<[1], [0], [0], [1], [0, 0, 1, 1], [], []>} : vector<288x128xbf16>, vector<128x128xbf16>, vector<288x128xf32> -> vector<288x128xf32>
    %84 = arith.addf %80, %83 : vector<288x128xf32>
    %c0_66 = arith.constant 0 : index
    %c0_67 = arith.constant 0 : index
    %c0_68 = arith.constant 0 : index
    %85 = vector.load %arg5[%c0_66, %c0_67, %c0_68] : memref<1x288x128xf32, #tpu.memory_space<vmem>>, vector<1x288x128xf32>
    %86 = vector.shape_cast %85 : vector<1x288x128xf32> to vector<288x128xf32>
    %87 = vector.shape_cast %84 : vector<288x128xf32> to vector<1x288x128xf32>
    tpu.vector_store %arg5[%c0_66, %c0_67, %c0_68], %87 {strides = array<i32>} : memref<1x288x128xf32, #tpu.memory_space<vmem>>, vector<1x288x128xf32>,
    %c23 = arith.constant 23 : index
    %c0_69 = arith.constant 0 : index
    %88 = vector.load %arg6[%c23, %c0_69] : memref<336x128xbf16, #tpu.memory_space<vmem>>, vector<288x128xbf16>
    %c0_70 = arith.constant 0 : index
    %c0_71 = arith.constant 0 : index
    %c0_72 = arith.constant 0 : index
    %89 = vector.load %arg5[%c0_70, %c0_71, %c0_72] : memref<1x288x128xf32, #tpu.memory_space<vmem>>, vector<1x288x128xf32>
    %90 = vector.shape_cast %89 : vector<1x288x128xf32> to vector<288x128xf32>
    %c0_73 = arith.constant 0 : index
    %c1_74 = arith.constant 1 : index
    %c0_75 = arith.constant 0 : index
    %c0_76 = arith.constant 0 : index
    %c0_77 = arith.constant 0 : index
    %91 = vector.load %arg2[%c0_73, %c1_74, %c0_75, %c0_76, %c0_77] : memref<1x3x3x128x128xbf16, #tpu.memory_space<vmem>>, vector<1x1x1x128x128xbf16>
    %92 = vector.shape_cast %91 : vector<1x1x1x128x128xbf16> to vector<128x128xbf16>
    %cst_78 = arith.constant dense<0.000000e+00> : vector<288x128xf32>
    %93 = tpu.matmul %88, %92, %cst_78 {dimension_numbers = #tpu.dot_dimension_numbers<[1], [0], [0], [1], [0, 0, 1, 1], [], []>} : vector<288x128xbf16>, vector<128x128xbf16>, vector<288x128xf32> -> vector<288x128xf32>
    %94 = arith.addf %90, %93 : vector<288x128xf32>
    %c0_79 = arith.constant 0 : index
    %c0_80 = arith.constant 0 : index
    %c0_81 = arith.constant 0 : index
    %95 = vector.load %arg5[%c0_79, %c0_80, %c0_81] : memref<1x288x128xf32, #tpu.memory_space<vmem>>, vector<1x288x128xf32>
    %96 = vector.shape_cast %95 : vector<1x288x128xf32> to vector<288x128xf32>
    %97 = vector.shape_cast %94 : vector<288x128xf32> to vector<1x288x128xf32>
    tpu.vector_store %arg5[%c0_79, %c0_80, %c0_81], %97 {strides = array<i32>} : memref<1x288x128xf32, #tpu.memory_space<vmem>>, vector<1x288x128xf32>,
    %c24_82 = arith.constant 24 : index
    %c0_83 = arith.constant 0 : index
    %98 = vector.load %arg6[%c24_82, %c0_83] : memref<336x128xbf16, #tpu.memory_space<vmem>>, vector<288x128xbf16>
    %c0_84 = arith.constant 0 : index
    %c0_85 = arith.constant 0 : index
    %c0_86 = arith.constant 0 : index
    %99 = vector.load %arg5[%c0_84, %c0_85, %c0_86] : memref<1x288x128xf32, #tpu.memory_space<vmem>>, vector<1x288x128xf32>
    %100 = vector.shape_cast %99 : vector<1x288x128xf32> to vector<288x128xf32>
    %c0_87 = arith.constant 0 : index
    %c1_88 = arith.constant 1 : index
    %c1_89 = arith.constant 1 : index
    %c0_90 = arith.constant 0 : index
    %c0_91 = arith.constant 0 : index
    %101 = vector.load %arg2[%c0_87, %c1_88, %c1_89, %c0_90, %c0_91] : memref<1x3x3x128x128xbf16, #tpu.memory_space<vmem>>, vector<1x1x1x128x128xbf16>
    %102 = vector.shape_cast %101 : vector<1x1x1x128x128xbf16> to vector<128x128xbf16>
    %cst_92 = arith.constant dense<0.000000e+00> : vector<288x128xf32>
    %103 = tpu.matmul %98, %102, %cst_92 {dimension_numbers = #tpu.dot_dimension_numbers<[1], [0], [0], [1], [0, 0, 1, 1], [], []>} : vector<288x128xbf16>, vector<128x128xbf16>, vector<288x128xf32> -> vector<288x128xf32>
    %104 = arith.addf %100, %103 : vector<288x128xf32>
    %c0_93 = arith.constant 0 : index
    %c0_94 = arith.constant 0 : index
    %c0_95 = arith.constant 0 : index
    %105 = vector.load %arg5[%c0_93, %c0_94, %c0_95] : memref<1x288x128xf32, #tpu.memory_space<vmem>>, vector<1x288x128xf32>
    %106 = vector.shape_cast %105 : vector<1x288x128xf32> to vector<288x128xf32>
    %107 = vector.shape_cast %104 : vector<288x128xf32> to vector<1x288x128xf32>
    tpu.vector_store %arg5[%c0_93, %c0_94, %c0_95], %107 {strides = array<i32>} : memref<1x288x128xf32, #tpu.memory_space<vmem>>, vector<1x288x128xf32>,
    %c25 = arith.constant 25 : index
    %c0_96 = arith.constant 0 : index
    %108 = vector.load %arg6[%c25, %c0_96] : memref<336x128xbf16, #tpu.memory_space<vmem>>, vector<288x128xbf16>
    %c0_97 = arith.constant 0 : index
    %c0_98 = arith.constant 0 : index
    %c0_99 = arith.constant 0 : index
    %109 = vector.load %arg5[%c0_97, %c0_98, %c0_99] : memref<1x288x128xf32, #tpu.memory_space<vmem>>, vector<1x288x128xf32>
    %110 = vector.shape_cast %109 : vector<1x288x128xf32> to vector<288x128xf32>
    %c0_100 = arith.constant 0 : index
    %c1_101 = arith.constant 1 : index
    %c2_102 = arith.constant 2 : index
    %c0_103 = arith.constant 0 : index
    %c0_104 = arith.constant 0 : index
    %111 = vector.load %arg2[%c0_100, %c1_101, %c2_102, %c0_103, %c0_104] : memref<1x3x3x128x128xbf16, #tpu.memory_space<vmem>>, vector<1x1x1x128x128xbf16>
    %112 = vector.shape_cast %111 : vector<1x1x1x128x128xbf16> to vector<128x128xbf16>
    %cst_105 = arith.constant dense<0.000000e+00> : vector<288x128xf32>
    %113 = tpu.matmul %108, %112, %cst_105 {dimension_numbers = #tpu.dot_dimension_numbers<[1], [0], [0], [1], [0, 0, 1, 1], [], []>} : vector<288x128xbf16>, vector<128x128xbf16>, vector<288x128xf32> -> vector<288x128xf32>
    %114 = arith.addf %110, %113 : vector<288x128xf32>
    %c0_106 = arith.constant 0 : index
    %c0_107 = arith.constant 0 : index
    %c0_108 = arith.constant 0 : index
    %115 = vector.load %arg5[%c0_106, %c0_107, %c0_108] : memref<1x288x128xf32, #tpu.memory_space<vmem>>, vector<1x288x128xf32>
    %116 = vector.shape_cast %115 : vector<1x288x128xf32> to vector<288x128xf32>
    %117 = vector.shape_cast %114 : vector<288x128xf32> to vector<1x288x128xf32>
    tpu.vector_store %arg5[%c0_106, %c0_107, %c0_108], %117 {strides = array<i32>} : memref<1x288x128xf32, #tpu.memory_space<vmem>>, vector<1x288x128xf32>,
    %c39 = arith.constant 39 : index
    %c0_109 = arith.constant 0 : index
    %118 = vector.load %arg6[%c39, %c0_109] : memref<336x128xbf16, #tpu.memory_space<vmem>>, vector<288x128xbf16>
    %c0_110 = arith.constant 0 : index
    %c0_111 = arith.constant 0 : index
    %c0_112 = arith.constant 0 : index
    %119 = vector.load %arg5[%c0_110, %c0_111, %c0_112] : memref<1x288x128xf32, #tpu.memory_space<vmem>>, vector<1x288x128xf32>
    %120 = vector.shape_cast %119 : vector<1x288x128xf32> to vector<288x128xf32>
    %c0_113 = arith.constant 0 : index
    %c2_114 = arith.constant 2 : index
    %c0_115 = arith.constant 0 : index
    %c0_116 = arith.constant 0 : index
    %c0_117 = arith.constant 0 : index
    %121 = vector.load %arg2[%c0_113, %c2_114, %c0_115, %c0_116, %c0_117] : memref<1x3x3x128x128xbf16, #tpu.memory_space<vmem>>, vector<1x1x1x128x128xbf16>
    %122 = vector.shape_cast %121 : vector<1x1x1x128x128xbf16> to vector<128x128xbf16>
    %cst_118 = arith.constant dense<0.000000e+00> : vector<288x128xf32>
    %123 = tpu.matmul %118, %122, %cst_118 {dimension_numbers = #tpu.dot_dimension_numbers<[1], [0], [0], [1], [0, 0, 1, 1], [], []>} : vector<288x128xbf16>, vector<128x128xbf16>, vector<288x128xf32> -> vector<288x128xf32>
    %124 = arith.addf %120, %123 : vector<288x128xf32>
    %c0_119 = arith.constant 0 : index
    %c0_120 = arith.constant 0 : index
    %c0_121 = arith.constant 0 : index
    %125 = vector.load %arg5[%c0_119, %c0_120, %c0_121] : memref<1x288x128xf32, #tpu.memory_space<vmem>>, vector<1x288x128xf32>
    %126 = vector.shape_cast %125 : vector<1x288x128xf32> to vector<288x128xf32>
    %127 = vector.shape_cast %124 : vector<288x128xf32> to vector<1x288x128xf32>
    tpu.vector_store %arg5[%c0_119, %c0_120, %c0_121], %127 {strides = array<i32>} : memref<1x288x128xf32, #tpu.memory_space<vmem>>, vector<1x288x128xf32>,
    %c40_122 = arith.constant 40 : index
    %c0_123 = arith.constant 0 : index
    %128 = vector.load %arg6[%c40_122, %c0_123] : memref<336x128xbf16, #tpu.memory_space<vmem>>, vector<288x128xbf16>
    %c0_124 = arith.constant 0 : index
    %c0_125 = arith.constant 0 : index
    %c0_126 = arith.constant 0 : index
    %129 = vector.load %arg5[%c0_124, %c0_125, %c0_126] : memref<1x288x128xf32, #tpu.memory_space<vmem>>, vector<1x288x128xf32>
    %130 = vector.shape_cast %129 : vector<1x288x128xf32> to vector<288x128xf32>
    %c0_127 = arith.constant 0 : index
    %c2_128 = arith.constant 2 : index
    %c1_129 = arith.constant 1 : index
    %c0_130 = arith.constant 0 : index
    %c0_131 = arith.constant 0 : index
    %131 = vector.load %arg2[%c0_127, %c2_128, %c1_129, %c0_130, %c0_131] : memref<1x3x3x128x128xbf16, #tpu.memory_space<vmem>>, vector<1x1x1x128x128xbf16>
    %132 = vector.shape_cast %131 : vector<1x1x1x128x128xbf16> to vector<128x128xbf16>
    %cst_132 = arith.constant dense<0.000000e+00> : vector<288x128xf32>
    %133 = tpu.matmul %128, %132, %cst_132 {dimension_numbers = #tpu.dot_dimension_numbers<[1], [0], [0], [1], [0, 0, 1, 1], [], []>} : vector<288x128xbf16>, vector<128x128xbf16>, vector<288x128xf32> -> vector<288x128xf32>
    %134 = arith.addf %130, %133 : vector<288x128xf32>
    %c0_133 = arith.constant 0 : index
    %c0_134 = arith.constant 0 : index
    %c0_135 = arith.constant 0 : index
    %135 = vector.load %arg5[%c0_133, %c0_134, %c0_135] : memref<1x288x128xf32, #tpu.memory_space<vmem>>, vector<1x288x128xf32>
    %136 = vector.shape_cast %135 : vector<1x288x128xf32> to vector<288x128xf32>
    %137 = vector.shape_cast %134 : vector<288x128xf32> to vector<1x288x128xf32>
    tpu.vector_store %arg5[%c0_133, %c0_134, %c0_135], %137 {strides = array<i32>} : memref<1x288x128xf32, #tpu.memory_space<vmem>>, vector<1x288x128xf32>,
    %c41 = arith.constant 41 : index
    %c0_136 = arith.constant 0 : index
    %138 = vector.load %arg6[%c41, %c0_136] : memref<336x128xbf16, #tpu.memory_space<vmem>>, vector<288x128xbf16>
    %c0_137 = arith.constant 0 : index
    %c0_138 = arith.constant 0 : index
    %c0_139 = arith.constant 0 : index
    %139 = vector.load %arg5[%c0_137, %c0_138, %c0_139] : memref<1x288x128xf32, #tpu.memory_space<vmem>>, vector<1x288x128xf32>
    %140 = vector.shape_cast %139 : vector<1x288x128xf32> to vector<288x128xf32>
    %c0_140 = arith.constant 0 : index
    %c2_141 = arith.constant 2 : index
    %c2_142 = arith.constant 2 : index
    %c0_143 = arith.constant 0 : index
    %c0_144 = arith.constant 0 : index
    %141 = vector.load %arg2[%c0_140, %c2_141, %c2_142, %c0_143, %c0_144] : memref<1x3x3x128x128xbf16, #tpu.memory_space<vmem>>, vector<1x1x1x128x128xbf16>
    %142 = vector.shape_cast %141 : vector<1x1x1x128x128xbf16> to vector<128x128xbf16>
    %cst_145 = arith.constant dense<0.000000e+00> : vector<288x128xf32>
    %143 = tpu.matmul %138, %142, %cst_145 {dimension_numbers = #tpu.dot_dimension_numbers<[1], [0], [0], [1], [0, 0, 1, 1], [], []>} : vector<288x128xbf16>, vector<128x128xbf16>, vector<288x128xf32> -> vector<288x128xf32>
    %144 = arith.addf %140, %143 : vector<288x128xf32>
    %c0_146 = arith.constant 0 : index
    %c0_147 = arith.constant 0 : index
    %c0_148 = arith.constant 0 : index
    %145 = vector.load %arg5[%c0_146, %c0_147, %c0_148] : memref<1x288x128xf32, #tpu.memory_space<vmem>>, vector<1x288x128xf32>
    %146 = vector.shape_cast %145 : vector<1x288x128xf32> to vector<288x128xf32>
    %147 = vector.shape_cast %144 : vector<288x128xf32> to vector<1x288x128xf32>
    tpu.vector_store %arg5[%c0_146, %c0_147, %c0_148], %147 {strides = array<i32>} : memref<1x288x128xf32, #tpu.memory_space<vmem>>, vector<1x288x128xf32>,
    return
  }
  func.func @transform_0(%arg0: i32) -> (i32, i32, i32, i32, i32) {
    %c0_i32 = arith.constant 0 : i32
    %c0_i32_0 = arith.constant 0 : i32
    %c0_i32_1 = arith.constant 0 : i32
    %c0_i32_2 = arith.constant 0 : i32
    %c0_i32_3 = arith.constant 0 : i32
    return %arg0, %c0_i32, %c0_i32_0, %c0_i32_1, %c0_i32_2 : i32, i32, i32, i32, i32
  }
  func.func @transform_1(%arg0: i32) -> (i32, i32, i32, i32, i32) {
    %c0_i32 = arith.constant 0 : i32
    %c0_i32_0 = arith.constant 0 : i32
    %c0_i32_1 = arith.constant 0 : i32
    %c0_i32_2 = arith.constant 0 : i32
    %c0_i32_3 = arith.constant 0 : i32
    return %arg0, %c0_i32, %c0_i32_0, %c0_i32_1, %c0_i32_2 : i32, i32, i32, i32, i32
  }
  func.func @transform_2(%arg0: i32) -> (i32, i32, i32) {
    %c0_i32 = arith.constant 0 : i32
    %c0_i32_0 = arith.constant 0 : i32
    %c0_i32_1 = arith.constant 0 : i32
    return %arg0, %c0_i32, %c0_i32_0 : i32, i32, i32
  }
  func.func @transform_3(%arg0: i32) -> (i32, i32) {
    %c0_i32 = arith.constant 0 : i32
    %c0_i32_0 = arith.constant 0 : i32
    %c0_i32_1 = arith.constant 0 : i32
    return %c0_i32, %c0_i32_0 : i32, i32
  }
  func.func @transform_4(%arg0: i32) -> (i32, i32, i32) {
    %c0_i32 = arith.constant 0 : i32
    %c0_i32_0 = arith.constant 0 : i32
    %c0_i32_1 = arith.constant 0 : i32
    return %arg0, %c0_i32, %c0_i32_0 : i32, i32, i32
  }
}

</mosaic_0001>

<bundles_post_ra>
// kernel: tpu_custom_call.1
= control target key start
LH: loop header
LB: loop body
LE: loop exit
PB: predicated region body
PF: predicated region fallthrough
CT: control target
= control target key end

     0   :  { %9 = vsyncpa [#allocation4], 0  ;;  %s7556_s0 = inlined_call_operand.hbm [shape: bf16[1,2,8,8,128], index: 0, kind: input, shape index: {}]   ;;  %s7557_s1 = inlined_call_operand.hbm [shape: bf16[1,3,3,128,128], index: 1, kind: input, shape index: {}]   ;;  %s7558_s2 = inlined_call_operand.vmem [shape: f32[1,1,128], index: 2, kind: input, shape index: {}]   ;;  %s7559_s3 = inlined_call_operand.vmem [shape: f32[1,128], index: 3, kind: input, shape index: {}]   ;;  %s7560_s4 = inlined_call_operand.hbm [shape: f32[1,288,128], index: 4, kind: output, shape index: {}]  }
   0x1   :  { %10 = vsyncpa [#allocation7], 0 }
   0x2   :  { %11 = vsyncpa [#allocation5], 0  ;;  %s16_s17 = sshll.u32 %s7556_s0, 4  ;;  %s6553_s18 = smov [#allocation3]   ;;  %s17_s17 = int_to_ptr.hbm [resolvable:$true] %s16_s17 }
   0x3   :  { %s18_s19 = sshll.u32 %s6553_s18, 4  ;;  %s29_s22 = sshll.u32 %s7557_s1, 4  ;;  %s19_s19 = int_to_ptr.vmem [resolvable:$true] %s18_s19  ;;  %s30_s22 = int_to_ptr.hbm [resolvable:$true] %s29_s22 }
   0x4   :  { %s6554_s23 = smov 64   ;;  %s6555_s24 = smov 4  }
   0x5   :  { %24 = dma.hbm_to_vmem [thread:$0]  %s17_s17, 1024, %s19_s19, [#allocation4], %s6554_s23, %s6554_s23, %s6555_s24  }
   0x6   :  { %s6556_s25 = smov [#allocation6]  }
   0x7   :  { %s31_s26 = sshll.u32 %s6556_s25, 4  ;;  %s32_s26 = int_to_ptr.vmem [resolvable:$true] %s31_s26 }
   0x8   :  { %37 = dma.hbm_to_vmem [thread:$0]  %s30_s22, 9216, %s32_s26, [#allocation7], %s6554_s23, %s6554_s23, %s6555_s24  }
   0x9   :  { %6547 = dma.done.wait [#allocation4], 1024  }
   0xa   :  { %6548 = vsyncadd [#allocation4], 4294966272 }
   0xb   :  { %6549 = dma.done.wait [#allocation7], 9216  }
   0xc   :  { %6550 = vsyncadd [#allocation7], 4294958080  ;;  %v6405_v0 = vld [vmem:[#allocation3 + $0x20] sm:$0xff]   ;;  %v6404_v1 = vld [vmem:[#allocation3 + $0x18] sm:$0xff]   ;;  %v6557_v20 = vmov 0   ;;  %s5186_s5 = sshll.u32 %s7560_s4, 4  ;;  %s5187_s5 = int_to_ptr.hbm [resolvable:$true] %s5186_s5 }
   0xd   :  { %v6403_v2 = vld [vmem:[#allocation3 + $0x10] sm:$0xff]   ;;  %v6592_v3 = vunpack.c.l.bf16 %v6405_v0  ;;  %v6594_v4 = vunpack.c.l.bf16 %v6404_v1  ;;  %v6406_v6 = vld [vmem:[#allocation3 + $0x28] sm:$0xff]   ;;  %v6604_v10 = vunpack.c.h.bf16 %v6405_v0  ;;  %v6371_v16 = vld [vmem:[#allocation3] sm:$0xff]   ;;  %v6616_v17 = vunpack.c.h.bf16 %v6404_v1  ;;  %72 = vst [vmem:[#allocation2 + $0x54] sm:$0xf] %v6557_v20  ;;  %s6559_s6 = smov 128  }
   0xe   :  { %v6596_v5 = vunpack.c.l.bf16 %v6403_v2  ;;  %v6606_v11 = vunpack.c.l.bf16 %v6406_v6  ;;  %v6608_v12 = vunpack.c.h.bf16 %v6403_v2  ;;  %v6618_v18 = vunpack.c.h.bf16 %v6406_v6  ;;  %51 = vst [vmem:[#allocation2] sm:$0xf] %v6557_v20  ;;  %v6407_v24 = vld [vmem:[#allocation3 + $0x30] sm:$0xff]   ;;  %v6408_v25 = vld [vmem:[#allocation3 + $0x38] sm:$0xff]   ;;  %v6402_v32 = vld [vmem:[#allocation3 + $0x8] sm:$0xff]   ;;  %s6560_s7 = smov 8  }
   0xf   :  { %v133_v7 = vmul.f32 %v6592_v3, %v6592_v3  ;;  %v131_v8 = vmul.f32 %v6594_v4, %v6594_v4  ;;  %v134_v13 = vmul.f32 %v6604_v10, %v6604_v10  ;;  %v6620_v19 = vunpack.c.l.bf16 %v6371_v16  ;;  %52 = vst [vmem:[#allocation2 + $0x4] sm:$0xf] %v6557_v20  ;;  %v6161_v41 = vld [vmem:[#allocation6 + $0x38] sm:$0xff]  ;;  %v6160_v44 = vld [vmem:[#allocation6 + $0x30] sm:$0xff]  ;;  %v6159_v49 = vld [vmem:[#allocation6 + $0x28] sm:$0xff] }
  0x10   :  { %v129_v9 = vmul.f32 %v6596_v5, %v6596_v5  ;;  %v135_v14 = vmul.f32 %v6606_v11, %v6606_v11  ;;  %v130_v15 = vmul.f32 %v6608_v12, %v6608_v12  ;;  %v132_v21 = vmul.f32 %v6616_v17, %v6616_v17  ;;  %53 = vst [vmem:[#allocation2 + $0x8] sm:$0xf] %v6557_v20  ;;  %v6158_v52 = vld [vmem:[#allocation6 + $0x20] sm:$0xff]  ;;  %v6157_v0 = vld [vmem:[#allocation6 + $0x18] sm:$0xff] }
  0x11   :  { %157 = vadd.xlane.f32.xlu1 %v133_v7  ;;  %153 = vadd.xlane.f32.xlu2 %v131_v8  ;;  %v136_v22 = vmul.f32 %v6618_v18, %v6618_v18  ;;  %v125_v23 = vmul.f32 %v6620_v19, %v6620_v19  ;;  %54 = vst [vmem:[#allocation2 + $0xc] sm:$0xf] %v6557_v20  ;;  %v6634_v26 = vunpack.c.h.bf16 %v6407_v24  ;;  %v6636_v27 = vunpack.c.l.bf16 %v6408_v25 }
  0x12   :  { %149 = vadd.xlane.f32.xlu0 %v129_v9  ;;  %55 = vst [vmem:[#allocation2 + $0x10] sm:$0xf] %v6557_v20  ;;  %v6639_v28 = vunpack.c.h.bf16 %v6371_v16  ;;  %v6654_v33 = vunpack.c.l.bf16 %v6402_v32  ;;  %v6656_v34 = vunpack.c.h.bf16 %v6408_v25  ;;  %v6659_v35 = vunpack.c.l.bf16 %v6407_v24  ;;  %6409 = vmatpush.bf16.msra.mxu1 %v6161_v41 }
  0x13   :  { %56 = vst [vmem:[#allocation2 + $0x14] sm:$0xf] %v6557_v20  ;;  %v138_v29 = vmul.f32 %v6634_v26, %v6634_v26  ;;  %v139_v30 = vmul.f32 %v6636_v27, %v6636_v27  ;;  %v6675_v39 = vunpack.c.h.bf16 %v6402_v32  ;;  %6410 = vmatpush.bf16.msra.mxu2 %v6161_v41  ;;  %876 = vmatpush.bf16.msra.mxu0 %v6161_v41  ;;  %v6757_v32 = vld [vmem:[%s7559_s3] ss:$0 sm:$0xff] }
  0x14   :  { %57 = vst [vmem:[#allocation2 + $0x18] sm:$0xf] %v6557_v20  ;;  %v126_v31 = vmul.f32 %v6639_v28, %v6639_v28  ;;  %v127_v36 = vmul.f32 %v6654_v33, %v6654_v33  ;;  %v140_v37 = vmul.f32 %v6656_v34, %v6656_v34  ;;  %v137_v38 = vmul.f32 %v6659_v35, %v6659_v35 }
  0x15   :  { %58 = vst [vmem:[#allocation2 + $0x1c] sm:$0xf] %v6557_v20  ;;  %v128_v40 = vmul.f32 %v6675_v39, %v6675_v39  ;;  %6411 = vmatpush.bf16.msra.mxu3 %v6161_v41 }
  0x16   :  { %59 = vst [vmem:[#allocation2 + $0x20] sm:$0xf] %v6557_v20  ;;  %6412 = vmatpush.bf16.msra.mxu1 %v6160_v44 }
  0x17   :  { %60 = vst [vmem:[#allocation2 + $0x24] sm:$0xf] %v6557_v20  ;;  %6413 = vmatpush.bf16.msra.mxu2 %v6160_v44  ;;  %877 = vmatpush.bf16.msra.mxu0 %v6160_v44 }
  0x18   :  { %61 = vst [vmem:[#allocation2 + $0x28] sm:$0xf] %v6557_v20 }
  0x19   :  { %159 = vadd.xlane.f32.xlu1 %v134_v13  ;;  %161 = vadd.xlane.f32.xlu2 %v135_v14  ;;  %62 = vst [vmem:[#allocation2 + $0x2c] sm:$0xf] %v6557_v20 }
  0x1a   :  { %151 = vadd.xlane.f32.xlu0 %v130_v15  ;;  %63 = vst [vmem:[#allocation2 + $0x30] sm:$0xf] %v6557_v20  ;;  %6414 = vmatpush.bf16.msra.mxu3 %v6160_v44  ;;  %v6156_v15 = vld [vmem:[#allocation6 + $0x10] sm:$0xff]  ;;  %v6155_v44 = vld [vmem:[#allocation6 + $0x8] sm:$0xff] }
  0x1b   :  { %64 = vst [vmem:[#allocation2 + $0x34] sm:$0xf] %v6557_v20  ;;  %6415 = vmatpush.bf16.msra.mxu1 %v6159_v49  ;;  %6416 = vmatpush.bf16.msra.mxu2 %v6159_v49 }
  0x1c   :  { %65 = vst [vmem:[#allocation2 + $0x38] sm:$0xf] %v6557_v20  ;;  %878 = vmatpush.bf16.msra.mxu0 %v6159_v49 }
  0x1d   :  { %66 = vst [vmem:[#allocation2 + $0x3c] sm:$0xf] %v6557_v20 }
  0x1e   :  { %67 = vst [vmem:[#allocation2 + $0x40] sm:$0xf] %v6557_v20  ;;  %6417 = vmatpush.bf16.msra.mxu3 %v6159_v49 }
  0x1f   :  { %68 = vst [vmem:[#allocation2 + $0x44] sm:$0xf] %v6557_v20  ;;  %6418 = vmatpush.bf16.msra.mxu1 %v6158_v52  ;;  %6419 = vmatpush.bf16.msra.mxu2 %v6158_v52 }
  0x20   :  { %69 = vst [vmem:[#allocation2 + $0x48] sm:$0xf] %v6557_v20  ;;  %879 = vmatpush.bf16.msra.mxu0 %v6158_v52 }
  0x21   :  { %155 = vadd.xlane.f32.xlu1 %v132_v21  ;;  %163 = vadd.xlane.f32.xlu2 %v136_v22  ;;  %70 = vst [vmem:[#allocation2 + $0x4c] sm:$0xf] %v6557_v20 }
  0x22   :  { %141 = vadd.xlane.f32.xlu0 %v125_v23  ;;  %71 = vst [vmem:[#allocation2 + $0x50] sm:$0xf] %v6557_v20  ;;  %6420 = vmatpush.bf16.msra.mxu3 %v6158_v52 }
  0x23   :  { %73 = vst [vmem:[#allocation2 + $0x58] sm:$0xf] %v6557_v20  ;;  %6421 = vmatpush.bf16.msra.mxu1 %v6157_v0  ;;  %6422 = vmatpush.bf16.msra.mxu2 %v6157_v0 }
  0x24   :  { %74 = vst [vmem:[#allocation2 + $0x5c] sm:$0xf] %v6557_v20  ;;  %880 = vmatpush.bf16.msra.mxu0 %v6157_v0 }
  0x25   :  { %75 = vst [vmem:[#allocation2 + $0x60] sm:$0xf] %v6557_v20 }
  0x26   :  { %76 = vst [vmem:[#allocation2 + $0x64] sm:$0xf] %v6557_v20  ;;  %6423 = vmatpush.bf16.msra.mxu3 %v6157_v0 }
  0x27   :  { %77 = vst [vmem:[#allocation2 + $0x68] sm:$0xf] %v6557_v20  ;;  %6424 = vmatpush.bf16.msra.mxu1 %v6156_v15  ;;  %6425 = vmatpush.bf16.msra.mxu2 %v6156_v15 }
  0x28   :  { %78 = vst [vmem:[#allocation2 + $0x6c] sm:$0xf] %v6557_v20  ;;  %881 = vmatpush.bf16.msra.mxu0 %v6156_v15 }
  0x29   :  { %167 = vadd.xlane.f32.xlu1 %v138_v29  ;;  %169 = vadd.xlane.f32.xlu2 %v139_v30  ;;  %79 = vst [vmem:[#allocation2 + $0x70] sm:$0xf] %v6557_v20 }
  0x2a   :  { %143 = vadd.xlane.f32.xlu0 %v126_v31  ;;  %80 = vst [vmem:[#allocation2 + $0x74] sm:$0xf] %v6557_v20  ;;  %6426 = vmatpush.bf16.msra.mxu3 %v6156_v15 }
  0x2b   :  { %81 = vst [vmem:[#allocation2 + $0x78] sm:$0xf] %v6557_v20  ;;  %6427 = vmatpush.bf16.msra.mxu1 %v6155_v44  ;;  %6428 = vmatpush.bf16.msra.mxu2 %v6155_v44 }
  0x2c   :  { %82 = vst [vmem:[#allocation2 + $0x7c] sm:$0xf] %v6557_v20  ;;  %882 = vmatpush.bf16.msra.mxu0 %v6155_v44 }
  0x2d   :  { %83 = vst [vmem:[#allocation2 + $0x80] sm:$0xf] %v6557_v20 }
  0x2e   :  { %84 = vst [vmem:[#allocation2 + $0x84] sm:$0xf] %v6557_v20  ;;  %6429 = vmatpush.bf16.msra.mxu3 %v6155_v44 }
  0x2f   :  { %85 = vst [vmem:[#allocation2 + $0x88] sm:$0xf] %v6557_v20 }
  0x30   :  { %86 = vst [vmem:[#allocation2 + $0x8c] sm:$0xf] %v6557_v20 }
  0x31   :  { %145 = vadd.xlane.f32.xlu1 %v127_v36  ;;  %171 = vadd.xlane.f32.xlu2 %v140_v37  ;;  %87 = vst [vmem:[#allocation2 + $0x90] sm:$0xf] %v6557_v20 }
  0x32   :  { %165 = vadd.xlane.f32.xlu0 %v137_v38  ;;  %88 = vst [vmem:[#allocation2 + $0x94] sm:$0xf] %v6557_v20 }
  0x33   :  { %89 = vst [vmem:[#allocation2 + $0x98] sm:$0xf] %v6557_v20 }
  0x34   :  { %90 = vst [vmem:[#allocation2 + $0x9c] sm:$0xf] %v6557_v20 }
  0x35   :  { %91 = vst [vmem:[#allocation2 + $0xa0] sm:$0xf] %v6557_v20 }
  0x36   :  { %92 = vst [vmem:[#allocation2 + $0xa4] sm:$0xf] %v6557_v20 }
  0x3a   :  { %147 = vadd.xlane.f32.xlu0 %v128_v40 }
  0x84   :  { %v158_v42 = vpop.xlane.xlu1 %157  ;;  %v154_v43 = vpop.xlane.xlu2 %153 }
  0x85   :  { %v6698_v45 = vadd.f32 1e-20, %v158_v42  ;;  %v179_v46 = vadd.f32 1e-20, %v154_v43  ;;  %v150_v47 = vpop.xlane.xlu0 %149 }
  0x86   :  { %v6700_v48 = vadd.f32 1e-20, %v150_v47 }
  0x87   :  { %6443 = vrsqrt.f32 %v6698_v45  ;;  %vm255_vm0 = vweird.f32 %v179_v46  ;;  %vm275_vm2 = vweird.f32 %v6698_v45 }
  0x88   :  { %6445 = vrsqrt.f32 %v179_v46  ;;  %vm235_vm4 = vweird.f32 %v6700_v48 }
  0x89   :  { %6447 = vrsqrt.f32 %v6700_v48 }
  0x8c   :  { %v160_v50 = vpop.xlane.xlu1 %159  ;;  %v162_v51 = vpop.xlane.xlu2 %161 }
  0x8d   :  { %v6704_v53 = vpop.eup %6443  ;;  %v6706_v54 = vadd.f32 1e-20, %v160_v50  ;;  %v6708_v55 = vadd.f32 1e-20, %v162_v51  ;;  %v152_v56 = vpop.xlane.xlu0 %151 }
  0x8e   :  { %v6710_v57 = vpop.eup %6445  ;;  %v270_v58 = vmul.f32 %v6704_v53, %v6698_v45  ;;  %v6714_v59 = vadd.f32 1e-20, %v152_v56  ;;  %vm276_vm3 = vweird.f32 %v6704_v53 }
  0x8f   :  { %v6716_v60 = vpop.eup %6447  ;;  %v250_v61 = vmul.f32 %v6710_v57, %v179_v46  ;;  %6449 = vrsqrt.f32 %v6706_v54  ;;  %vm256_vm1 = vweird.f32 %v6710_v57  ;;  %vm285_vm7 = vweird.f32 %v6706_v54  ;;  %vm277_vm9 = vmor %vm275_vm2, %vm276_vm3 }
  0x90   :  { %v271_v62 = vmul.f32 %v6704_v53, %v270_v58  ;;  %v230_v63 = vmul.f32 %v6716_v60, %v6700_v48  ;;  %6451 = vrsqrt.f32 %v6708_v55  ;;  %vm236_vm5 = vweird.f32 %v6716_v60  ;;  %vm6744_vm6 = vmor %vm255_vm0, %vm256_vm1  ;;  %v6154_v58 = vld [vmem:[#allocation6] sm:$0xff] }
  0x91   :  { %v251_v1 = vmul.f32 %v6710_v57, %v250_v61  ;;  %6453 = vrsqrt.f32 %v6714_v59  ;;  %vm295_vm8 = vweird.f32 %v6708_v55  ;;  %vm245_vm10 = vweird.f32 %v6714_v59  ;;  %vm237_vm11 = vmor %vm235_vm4, %vm236_vm5  ;;  %6430 = vmatpush.bf16.msra.mxu1 %v6154_v58  ;;  %6431 = vmatpush.bf16.msra.mxu2 %v6154_v58 }
  0x92   :  { %v272_v2 = vmul.f32 0.5, %v271_v62  ;;  %v231_v6 = vmul.f32 %v6716_v60, %v230_v63  ;;  %883 = vmatpush.bf16.msra.mxu0 %v6154_v58  ;;  %6432 = vmatpush.bf16.msra.mxu3 %v6154_v58 }
  0x93   :  { %v252_v7 = vmul.f32 0.5, %v251_v1 }
  0x94   :  { %v273_v8 = vsub.f32 1.5, %v272_v2  ;;  %v232_v9 = vmul.f32 0.5, %v231_v6  ;;  %v156_v13 = vpop.xlane.xlu1 %155  ;;  %v164_v14 = vpop.xlane.xlu2 %163 }
  0x95   :  { %v6730_v16 = vpop.eup %6449  ;;  %v253_v20 = vsub.f32 1.5, %v252_v7  ;;  %v6734_v21 = vadd.f32 1e-20, %v156_v13  ;;  %v6736_v22 = vpop.xlane.xlu0 %141  ;;  %v6767_v38 = vadd.f32 1e-20, %v164_v14 }
  0x96   :  { %v6738_v23 = vpop.eup %6451  ;;  %v274_v24 = vmul.f32 %v6704_v53, %v273_v8  ;;  %v233_v29 = vsub.f32 1.5, %v232_v9  ;;  %v280_v30 = vmul.f32 %v6730_v16, %v6706_v54  ;;  %vm286_vm12 = vweird.f32 %v6730_v16 }
  0x97   :  { %v6752_v31 = vpop.eup %6453  ;;  %v254_v36 = vmul.f32 %v6710_v57, %v253_v20  ;;  %v290_v37 = vmul.f32 %v6738_v23, %v6708_v55  ;;  %6455 = vrsqrt.f32 %v6734_v21  ;;  %vm296_vm13 = vweird.f32 %v6738_v23  ;;  %vm287_vm0 = vmor %vm285_vm7, %vm286_vm12 }
  0x98   :  { %v278_v40 = vsel %vm277_vm9, %v6704_v53, %v274_v24  ;;  %v234_v41 = vmul.f32 %v6716_v60, %v233_v29  ;;  %v281_v42 = vmul.f32 %v6730_v16, %v280_v30  ;;  %v240_v43 = vmul.f32 %v6752_v31, %v6714_v59  ;;  %vm6802_vm15 = vmor %vm295_vm8, %vm296_vm13 }
  0x99   :  { %v357_v45 = vmul.f32 %v6592_v3, %v278_v40  ;;  %v258_v46 = vsel %vm6744_vm6, %v6710_v57, %v254_v36  ;;  %v291_v47 = vmul.f32 %v6738_v23, %v290_v37  ;;  %6457 = vrsqrt.f32 %v6767_v38 }
  0x9a   :  { %v355_v49 = vmul.f32 %v6594_v4, %v258_v46  ;;  %v238_v50 = vsel %vm237_vm11, %v6716_v60, %v234_v41  ;;  %v282_v51 = vmul.f32 0.5, %v281_v42  ;;  %v241_v3 = vmul.f32 %v6752_v31, %v240_v43 }
  0x9b   :  { %v377_v52 = vmul.f32 %v6757_v32, %v357_v45  ;;  %v353_v53 = vmul.f32 %v6596_v5, %v238_v50  ;;  %v292_v56 = vmul.f32 0.5, %v291_v47  ;;  %vm246_vm14 = vweird.f32 %v6752_v31 }
  0x9c   :  { %v375_v48 = vmul.f32 %v6757_v32, %v355_v49  ;;  %v283_v57 = vsub.f32 1.5, %v282_v51  ;;  %v242_v4 = vmul.f32 0.5, %v241_v3  ;;  %v168_v5 = vpop.xlane.xlu1 %167  ;;  %v170_v9 = vpop.xlane.xlu2 %169  ;;  %vm265_vm1 = vweird.f32 %v6734_v21  ;;  %vm247_vm2 = vmor %vm245_vm10, %vm246_vm14 }
  0x9d   :  { %v6793_v60 = vpop.eup %6455  ;;  %v393_v61 = vpack.c.bf16 %v377_v52, %v377_v52  ;;  %v373_v62 = vmul.f32 %v6757_v32, %v353_v53  ;;  %v293_v63 = vsub.f32 1.5, %v292_v56  ;;  %v144_v0 = vpop.xlane.xlu0 %143  ;;  %v6815_v14 = vadd.f32 1e-20, %v6736_v22 }
  0x9e   :  { %v391_v1 = vpack.c.bf16 %v375_v48, %v375_v48  ;;  %v284_v2 = vmul.f32 %v6730_v16, %v283_v57  ;;  %v243_v7 = vsub.f32 1.5, %v242_v4  ;;  %v260_v8 = vmul.f32 %v6793_v60, %v6734_v21 }
  0x9f   :  { %409 = vst [vmem:[#allocation2 + $0x54] sm:$0xf] %v393_v61  ;;  %v389_v13 = vpack.c.bf16 %v373_v62, %v373_v62  ;;  %v294_v55 = vmul.f32 %v6738_v23, %v293_v63  ;;  %v6820_v25 = vadd.f32 1e-20, %v168_v5  ;;  %vm266_vm3 = vweird.f32 %v6793_v60 }
  0xa0   :  { %407 = vst [vmem:[#allocation2 + $0x3c] sm:$0xf] %v391_v1  ;;  %v288_v15 = vsel %vm287_vm0, %v6730_v16, %v284_v2  ;;  %v244_v20 = vmul.f32 %v6752_v31, %v243_v7  ;;  %v261_v24 = vmul.f32 %v6793_v60, %v260_v8  ;;  %6459 = vrsqrt.f32 %v6815_v14  ;;  %v6832_v16 = vpop.eup %6457  ;;  %vm6849_vm4 = vmor %vm265_vm1, %vm266_vm3 }
  0xa1   :  { %405 = vst [vmem:[#allocation2 + $0x2c] sm:$0xf] %v389_v13  ;;  %v358_v54 = vmul.f32 %v6604_v10, %v288_v15  ;;  %v298_v29 = vsel %vm6802_vm15, %v6738_v23, %v294_v55  ;;  %6461 = vrsqrt.f32 %v6820_v25  ;;  %v300_v59 = vmul.f32 %v6832_v16, %v6767_v38  ;;  %v6213_v13 = vld [vmem:[#allocation6 + $0xb8] sm:$0xff] }
  0xa2   :  { %v359_v22 = vmul.f32 %v6606_v11, %v298_v29  ;;  %v248_v30 = vsel %vm247_vm2, %v6752_v31, %v244_v20  ;;  %v262_v10 = vmul.f32 0.5, %v261_v24  ;;  %v6842_v41 = vadd.f32 1e-20, %v170_v9  ;;  %v6187_v9 = vld [vmem:[#allocation6 + $0x78] sm:$0xff]  ;;  %1861 = vmatpush.bf16.msrb.mxu2 %v6213_v13 }
  0xa3   :  { %v378_v23 = vmul.f32 %v6757_v32, %v358_v54  ;;  %v354_v36 = vmul.f32 %v6608_v12, %v248_v30  ;;  %v301_v12 = vmul.f32 %v6832_v16, %v300_v59  ;;  %v6854_v43 = vadd.f32 1e-20, %v144_v0  ;;  %1292 = vmatpush.bf16.msrb.mxu1 %v6187_v9  ;;  %v6185_v9 = vld [vmem:[#allocation6 + $0x68] sm:$0xff] }
  0xa4   :  { %v379_v37 = vmul.f32 %v6757_v32, %v359_v22  ;;  %v263_v40 = vsub.f32 1.5, %v262_v10  ;;  %vm305_vm5 = vweird.f32 %v6767_v38  ;;  %6463 = vrsqrt.f32 %v6842_v41  ;;  %v146_v50 = vpop.xlane.xlu1 %145  ;;  %v172_v56 = vpop.xlane.xlu2 %171  ;;  %v6212_v22 = vld [vmem:[#allocation6 + $0xb0] sm:$0xff] }
  0xa5   :  { %v394_v42 = vpack.c.bf16 %v378_v23, %v378_v23  ;;  %v374_v11 = vmul.f32 %v6757_v32, %v354_v36  ;;  %v166_v44 = vpop.xlane.xlu0 %165  ;;  %v302_v49 = vmul.f32 0.5, %v301_v12  ;;  %vm306_vm6 = vweird.f32 %v6832_v16 }
  0xa6   :  { %v395_v45 = vpack.c.bf16 %v379_v37, %v379_v37  ;;  %v264_v46 = vmul.f32 %v6793_v60, %v263_v40  ;;  %v6859_v47 = vpop.eup %6459  ;;  %6465 = vrsqrt.f32 %v6854_v43  ;;  %vm195_vm7 = vweird.f32 %v6815_v14  ;;  %vm6881_vm9 = vmor %vm305_vm5, %vm306_vm6  ;;  %1862 = vmatpush.bf16.msrb.mxu2 %v6212_v22 }
  0xa7   :  { %410 = vst [vmem:[#allocation2 + $0x5c] sm:$0xf] %v394_v42  ;;  %v390_v21 = vpack.c.bf16 %v374_v11, %v374_v11  ;;  %v6863_v51 = vpop.eup %6461  ;;  %v190_v52 = vmul.f32 %v6859_v47, %v6815_v14  ;;  %v6871_v53 = vadd.f32 1e-20, %v166_v44  ;;  %v303_v57 = vsub.f32 1.5, %v302_v49 }
  0xa8   :  { %411 = vst [vmem:[#allocation2 + $0x64] sm:$0xf] %v395_v45  ;;  %v268_v3 = vsel %vm6849_vm4, %v6793_v60, %v264_v46  ;;  %v320_v4 = vmul.f32 %v6863_v51, %v6820_v25  ;;  %vm325_vm8 = vweird.f32 %v6820_v25  ;;  %vm335_vm10 = vweird.f32 %v6842_v41 }
  0xa9   :  { %406 = vst [vmem:[#allocation2 + $0x34] sm:$0xf] %v390_v21  ;;  %v356_v48 = vmul.f32 %v6616_v17, %v268_v3  ;;  %v191_v60 = vmul.f32 %v6859_v47, %v190_v52  ;;  %6467 = vrsqrt.f32 %v6871_v53  ;;  %v6888_v17 = vadd.f32 1e-20, %v146_v50 }
  0xaa   :  { %v304_v62 = vmul.f32 %v6832_v16, %v303_v57  ;;  %v321_v63 = vmul.f32 %v6863_v51, %v320_v4  ;;  %v6893_v5 = vadd.f32 1e-20, %v172_v56  ;;  %v6895_v38 = vpop.eup %6463  ;;  %vm196_vm11 = vweird.f32 %v6859_v47  ;;  %v6141_v57 = vld [vmem:[#allocation2 + $0x28] sm:$0xff] }
  0xab   :  { %v376_v61 = vmul.f32 %v6757_v32, %v356_v48  ;;  %v192_v0 = vmul.f32 0.5, %v191_v60  ;;  %vm326_vm12 = vweird.f32 %v6863_v51  ;;  %vm205_vm13 = vweird.f32 %v6854_v43  ;;  %vm197_vm3 = vmor %vm195_vm7, %vm196_vm11 }
  0xac   :  { %6469 = vrsqrt.f32 %v6888_v17  ;;  %v6901_v1 = vpop.eup %6465  ;;  %v308_v6 = vsel %vm6881_vm9, %v6832_v16, %v304_v62  ;;  %v322_v7 = vmul.f32 0.5, %v321_v63  ;;  %v330_v8 = vmul.f32 %v6895_v38, %v6842_v41  ;;  %v6186_v16 = vld [vmem:[#allocation6 + $0x70] sm:$0xff]  ;;  %vm6923_vm0 = vmor %vm325_vm8, %vm326_vm12 }
  0xad   :  { %v392_v2 = vpack.c.bf16 %v376_v61, %v376_v61  ;;  %v360_v55 = vmul.f32 %v6618_v18, %v308_v6  ;;  %v193_v15 = vsub.f32 1.5, %v192_v0  ;;  %v200_v20 = vmul.f32 %v6901_v1, %v6854_v43  ;;  %v148_v29 = vpop.xlane.xlu0 %147  ;;  %1293 = vmatpush.bf16.msrb.mxu1 %v6186_v16 }
  0xae   :  { %vm315_vm14 = vweird.f32 %v6871_v53  ;;  %v323_v24 = vsub.f32 1.5, %v322_v7  ;;  %v331_v54 = vmul.f32 %v6895_v38, %v330_v8  ;;  %vm336_vm15 = vweird.f32 %v6895_v38  ;;  %v6147_v23 = vld [vmem:[#allocation2 + $0x58] sm:$0xff] }
  0xaf   :  { %408 = vst [vmem:[#allocation2 + $0x44] sm:$0xf] %v392_v2  ;;  %6471 = vrsqrt.f32 %v6893_v5  ;;  %v6915_v18 = vpop.eup %6467  ;;  %v380_v30 = vmul.f32 %v6757_v32, %v360_v55  ;;  %v194_v10 = vmul.f32 %v6859_v47, %v193_v15  ;;  %v201_v36 = vmul.f32 %v6901_v1, %v200_v20  ;;  %vm6954_vm6 = vmor %vm335_vm10, %vm336_vm15 }
  0xb0   :  { %vm206_vm1 = vweird.f32 %v6901_v1  ;;  %vm215_vm2 = vweird.f32 %v6888_v17  ;;  %v324_v59 = vmul.f32 %v6863_v51, %v323_v24  ;;  %v332_v37 = vmul.f32 0.5, %v331_v54  ;;  %v6142_v61 = vld [vmem:[#allocation2 + $0x30] sm:$0xff] }
  0xb1   :  { %v310_v25 = vmul.f32 %v6915_v18, %v6871_v53  ;;  %vm316_vm4 = vweird.f32 %v6915_v18  ;;  %v396_v42 = vpack.c.bf16 %v380_v30, %v380_v30  ;;  %v198_v11 = vsel %vm197_vm3, %v6859_v47, %v194_v10  ;;  %vm207_vm8 = vmor %vm205_vm13, %vm206_vm1  ;;  %1294 = vmatpush.bf16.msrb.mxu1 %v6185_v9 }
  0xb2   :  { %v6938_v40 = vpop.eup %6469  ;;  %v202_v31 = vmul.f32 0.5, %v201_v36  ;;  %v6941_v12 = vadd.f32 1e-20, %v148_v29  ;;  %v349_v44 = vmul.f32 %v6620_v19, %v198_v11  ;;  %v328_v14 = vsel %vm6923_vm0, %v6863_v51, %v324_v59  ;;  %vm6985_vm10 = vmor %vm315_vm14, %vm316_vm4  ;;  %v6184_v11 = vld [vmem:[#allocation6 + $0x60] sm:$0xff] }
  0xb3   :  { %v333_v45 = vsub.f32 1.5, %v332_v37  ;;  %v311_v46 = vmul.f32 %v6915_v18, %v310_v25  ;;  %vm345_vm5 = vweird.f32 %v6893_v5  ;;  %412 = vst [vmem:[#allocation2 + $0x6c] sm:$0xf] %v396_v42  ;;  %v362_v21 = vmul.f32 %v6634_v26, %v328_v14  ;;  %v6211_v42 = vld [vmem:[#allocation6 + $0xa8] sm:$0xff] }
  0xb4   :  { %v203_v47 = vsub.f32 1.5, %v202_v31  ;;  %v210_v49 = vmul.f32 %v6938_v40, %v6888_v17  ;;  %vm216_vm7 = vweird.f32 %v6938_v40  ;;  %v369_v51 = vmul.f32 %v6757_v32, %v349_v44  ;;  %1863 = vmatpush.bf16.msrb.mxu2 %v6211_v42 }
  0xb5   :  { %v6961_v50 = vpop.eup %6471  ;;  %v334_v26 = vmul.f32 %v6895_v38, %v333_v45  ;;  %v312_v3 = vmul.f32 0.5, %v311_v46  ;;  %6473 = vrsqrt.f32 %v6941_v12  ;;  %v382_v41 = vmul.f32 %v6757_v32, %v362_v21  ;;  %vm7004_vm12 = vmor %vm215_vm2, %vm216_vm7  ;;  %v6265_v45 = vld [vmem:[#allocation6 + $0x138] sm:$0xff]  ;;  %1295 = vmatpush.bf16.msrb.mxu1 %v6184_v11 }
  0xb6   :  { %v204_v52 = vmul.f32 %v6901_v1, %v203_v47  ;;  %v211_v56 = vmul.f32 %v6938_v40, %v210_v49  ;;  %v340_v48 = vmul.f32 %v6961_v50, %v6893_v5  ;;  %v385_v4 = vpack.c.bf16 %v369_v51, %v369_v51  ;;  %v5202_v47 = vld [vmem:[#allocation2] sm:$0x8]  ;;  %2867 = vmatpush.bf16.msrb.mxu0 %v6265_v45 }
  0xb7   :  { %v338_v58 = vsel %vm6954_vm6, %v6895_v38, %v334_v26  ;;  %v313_v60 = vsub.f32 1.5, %v312_v3  ;;  %vm346_vm9 = vweird.f32 %v6961_v50  ;;  %v398_v62 = vpack.c.bf16 %v382_v41, %v382_v41  ;;  %v6136_v3 = vld [vmem:[#allocation2] sm:$0xf0] }
  0xb8   :  { %v363_v63 = vmul.f32 %v6636_v27, %v338_v58  ;;  %v208_v0 = vsel %vm207_vm8, %v6901_v1, %v204_v52  ;;  %v212_v2 = vmul.f32 0.5, %v211_v56  ;;  %401 = vst [vmem:[#allocation2 + $0xc] sm:$0xf] %v385_v4  ;;  %v341_v7 = vmul.f32 %v6961_v50, %v340_v48  ;;  %vm7021_vm15 = vmor %vm345_vm5, %vm346_vm9 }
  0xb9   :  { %v350_v43 = vmul.f32 %v6639_v28, %v208_v0  ;;  %v314_v6 = vmul.f32 %v6915_v18, %v313_v60  ;;  %vm225_vm11 = vweird.f32 %v6941_v12  ;;  %414 = vst [vmem:[#allocation2 + $0x7c] sm:$0xf] %v398_v62  ;;  %v685_v8 = vshrl.u32 %v6141_v57, 16 }
  0xba   :  { %v383_v27 = vmul.f32 %v6757_v32, %v363_v63  ;;  %v213_v1 = vsub.f32 1.5, %v212_v2  ;;  %v688_v53 = vshll.u32 %v6141_v57, 16  ;;  %v342_v20 = vmul.f32 0.5, %v341_v7 }
  0xbb   :  { %v6994_v13 = vpop.eup %6473  ;;  %v370_v55 = vmul.f32 %v6757_v32, %v350_v43  ;;  %v318_v28 = vsel %vm6985_vm10, %v6915_v18, %v314_v6  ;;  %v694_v24 = vshrl.u32 %v6142_v61, 16  ;;  %vm639_vm13 = vsmask.f32 4352  ;;  %v6146_v18 = vld [vmem:[#allocation2 + $0x50] sm:$0xff] }
  0xbc   :  { %v399_v54 = vpack.c.bf16 %v383_v27, %v383_v27  ;;  %v361_v29 = vmul.f32 %v6659_v35, %v318_v28  ;;  %v214_v16 = vmul.f32 %v6938_v40, %v213_v1  ;;  %v220_v22 = vmul.f32 %v6994_v13, %v6941_v12 }
  0xbd   :  { %v386_v30 = vpack.c.bf16 %v370_v55, %v370_v55  ;;  %v343_v10 = vsub.f32 1.5, %v342_v20  ;;  %vm226_vm14 = vweird.f32 %v6994_v13  ;;  %v687_v17 = vrot.slane %v685_v8, 3  ;;  %v6143_v8 = vld [vmem:[#allocation2 + $0x38] sm:$0xff] }
  0xbe   :  { %415 = vst [vmem:[#allocation2 + $0x84] sm:$0xf] %v399_v54  ;;  %v381_v36 = vmul.f32 %v6757_v32, %v361_v29  ;;  %v218_v35 = vsel %vm7004_vm12, %v6938_v40, %v214_v16  ;;  %v221_v37 = vmul.f32 %v6994_v13, %v220_v22  ;;  %v690_v25 = vrot.slane %v688_v53, 4  ;;  %vm7039_vm0 = vmor %vm225_vm11, %vm226_vm14  ;;  %v6148_v54 = vld [vmem:[#allocation2 + $0x60] sm:$0xff] }
  0xbf   :  { %402 = vst [vmem:[#allocation2 + $0x14] sm:$0xf] %v386_v30  ;;  %v351_v31 = vmul.f32 %v6654_v33, %v218_v35  ;;  %v344_v44 = vmul.f32 %v6961_v50, %v343_v10  ;;  %v696_v14 = vrot.slane %v694_v24, 3  ;;  %v697_v40 = vshll.u32 %v6142_v61, 16  ;;  %v6137_v41 = vld [vmem:[#allocation2 + $0x8] sm:$0xff]  ;;  %v6239_v30 = vld [vmem:[#allocation6 + $0xf8] sm:$0xff] }
  0xc0   :  { %v397_v46 = vpack.c.bf16 %v381_v36, %v381_v36  ;;  %v222_v21 = vmul.f32 0.5, %v221_v37  ;;  %v7028_v5 = vor.u32 %v690_v25, %v687_v17  ;;  %v730_v19 = vshrl.u32 %v6146_v18, 16  ;;  %v6151_v15 = vld [vmem:[#allocation2 + $0x78] sm:$0xff]  ;;  %v6210_v10 = vld [vmem:[#allocation6 + $0xa0] sm:$0xff]  ;;  %2451 = vmatpush.bf16.msrb.mxu3 %v6239_v30 }
  0xc1   :  { %v371_v49 = vmul.f32 %v6757_v32, %v351_v31  ;;  %v348_v51 = vsel %vm7021_vm15, %v6961_v50, %v344_v44  ;;  %v699_v33 = vrot.slane %v697_v40, 4  ;;  %v733_v26 = vshll.u32 %v6146_v18, 16  ;;  %1864 = vmatpush.bf16.msrb.mxu2 %v6210_v10 }
  0xc2   :  { %413 = vst [vmem:[#allocation2 + $0x74] sm:$0xf] %v397_v46  ;;  %v364_v52 = vmul.f32 %v6656_v34, %v348_v51  ;;  %v223_v56 = vsub.f32 1.5, %v222_v21  ;;  %v732_v48 = vrot.slane %v730_v19, 3  ;;  %v739_v57 = vshrl.u32 %v6147_v23, 16  ;;  %v6183_v46 = vld [vmem:[#allocation6 + $0x58] sm:$0xff] }
  0xc3   :  { %v387_v4 = vpack.c.bf16 %v371_v49, %v371_v49  ;;  %v7043_v50 = vor.u32 %v699_v33, %v696_v14  ;;  %v735_v60 = vrot.slane %v733_v26, 4  ;;  %v742_v61 = vshll.u32 %v6147_v23, 16  ;;  %v6264_v21 = vld [vmem:[#allocation6 + $0x130] sm:$0xff]  ;;  %v6209_v51 = vld [vmem:[#allocation6 + $0x98] sm:$0xff]  ;;  %1296 = vmatpush.bf16.msrb.mxu1 %v6183_v46 }
  0xc4   :  { %v384_v62 = vmul.f32 %v6757_v32, %v364_v52  ;;  %v224_v34 = vmul.f32 %v6994_v13, %v223_v56  ;;  %v741_v63 = vrot.slane %v739_v57, 3  ;;  %v5203_v0 = vor.u32 %v6136_v3, %v5202_v47  ;;  %2868 = vmatpush.bf16.msrb.mxu0 %v6264_v21 }
  0xc5   :  { %403 = vst [vmem:[#allocation2 + $0x1c] sm:$0xf] %v387_v4  ;;  %v701_v38 = vsel %vm639_vm13, %v7028_v5, %v7043_v50  ;;  %v7050_v12 = vor.u32 %v735_v60, %v732_v48  ;;  %v744_v2 = vrot.slane %v742_v61, 4  ;;  %v649_v43 = vshrl.u32 %v6137_v41, 16  ;;  %v6152_v29 = vld [vmem:[#allocation2 + $0x80] sm:$0xff]  ;;  %v6237_v48 = vld [vmem:[#allocation6 + $0xe8] sm:$0xff]  ;;  %1865 = vmatpush.bf16.msrb.mxu2 %v6209_v51 }
  0xc6   :  { %v400_v6 = vpack.c.bf16 %v384_v62, %v384_v62  ;;  %v228_v7 = vsel %vm7039_vm0, %v6994_v13, %v224_v34  ;;  %909 = vmatmul.bf16.vlgmr.msra.gmra.mxu1 %v701_v38  ;;  %v641_v27 = vshrl.u32 %v5203_v0, 16  ;;  %v644_v1 = vshll.u32 %v5203_v0, 16  ;;  %v6138_v14 = vld [vmem:[#allocation2 + $0x10] sm:$0xff]  ;;  %v6236_v0 = vld [vmem:[#allocation6 + $0xe0] sm:$0xff] }
  0xc7   :  { %v352_v53 = vmul.f32 %v6675_v39, %v228_v7  ;;  %v7056_v9 = vor.u32 %v744_v2, %v741_v63  ;;  %v651_v55 = vrot.slane %v649_v43, 3  ;;  %v652_v28 = vshll.u32 %v6137_v41, 16  ;;  %v6144_v63 = vld [vmem:[#allocation2 + $0x40] sm:$0xff]  ;;  %v6149_v43 = vld [vmem:[#allocation2 + $0x68] sm:$0xff] }
  0xc8   :  { %416 = vst [vmem:[#allocation2 + $0x8c] sm:$0xf] %v400_v6  ;;  %v643_v20 = vrot.slane %v641_v27, 3  ;;  %v646_v24 = vrot.slane %v644_v1, 4  ;;  %v703_v39 = vshrl.u32 %v6143_v8, 16  ;;  %v706_v36 = vshll.u32 %v6143_v8, 16 }
  0xc9   :  { %v372_v16 = vmul.f32 %v6757_v32, %v352_v53  ;;  %v746_v13 = vsel %vm639_vm13, %v7050_v12, %v7056_v9  ;;  %v654_v22 = vrot.slane %v652_v28, 4  ;;  %v775_v35 = vshrl.u32 %v6151_v15, 16  ;;  %v6238_v32 = vld [vmem:[#allocation6 + $0xf0] sm:$0xff]  ;;  %v6263_v28 = vld [vmem:[#allocation6 + $0x128] sm:$0xff]  ;;  %v6180_v51 = vld [vmem:[#allocation6 + $0x40] sm:$0xff] }
  0xca   :  { %934 = vmatmul.bf16.vlgmr.msra.gmra.mxu2 %v746_v13  ;;  %v647_v18 = vor.u32 %v646_v24, %v643_v20  ;;  %v748_v59 = vshrl.u32 %v6148_v54, 16  ;;  %v778_v37 = vshll.u32 %v6151_v15, 16  ;;  %v784_v25 = vshrl.u32 %v6152_v29, 16  ;;  %2452 = vmatpush.bf16.msrb.mxu3 %v6238_v32  ;;  %v6182_v8 = vld [vmem:[#allocation6 + $0x50] sm:$0xff]  ;;  %v493_v24 = vld [vmem:[#allocation2 + $0x90] sm:$0xf] }
  0xcb   :  { %v388_v17 = vpack.c.bf16 %v372_v16, %v372_v16  ;;  %v7062_v23 = vor.u32 %v654_v22, %v651_v55  ;;  %v751_v11 = vshll.u32 %v6148_v54, 16  ;;  %v777_v31 = vrot.slane %v775_v35, 3  ;;  %v6208_v15 = vld [vmem:[#allocation6 + $0x90] sm:$0xff]  ;;  %1297 = vmatpush.bf16.msrb.mxu1 %v6182_v8  ;;  %2869 = vmatpush.bf16.msrb.mxu0 %v6263_v28 }
  0xcc   :  { %v787_v44 = vshll.u32 %v6152_v29, 16  ;;  %v780_v40 = vrot.slane %v778_v37, 4  ;;  %v786_v45 = vrot.slane %v784_v25, 3  ;;  %v705_v19 = vrot.slane %v703_v39, 3  ;;  %v6139_v13 = vld [vmem:[#allocation2 + $0x18] sm:$0xff]  ;;  %1866 = vmatpush.bf16.msrb.mxu2 %v6208_v15  ;;  %v6262_v39 = vld [vmem:[#allocation6 + $0x120] sm:$0xff] }
  0xcd   :  { %404 = vst [vmem:[#allocation2 + $0x24] sm:$0xf] %v388_v17  ;;  %v656_v42 = vsel %vm639_vm13, %v647_v18, %v7062_v23  ;;  %v708_v47 = vrot.slane %v706_v36, 4  ;;  %v750_v33 = vrot.slane %v748_v59, 3  ;;  %v753_v3 = vrot.slane %v751_v11, 4  ;;  %v6234_v22 = vld [vmem:[#allocation6 + $0xd0] sm:$0xff] }
  0xce   :  { %884 = vmatmul.bf16.vlgmr.msra.gmra.mxu0 %v656_v42  ;;  %v789_v49 = vrot.slane %v787_v44, 4  ;;  %v7066_v26 = vor.u32 %v780_v40, %v777_v31  ;;  %v658_v52 = vshrl.u32 %v6138_v14, 16  ;;  %v661_v56 = vshll.u32 %v6138_v14, 16  ;;  %2453 = vmatpush.bf16.msrb.mxu3 %v6237_v48  ;;  %v6181_v18 = vld [vmem:[#allocation6 + $0x48] sm:$0xff]  ;;  %v6232_v14 = vld [vmem:[#allocation6 + $0xc0] sm:$0xff] }
  0xcf   :  { %v709_v57 = vor.u32 %v708_v47, %v705_v19  ;;  %v6153_v58 = vld [vmem:[#allocation2 + $0x88] sm:$0xff]  ;;  %v754_v61 = vor.u32 %v753_v3, %v750_v33  ;;  %v712_v27 = vshrl.u32 %v6144_v63, 16  ;;  %v715_v1 = vshll.u32 %v6144_v63, 16  ;;  %1298 = vmatpush.bf16.msrb.mxu1 %v6181_v18  ;;  %2870 = vmatpush.bf16.msrb.mxu0 %v6262_v39  ;;  %v6150_v47 = vld [vmem:[#allocation2 + $0x70] sm:$0xff]  ;;  %v6261_v33 = vld [vmem:[#allocation6 + $0x118] sm:$0xff] }
  0xd0   :  { %v790_v41 = vor.u32 %v789_v49, %v786_v45  ;;  %v660_v62 = vrot.slane %v658_v52, 3  ;;  %v663_v34 = vrot.slane %v661_v56, 4  ;;  %v793_v38 = vshrl.u32 %v6153_v58, 16  ;;  %v6145_v40 = vld [vmem:[#allocation2 + $0x48] sm:$0xff]  ;;  %v6207_v49 = vld [vmem:[#allocation6 + $0x88] sm:$0xff]  ;;  %v6317_v18 = vld [vmem:[#allocation6 + $0x1b8] sm:$0xff] }
  0xd1   :  { %v710_v60 = vsel %vm639_vm13, %v7043_v50, %v709_v57  ;;  %v796_v2 = vshll.u32 %v6153_v58, 16  ;;  %v755_v6 = vsel %vm639_vm13, %v7056_v9, %v754_v61  ;;  %v6235_v50 = vld [vmem:[#allocation6 + $0xd8] sm:$0xff]  ;;  %v757_v20 = vshrl.u32 %v6149_v43, 16  ;;  %1867 = vmatpush.bf16.msrb.mxu2 %v6207_v49 }
  0xd2   :  { %v791_v4 = vsel %vm639_vm13, %v7066_v26, %v790_v41  ;;  %v7074_v7 = vor.u32 %v663_v34, %v660_v62  ;;  %2454 = vmatpush.bf16.msrb.mxu3 %v6236_v0  ;;  %v795_v53 = vrot.slane %v793_v38, 3  ;;  %v714_v9 = vrot.slane %v712_v27, 3  ;;  %v5514_v0 = vld [vmem:[#allocation2 + $0x8] sm:$0x8]  ;;  %v6214_v27 = vld [vmem:[#allocation2 + $0x8] sm:$0xf0] }
  0xd3   :  { %959 = vmatmul.bf16.vlgmr.msra.gmra.mxu3 %v791_v4  ;;  %v798_v55 = vrot.slane %v796_v2, 4  ;;  %v717_v29 = vrot.slane %v715_v1, 4  ;;  %v760_v16 = vshll.u32 %v6149_v43, 16  ;;  %v619_v10 = vunpack.c.l.b16 %v493_v24  ;;  %1299 = vmatpush.bf16.msrb.mxu1 %v6180_v51 }
  0xd4   :  { %v665_v54 = vsel %vm639_vm13, %v7062_v23, %v7074_v7  ;;  %v759_v17 = vrot.slane %v757_v20, 3  ;;  %v667_v59 = vshrl.u32 %v6139_v13, 16  ;;  %v670_v37 = vshll.u32 %v6139_v13, 16  ;;  %v6233_v23 = vld [vmem:[#allocation6 + $0xc8] sm:$0xff]  ;;  %v6140_v58 = vld [vmem:[#allocation2 + $0x20] sm:$0xff]  ;;  %2871 = vmatpush.bf16.msrb.mxu0 %v6261_v33 }
  0xd5   :  { %v799_v30 = vor.u32 %v798_v55, %v795_v53  ;;  %v718_v36 = vor.u32 %v717_v29, %v714_v9  ;;  %v762_v35 = vrot.slane %v760_v16, 4  ;;  %v638_v32 = vpack.c.b16 %v619_v10, %v619_v10  ;;  %v6291_v13 = vld [vmem:[#allocation6 + $0x178] sm:$0xff]  ;;  %v6258_v10 = vld [vmem:[#allocation6 + $0x100] sm:$0xff] }
  0xd6   :  { %914 = vmatmul.bf16.gmra.mxu1 %v710_v60  ;;  %2455 = vmatpush.bf16.msrb.mxu3 %v6235_v50  ;;  %v669_v31 = vrot.slane %v667_v59, 3  ;;  %v672_v44 = vrot.slane %v670_v37, 4  ;;  %v721_v3 = vshrl.u32 %v6145_v40, 16  ;;  %v769_v4 = vshll.u32 %v6150_v47, 16  ;;  %v6206_v60 = vld [vmem:[#allocation6 + $0x80] sm:$0xff]  ;;  %v6215_v50 = vld [vmem:[#allocation2 + $0x10] sm:$0xff] }
  0xd7   :  { %v800_v25 = vsel %vm639_vm13, %v790_v41, %v799_v30  ;;  %v719_v42 = vsel %vm639_vm13, %v709_v57, %v718_v36  ;;  %v763_v11 = vor.u32 %v762_v35, %v759_v17  ;;  %v802_v45 = vshrl.u32 %v638_v32, 16  ;;  %1868 = vmatpush.bf16.msrb.mxu2 %v6206_v60  ;;  %3435 = vmatpush.bf16.msra.mxu1 %v6291_v13  ;;  %v6343_v59 = vld [vmem:[#allocation6 + $0x1f8] sm:$0xff] }
  0xd8   :  { %v805_v46 = vshll.u32 %v638_v32, 16  ;;  %v673_v19 = vor.u32 %v672_v44, %v669_v31  ;;  %v724_v41 = vshll.u32 %v6145_v40, 16  ;;  %v766_v57 = vshrl.u32 %v6150_v47, 16  ;;  %v6216_v32 = vld [vmem:[#allocation2 + $0x18] sm:$0xff]  ;;  %v6369_v47 = vld [vmem:[#allocation6 + $0x238] sm:$0xff] }
  0xd9   :  { %v764_v21 = vsel %vm639_vm13, %v754_v61, %v763_v11  ;;  %v804_v52 = vrot.slane %v802_v45, 3  ;;  %v6260_v61 = vld [vmem:[#allocation6 + $0x110] sm:$0xff]  ;;  %v723_v62 = vrot.slane %v721_v3, 3  ;;  %v771_v2 = vrot.slane %v769_v4, 4  ;;  %v6162_v3 = vld [vmem:[#allocation2 + $0x4] sm:$0xff] }
  0xda   :  { %939 = vmatmul.bf16.gmra.mxu2 %v755_v6  ;;  %2456 = vmatpush.bf16.msrb.mxu3 %v6234_v22  ;;  %v807_v56 = vrot.slane %v805_v46, 4  ;;  %v674_v48 = vsel %vm639_vm13, %v7074_v7, %v673_v19  ;;  %v726_v34 = vrot.slane %v724_v41, 4  ;;  %v768_v38 = vrot.slane %v766_v57, 3  ;;  %v6259_v22 = vld [vmem:[#allocation6 + $0x108] sm:$0xff]  ;;  %v6290_v4 = vld [vmem:[#allocation6 + $0x170] sm:$0xff] }
  0xdb   :  { %v676_v43 = vshrl.u32 %v6140_v58, 16  ;;  %v679_v6 = vshll.u32 %v6140_v58, 16  ;;  %2872 = vmatpush.bf16.msrb.mxu0 %v6260_v61  ;;  %v5515_v8 = vor.u32 %v6214_v27, %v5514_v0  ;;  %v2224_v20 = vshrl.u32 %v6215_v50, 16  ;;  %4025 = vmatpush.bf16.msra.mxu2 %v6317_v18  ;;  %v6240_v61 = vld [vmem:[#allocation2 + $0xc] sm:$0xff] }
  0xdc   :  { %v808_v63 = vor.u32 %v807_v56, %v804_v52  ;;  %v727_v1 = vor.u32 %v726_v34, %v723_v62  ;;  %v772_v55 = vor.u32 %v771_v2, %v768_v38  ;;  %v2227_v24 = vshll.u32 %v6215_v50, 16  ;;  %3436 = vmatpush.bf16.msra.mxu1 %v6290_v4  ;;  %v6190_v62 = vld [vmem:[#allocation2 + $0x14] sm:$0xff]  ;;  %v6163_v2 = vld [vmem:[#allocation2 + $0xc] sm:$0xff] }
  0xdd   :  { %v678_v28 = vrot.slane %v676_v43, 3  ;;  %v681_v15 = vrot.slane %v679_v6, 4  ;;  %v2216_v29 = vshrl.u32 %v5515_v8, 16  ;;  %v2219_v16 = vshll.u32 %v5515_v8, 16  ;;  %v6316_v34 = vld [vmem:[#allocation6 + $0x1b0] sm:$0xff]  ;;  %v6218_v27 = vld [vmem:[#allocation2 + $0x28] sm:$0xff] }
  0xde   :  { %889 = vmatmul.bf16.gmra.mxu0 %v665_v54  ;;  %2457 = vmatpush.bf16.msrb.mxu3 %v6233_v23  ;;  %v809_v7 = vsel %vm639_vm13, %v799_v30, %v808_v63  ;;  %v728_v53 = vsel %vm639_vm13, %v718_v36, %v727_v1  ;;  %v773_v54 = vsel %vm639_vm13, %v763_v11, %v772_v55  ;;  %v2226_v39 = vrot.slane %v2224_v20, 3 }
  0xdf   :  { %v682_v9 = vor.u32 %v681_v15, %v678_v28  ;;  %v2229_v30 = vrot.slane %v2227_v24, 4  ;;  %2873 = vmatpush.bf16.msrb.mxu0 %v6259_v22  ;;  %v2218_v36 = vrot.slane %v2216_v29, 3  ;;  %v2221_v35 = vrot.slane %v2219_v16, 4  ;;  %4026 = vmatpush.bf16.msra.mxu2 %v6316_v34  ;;  %v6191_v28 = vld [vmem:[#allocation2 + $0x1c] sm:$0xff]  ;;  %v6219_v29 = vld [vmem:[#allocation2 + $0x30] sm:$0xff] }
  0xe0   :  { %v2233_v11 = vshrl.u32 %v6216_v32, 16  ;;  %v2236_v31 = vshll.u32 %v6216_v32, 16  ;;  %v782_v44 = vsel %vm639_vm13, %v772_v55, %v7066_v26  ;;  %v6217_v26 = vld [vmem:[#allocation2 + $0x20] sm:$0xff]  ;;  %vm1646_vm1 = vsmask.f32 7424  ;;  %v6241_v55 = vld [vmem:[#allocation2 + $0x14] sm:$0xff] }
  0xe1   :  { %v683_v17 = vsel %vm639_vm13, %v673_v19, %v682_v9  ;;  %v2230_v37 = vor.u32 %v2229_v30, %v2226_v39  ;;  %v2222_v23 = vor.u32 %v2221_v35, %v2218_v36  ;;  %v692_v46 = vsel %vm639_vm13, %v682_v9, %v7028_v5  ;;  %v6164_v16 = vld [vmem:[#allocation2 + $0x14] sm:$0xff] }
  0xe2   :  { %2458 = vmatpush.bf16.msrb.mxu3 %v6232_v14  ;;  %v6188_v14 = vld [vmem:[#allocation2 + $0x4] sm:$0xff]  ;;  %v2235_v40 = vrot.slane %v2233_v11, 3  ;;  %v2238_v45 = vrot.slane %v2236_v31, 4  ;;  %v2245_v57 = vshll.u32 %v6217_v26, 16  ;;  %v1663_v0 = vshll.u32 %v6190_v62, 16  ;;  %v6289_v32 = vld [vmem:[#allocation6 + $0x168] sm:$0xff] }
  0xe3   :  { %964 = vmatmul.bf16.gmra.mxu3 %v800_v25  ;;  %2874 = vmatpush.bf16.msrb.mxu0 %v6258_v10  ;;  %v2231_v25 = vsel %vm639_vm13, %v2222_v23, %v2230_v37  ;;  %v1650_v19 = vshll.u32 %v6188_v14, 16  ;;  %v2251_v50 = vshrl.u32 %v6218_v27, 16  ;;  %v2254_v8 = vshll.u32 %v6218_v27, 16 }
  0xe4   :  { %v2239_v49 = vor.u32 %v2238_v45, %v2235_v40  ;;  %v2247_v60 = vrot.slane %v2245_v57, 4  ;;  %v1665_v6 = vrot.slane %v1663_v0, 1  ;;  %v1671_v24 = vshll.u32 %v6191_v28, 16  ;;  %3437 = vmatpush.bf16.msra.mxu1 %v6289_v32  ;;  %v6165_v40 = vld [vmem:[#allocation2 + $0x1c] sm:$0xff]  ;;  %v6193_v57 = vld [vmem:[#allocation2 + $0x2c] sm:$0xff] }
  0xe5   :  { %v1652_v51 = vrot.slane %v1650_v19, 1  ;;  %v2253_v15 = vrot.slane %v2251_v50, 3  ;;  %v2256_v20 = vrot.slane %v2254_v8, 4  ;;  %v1667_v13 = vshrl.u32 %v6190_v62, 16  ;;  %v6315_v19 = vld [vmem:[#allocation6 + $0x1a8] sm:$0xff] }
  0xe6   :  { %919 = vmatmul.bf16.gmra.mxu1 %v719_v42  ;;  %4441 = vmatpush.bf16.msra.mxu3 %v6343_v59  ;;  %v737_v42 = vsel %vm639_vm13, %v727_v1, %v7050_v12  ;;  %v1648_v12 = vshrl.u32 %v6188_v14, 16  ;;  %v2240_v41 = vsel %vm639_vm13, %v2230_v37, %v2239_v49  ;;  %v1673_v22 = vrot.slane %v1671_v24, 1  ;;  %v6242_v59 = vld [vmem:[#allocation2 + $0x1c] sm:$0xff]  ;;  %v6192_v37 = vld [vmem:[#allocation2 + $0x24] sm:$0xff] }
  0xe7   :  { %5009 = vmatpush.bf16.msra.mxu0 %v6369_v47  ;;  %v1669_v18 = vor.u32 %v1667_v13, %v1665_v6  ;;  %v2260_v39 = vshrl.u32 %v6219_v29, 16  ;;  %v2263_v30 = vshll.u32 %v6219_v29, 16  ;;  %v1675_v31 = vshrl.u32 %v6191_v28, 16  ;;  %4027 = vmatpush.bf16.msra.mxu2 %v6315_v19  ;;  %v7123_v29 = vld [vmem:[#allocation2 + $0x34] sm:$0xff]  ;;  %v6314_v19 = vld [vmem:[#allocation6 + $0x1a0] sm:$0xff] }
  0xe8   :  { %v1653_v52 = vor.u32 %v1652_v51, %v1648_v12  ;;  %v1683_v4 = vshrl.u32 %v6192_v37, 16  ;;  %v1687_v62 = vshll.u32 %v6193_v57, 16 }
  0xe9   :  { %v1674_v10 = vsel %vm1646_vm1, %v1669_v18, %v1673_v22  ;;  %v2262_v36 = vrot.slane %v2260_v39, 3  ;;  %v2265_v35 = vrot.slane %v2263_v30, 4  ;;  %v6367_v39 = vld [vmem:[#allocation6 + $0x228] sm:$0xff]  ;;  %v1695_v30 = vshll.u32 %v7123_v29, 16 }
  0xea   :  { %944 = vmatmul.bf16.gmra.mxu2 %v764_v21  ;;  %v6189_v21 = vld [vmem:[#allocation2 + $0xc] sm:$0xff]  ;;  %v1689_v27 = vrot.slane %v1687_v62, 1  ;;  %v1699_v62 = vshrl.u32 %v7123_v29, 16  ;;  %v6246_v29 = vld [vmem:[#allocation2 + $0x3c] sm:$0xff] }
  0xeb   :  { %v1655_v33 = vshll.u32 %v6189_v21, 16  ;;  %v1659_v43 = vshrl.u32 %v6189_v21, 16  ;;  %v2266_v23 = vor.u32 %v2265_v35, %v2262_v36  ;;  %v1677_v21 = vor.u32 %v1675_v31, %v1673_v22  ;;  %4028 = vmatpush.bf16.msra.mxu2 %v6314_v19 }
  0xec   :  { %v1697_v32 = vrot.slane %v1695_v30, 1 }
  0xed   :  { %v1657_v56 = vrot.slane %v1655_v33, 1 }
  0xee   :  { %894 = vmatmul.bf16.gmra.mxu0 %v674_v48  ;;  %v2242_v48 = vshrl.u32 %v6217_v26, 16 }
  0xef   :  { %v1658_v5 = vsel %vm1646_vm1, %v1653_v52, %v1657_v56  ;;  %v1661_v1 = vor.u32 %v1659_v43, %v1657_v56 }
  0xf0   :  { %v2244_v58 = vrot.slane %v2242_v48, 3 }
  0xf2   :  { %v2248_v63 = vor.u32 %v2247_v60, %v2244_v58 }
  0xf3   :  { %969 = vmatmul.bf16.gmra.mxu3 %v809_v7  ;;  %v1666_v7 = vsel %vm1646_vm1, %v1661_v1, %v1665_v6 }
  0xf4   :  { %v2249_v38 = vsel %vm639_vm13, %v2239_v49, %v2248_v63 }
  0xf6   :  { %924 = vmatmul.bf16.gmra.mxu1 %v728_v53  ;;  %v6342_v53 = vld [vmem:[#allocation6 + $0x1f0] sm:$0xff] }
  0xf7   :  { %4442 = vmatpush.bf16.msra.mxu3 %v6342_v53 }
  0xfa   :  { %949 = vmatmul.bf16.gmra.mxu2 %v773_v54  ;;  %v2257_v54 = vor.u32 %v2256_v20, %v2253_v15 }
  0xfc   :  { %v2258_v9 = vsel %vm639_vm13, %v2248_v63, %v2257_v54  ;;  %v6221_v63 = vld [vmem:[#allocation2 + $0x40] sm:$0xff] }
  0xfd   :  { %v2281_v50 = vshll.u32 %v6221_v63, 16 }
  0xfe   :  { %899 = vmatmul.bf16.gmra.mxu0 %v683_v17  ;;  %v6368_v17 = vld [vmem:[#allocation6 + $0x230] sm:$0xff] }
  0xff   :  { %5010 = vmatpush.bf16.msra.mxu0 %v6368_v17  ;;  %v2283_v20 = vrot.slane %v2281_v50, 4 }
 0x103   :  { %2459 = vmatmul.bf16.vlgmr.msrb.gmra.mxu3 %v2231_v25  ;;  %v7104_v25 = vld [vmem:[%s7558_s2] ss:$0 sm:$0xff]  ;;  %5011 = vmatpush.bf16.msra.mxu0 %v6367_v39  ;;  %s6558_s2 = smov [#allocation8]  }
 0x104   :  { %s5184_s28 = sshll.u32 %s6558_s2, 4  ;;  %s5185_s28 = int_to_ptr.vmem [resolvable:$true] %s5184_s28 }
 0x106   :  { %929 = vmatmul.bf16.gmra.mxu1 %v737_v42  ;;  %v1679_v42 = vshll.u32 %v6192_v37, 16 }
 0x108   :  { %v1681_v45 = vrot.slane %v1679_v42, 1  ;;  %v6222_v42 = vld [vmem:[#allocation2 + $0x48] sm:$0xff] }
 0x10a   :  { %954 = vmatmul.bf16.gmra.mxu2 %v782_v44  ;;  %v2267_v44 = vsel %vm639_vm13, %v2257_v54, %v2266_v23  ;;  %v1682_v47 = vsel %vm1646_vm1, %v1677_v21, %v1681_v45  ;;  %v1685_v43 = vor.u32 %v1683_v4, %v1681_v45  ;;  %v6244_v54 = vld [vmem:[#allocation2 + $0x2c] sm:$0xff]  ;;  %v2290_v21 = vshll.u32 %v6222_v42, 16 }
 0x10c   :  { %v1690_v53 = vsel %vm1646_vm1, %v1685_v43, %v1689_v27 }
 0x10e   :  { %904 = vmatmul.bf16.gmra.mxu0 %v692_v46  ;;  %v6220_v46 = vld [vmem:[#allocation2 + $0x38] sm:$0xff] }
 0x10f   :  { %v2269_v49 = vshrl.u32 %v6220_v46, 16  ;;  %v2272_v12 = vshll.u32 %v6220_v46, 16  ;;  %v2287_v46 = vshrl.u32 %v6222_v42, 16  ;;  %v6169_v42 = vld [vmem:[#allocation2 + $0x3c] sm:$0xff] }
 0x111   :  { %v2271_v52 = vrot.slane %v2269_v49, 3  ;;  %v2274_v56 = vrot.slane %v2272_v12, 4 }
 0x113   :  { %2464 = vmatmul.bf16.gmra.mxu3 %v2240_v41  ;;  %v6243_v41 = vld [vmem:[#allocation2 + $0x24] sm:$0xff]  ;;  %v2275_v58 = vor.u32 %v2274_v56, %v2271_v52 }
 0x115   :  { %v2276_v34 = vsel %vm639_vm13, %v2266_v23, %v2275_v58  ;;  %v1691_v23 = vshrl.u32 %v6193_v57, 16 }
 0x116   :  { %1300 = vmatmul.bf16.vlgmr.msrb.gmra.mxu1 %v6162_v3 }
 0x117   :  { %v1693_v31 = vor.u32 %v1691_v23, %v1689_v27  ;;  %v6224_v23 = vld [vmem:[#allocation2 + $0x58] sm:$0xff] }
 0x119   :  { %v1698_v45 = vsel %vm1646_vm1, %v1693_v31, %v1697_v32 }
 0x11a   :  { %1869 = vmatmul.bf16.vlgmr.msrb.gmra.mxu2 %v1658_v5  ;;  %v6341_v5 = vld [vmem:[#allocation6 + $0x1e8] sm:$0xff] }
 0x11b   :  { %4443 = vmatpush.bf16.msra.mxu3 %v6341_v5  ;;  %v6340_v5 = vld [vmem:[#allocation6 + $0x1e0] sm:$0xff] }
 0x11e   :  { %2875 = vmatmul.bf16.vlgmr.msrb.gmra.mxu0 %v6240_v61 }
 0x11f   :  { %4444 = vmatpush.bf16.msra.mxu3 %v6340_v5 }
 0x123   :  { %2469 = vmatmul.bf16.gmra.mxu3 %v2249_v38  ;;  %v6166_v38 = vld [vmem:[#allocation2 + $0x24] sm:$0xff] }
 0x126   :  { %1305 = vmatmul.bf16.gmra.mxu1 %v6163_v2 }
 0x12a   :  { %1874 = vmatmul.bf16.gmra.mxu2 %v1666_v7  ;;  %v2278_v7 = vshrl.u32 %v6221_v63, 16 }
 0x12c   :  { %v2280_v15 = vrot.slane %v2278_v7, 3 }
 0x12e   :  { %2880 = vmatmul.bf16.gmra.mxu0 %v6241_v55  ;;  %v2284_v22 = vor.u32 %v2283_v20, %v2280_v15 }
 0x130   :  { %v2285_v36 = vsel %vm639_vm13, %v2275_v58, %v2284_v22 }
 0x133   :  { %2474 = vmatmul.bf16.gmra.mxu3 %v2258_v9 }
 0x136   :  { %1310 = vmatmul.bf16.gmra.mxu1 %v6164_v16 }
 0x13a   :  { %1879 = vmatmul.bf16.gmra.mxu2 %v1674_v10 }
 0x13e   :  { %2885 = vmatmul.bf16.gmra.mxu0 %v6242_v59  ;;  %v6167_v59 = vld [vmem:[#allocation2 + $0x2c] sm:$0xff] }
 0x143   :  { %v910_v11 = vpop.f32.mrf.mxu1  ;;  %2479 = vmatmul.bf16.gmra.mxu3 %v2267_v44 }
 0x144   :  { %v985_v14 = vadd.f32 %v7104_v25, %v910_v11 }
 0x146   :  { %1021 = vst [vmem:[#allocation8 + $0x50] sm:$0xff] %v985_v14  ;;  %1315 = vmatmul.bf16.gmra.mxu1 %v6165_v40  ;;  %v6288_v40 = vld [vmem:[#allocation6 + $0x160] sm:$0xff] }
 0x147   :  { %3438 = vmatpush.bf16.msra.mxu1 %v6288_v40 }
 0x14a   :  { %1884 = vmatmul.bf16.gmra.mxu2 %v1682_v47 }
 0x14b   :  { %v7109_v51 = vpop.f32.mrf.mxu0  ;;  %v912_v33 = vpop.f32.mrf.mxu1 }
 0x14c   :  { %v986_v3 = vadd.f32 %v7104_v25, %v912_v33  ;;  %v6245_v33 = vld [vmem:[#allocation2 + $0x34] sm:$0xff] }
 0x14d   :  { %v935_v26 = vpop.f32.mrf.mxu2 }
 0x14e   :  { %v995_v48 = vadd.f32 %v7104_v25, %v935_v26  ;;  %1022 = vst [vmem:[#allocation8 + $0x58] sm:$0xff] %v986_v3  ;;  %2890 = vmatmul.bf16.gmra.mxu0 %v6243_v41  ;;  %v2289_v41 = vrot.slane %v2287_v46, 3  ;;  %v2292_v26 = vrot.slane %v2290_v21, 4  ;;  %v2305_v46 = vshrl.u32 %v6224_v23, 16 }
 0x14f   :  { %v2308_v21 = vshll.u32 %v6224_v23, 16 }
 0x150   :  { %1031 = vst [vmem:[#allocation8 + $0xa0] sm:$0xff] %v995_v48  ;;  %v7139_v48 = vld [vmem:[#allocation2 + $0x3c] sm:$0xff]  ;;  %v2293_v4 = vor.u32 %v2292_v26, %v2289_v41  ;;  %v6247_v26 = vld [vmem:[#allocation2 + $0x44] sm:$0xff] }
 0x152   :  { %v2294_v63 = vsel %vm639_vm13, %v2284_v22, %v2293_v4 }
 0x153   :  { %v7113_v60 = vpop.f32.mrf.mxu0  ;;  %v915_v61 = vpop.f32.mrf.mxu1  ;;  %2484 = vmatmul.bf16.gmra.mxu3 %v2276_v34  ;;  %v1703_v34 = vshll.u32 %v7139_v48, 16 }
 0x154   :  { %v987_v0 = vadd.f32 %v7104_v25, %v915_v61  ;;  %v976_v23 = vadd.f32 %v7104_v25, %v7113_v60 }
 0x155   :  { %v937_v2 = vpop.f32.mrf.mxu2 }
 0x156   :  { %v996_v6 = vadd.f32 %v7104_v25, %v937_v2  ;;  %1023 = vst [vmem:[#allocation8 + $0x60] sm:$0xff] %v987_v0  ;;  %1320 = vmatmul.bf16.gmra.mxu1 %v6166_v38  ;;  %v960_v1 = vpop.f32.mrf.mxu3  ;;  %v6223_v0 = vld [vmem:[#allocation2 + $0x50] sm:$0xff] }
 0x157   :  { %v1005_v8 = vadd.f32 %v7104_v25, %v960_v1  ;;  %v6168_v2 = vld [vmem:[#allocation2 + $0x34] sm:$0xff]  ;;  %v1705_v1 = vrot.slane %v1703_v34, 1  ;;  %v2296_v50 = vshrl.u32 %v6223_v0, 16 }
 0x158   :  { %1032 = vst [vmem:[#allocation8 + $0xa8] sm:$0xff] %v996_v6  ;;  %v1701_v6 = vor.u32 %v1699_v62, %v1697_v32 }
 0x159   :  { %1041 = vst [vmem:[#allocation8 + $0xf0] sm:$0xff] %v1005_v8  ;;  %v2299_v8 = vshll.u32 %v6223_v0, 16 }
 0x15a   :  { %1889 = vmatmul.bf16.gmra.mxu2 %v1690_v53 }
 0x15b   :  { %v7120_v55 = vpop.f32.mrf.mxu0  ;;  %v917_v28 = vpop.f32.mrf.mxu1 }
 0x15c   :  { %v988_v24 = vadd.f32 %v7104_v25, %v917_v28  ;;  %v1706_v28 = vsel %vm1646_vm1, %v1701_v6, %v1705_v1 }
 0x15d   :  { %v940_v9 = vpop.f32.mrf.mxu2 }
 0x15e   :  { %v997_v16 = vadd.f32 %v7104_v25, %v940_v9  ;;  %1024 = vst [vmem:[#allocation8 + $0x68] sm:$0xff] %v988_v24  ;;  %2895 = vmatmul.bf16.gmra.mxu0 %v6244_v54  ;;  %v962_v13 = vpop.f32.mrf.mxu3  ;;  %v2298_v24 = vrot.slane %v2296_v50, 3  ;;  %v2301_v54 = vrot.slane %v2299_v8, 4 }
 0x15f   :  { %v1006_v18 = vadd.f32 %v7104_v25, %v962_v13  ;;  %v6196_v13 = vld [vmem:[#allocation2 + $0x44] sm:$0xff] }
 0x160   :  { %1033 = vst [vmem:[#allocation8 + $0xb0] sm:$0xff] %v997_v16  ;;  %v2302_v39 = vor.u32 %v2301_v54, %v2298_v24  ;;  %v1715_v62 = vshrl.u32 %v6196_v13, 16  ;;  %v6248_v24 = vld [vmem:[#allocation2 + $0x4c] sm:$0xff] }
 0x161   :  { %1042 = vst [vmem:[#allocation8 + $0xf8] sm:$0xff] %v1006_v18 }
 0x163   :  { %v7128_v10 = vpop.f32.mrf.mxu0  ;;  %v920_v17 = vpop.f32.mrf.mxu1  ;;  %2489 = vmatmul.bf16.gmra.mxu3 %v2285_v36 }
 0x164   :  { %v989_v35 = vadd.f32 %v7104_v25, %v920_v17  ;;  %v1711_v17 = vshll.u32 %v6196_v13, 16 }
 0x165   :  { %v942_v37 = vpop.f32.mrf.mxu2 }
 0x166   :  { %v998_v11 = vadd.f32 %v7104_v25, %v942_v37  ;;  %1025 = vst [vmem:[#allocation8 + $0x70] sm:$0xff] %v989_v35  ;;  %1325 = vmatmul.bf16.gmra.mxu1 %v6167_v59  ;;  %v965_v44 = vpop.f32.mrf.mxu3  ;;  %v1707_v59 = vshrl.u32 %v7139_v48, 16  ;;  %v2303_v37 = vsel %vm639_vm13, %v2293_v4, %v2302_v39  ;;  %v6197_v4 = vld [vmem:[#allocation2 + $0x4c] sm:$0xff] }
 0x167   :  { %v1007_v14 = vadd.f32 %v7104_v25, %v965_v44  ;;  %v1713_v44 = vrot.slane %v1711_v17, 1  ;;  %v1719_v0 = vshll.u32 %v6197_v4, 16 }
 0x168   :  { %1034 = vst [vmem:[#allocation8 + $0xb8] sm:$0xff] %v998_v11  ;;  %v6366_v11 = vld [vmem:[#allocation6 + $0x220] sm:$0xff]  ;;  %v1709_v40 = vor.u32 %v1707_v59, %v1705_v1 }
 0x169   :  { %1043 = vst [vmem:[#allocation8 + $0x100] sm:$0xff] %v1007_v14  ;;  %5012 = vmatpush.bf16.msra.mxu0 %v6366_v11 }
 0x16a   :  { %1894 = vmatmul.bf16.gmra.mxu2 %v1698_v45  ;;  %v1714_v19 = vsel %vm1646_vm1, %v1709_v40, %v1713_v44 }
 0x16b   :  { %v7135_v47 = vpop.f32.mrf.mxu0  ;;  %v922_v49 = vpop.f32.mrf.mxu1 }
 0x16c   :  { %v990_v12 = vadd.f32 %v7104_v25, %v922_v49 }
 0x16d   :  { %v945_v3 = vpop.f32.mrf.mxu2 }
 0x16e   :  { %v999_v52 = vadd.f32 %v7104_v25, %v945_v3  ;;  %1026 = vst [vmem:[#allocation8 + $0x78] sm:$0xff] %v990_v12  ;;  %2900 = vmatmul.bf16.gmra.mxu0 %v6245_v33  ;;  %v967_v56 = vpop.f32.mrf.mxu3  ;;  %v2307_v33 = vrot.slane %v2305_v46, 3  ;;  %v2310_v3 = vrot.slane %v2308_v21, 4 }
 0x16f   :  { %v1008_v57 = vadd.f32 %v7104_v25, %v967_v56 }
 0x170   :  { %1035 = vst [vmem:[#allocation8 + $0xc0] sm:$0xff] %v999_v52  ;;  %v6287_v52 = vld [vmem:[#allocation6 + $0x158] sm:$0xff] }
 0x171   :  { %1044 = vst [vmem:[#allocation8 + $0x108] sm:$0xff] %v1008_v57  ;;  %3439 = vmatpush.bf16.msra.mxu1 %v6287_v52  ;;  %v6313_v57 = vld [vmem:[#allocation6 + $0x198] sm:$0xff] }
 0x172   :  { %4029 = vmatpush.bf16.msra.mxu2 %v6313_v57 }
 0x173   :  { %v7142_v58 = vpop.f32.mrf.mxu0  ;;  %v925_v61 = vpop.f32.mrf.mxu1  ;;  %2494 = vmatmul.bf16.gmra.mxu3 %v2294_v63 }
 0x174   :  { %v991_v38 = vadd.f32 %v7104_v25, %v925_v61  ;;  %v2311_v61 = vor.u32 %v2310_v3, %v2307_v33 }
 0x175   :  { %v947_v43 = vpop.f32.mrf.mxu2 }
 0x176   :  { %v1000_v27 = vadd.f32 %v7104_v25, %v947_v43  ;;  %1027 = vst [vmem:[#allocation8 + $0x80] sm:$0xff] %v991_v38  ;;  %1330 = vmatmul.bf16.gmra.mxu1 %v6168_v2  ;;  %v970_v7 = vpop.f32.mrf.mxu3  ;;  %v2312_v38 = vsel %vm639_vm13, %v2302_v39, %v2311_v61  ;;  %v6225_v2 = vld [vmem:[#allocation2 + $0x60] sm:$0xff]  ;;  %v7176_v39 = vld [vmem:[#allocation2 + $0x54] sm:$0xff] }
 0x177   :  { %v1009_v53 = vadd.f32 %v7104_v25, %v970_v7  ;;  %v6170_v43 = vld [vmem:[#allocation2 + $0x44] sm:$0xff]  ;;  %v1721_v7 = vrot.slane %v1719_v0, 1  ;;  %v2314_v8 = vshrl.u32 %v6225_v2, 16 }
 0x178   :  { %1036 = vst [vmem:[#allocation8 + $0xc8] sm:$0xff] %v1000_v27  ;;  %v1717_v27 = vor.u32 %v1715_v62, %v1713_v44  ;;  %v6249_v62 = vld [vmem:[#allocation2 + $0x54] sm:$0xff] }
 0x179   :  { %1045 = vst [vmem:[#allocation8 + $0x110] sm:$0xff] %v1009_v53  ;;  %v2317_v53 = vshll.u32 %v6225_v2, 16 }
 0x17a   :  { %1899 = vmatmul.bf16.gmra.mxu2 %v1706_v28  ;;  %v1722_v28 = vsel %vm1646_vm1, %v1717_v27, %v1721_v7 }
 0x17b   :  { %v7151_v15 = vpop.f32.mrf.mxu0  ;;  %v927_v20 = vpop.f32.mrf.mxu1 }
 0x17c   :  { %v992_v9 = vadd.f32 %v7104_v25, %v927_v20  ;;  %v975_v20 = vadd.f32 %v7104_v25, %v7109_v51  ;;  %v1727_v51 = vshll.u32 %v7176_v39, 16 }
 0x17d   :  { %v950_v16 = vpop.f32.mrf.mxu2 }
 0x17e   :  { %v1001_v22 = vadd.f32 %v7104_v25, %v950_v16  ;;  %1028 = vst [vmem:[#allocation8 + $0x88] sm:$0xff] %v992_v9  ;;  %2905 = vmatmul.bf16.gmra.mxu0 %v6246_v29  ;;  %v972_v18 = vpop.f32.mrf.mxu3  ;;  %v2316_v29 = vrot.slane %v2314_v8, 3  ;;  %v2319_v16 = vrot.slane %v2317_v53, 4 }
 0x17f   :  { %v1010_v30 = vadd.f32 %v7104_v25, %v972_v18 }
 0x180   :  { %1037 = vst [vmem:[#allocation8 + $0xd0] sm:$0xff] %v1001_v22  ;;  %v6339_v22 = vld [vmem:[#allocation6 + $0x1d8] sm:$0xff] }
 0x181   :  { %1046 = vst [vmem:[#allocation8 + $0x118] sm:$0xff] %v1010_v30  ;;  %4445 = vmatpush.bf16.msra.mxu3 %v6339_v22 }
 0x183   :  { %v7156_v36 = vpop.f32.mrf.mxu0  ;;  %v930_v35 = vpop.f32.mrf.mxu1  ;;  %2499 = vmatmul.bf16.gmra.mxu3 %v2303_v37  ;;  %v1723_v37 = vshrl.u32 %v6197_v4, 16 }
 0x184   :  { %v993_v32 = vadd.f32 %v7104_v25, %v930_v35  ;;  %v2320_v35 = vor.u32 %v2319_v16, %v2316_v29 }
 0x185   :  { %v952_v31 = vpop.f32.mrf.mxu2  ;;  %v1725_v21 = vor.u32 %v1723_v37, %v1721_v7  ;;  %v979_v37 = vadd.f32 %v7104_v25, %v7135_v47 }
 0x186   :  { %v1002_v14 = vadd.f32 %v7104_v25, %v952_v31  ;;  %1029 = vst [vmem:[#allocation8 + $0x90] sm:$0xff] %v993_v32  ;;  %1335 = vmatmul.bf16.gmra.mxu1 %v6169_v42  ;;  %v2460_v45 = vpop.f32.mrf.mxu3  ;;  %v6171_v42 = vld [vmem:[#allocation2 + $0x4c] sm:$0xff]  ;;  %v2321_v44 = vsel %vm639_vm13, %v2311_v61, %v2320_v35 }
 0x188   :  { %1038 = vst [vmem:[#allocation8 + $0xd8] sm:$0xff] %v1002_v14  ;;  %v6226_v14 = vld [vmem:[#allocation2 + $0x68] sm:$0xff] }
 0x189   :  { %v2323_v33 = vshrl.u32 %v6226_v14, 16  ;;  %v2326_v3 = vshll.u32 %v6226_v14, 16 }
 0x18a   :  { %1904 = vmatmul.bf16.gmra.mxu2 %v1714_v19  ;;  %v1729_v19 = vrot.slane %v1727_v51, 1 }
 0x18b   :  { %v7163_v49 = vpop.f32.mrf.mxu0  ;;  %v932_v12 = vpop.f32.mrf.mxu1  ;;  %v2325_v57 = vrot.slane %v2323_v33, 3  ;;  %v2328_v4 = vrot.slane %v2326_v3, 4 }
 0x18c   :  { %v994_v41 = vadd.f32 %v7104_v25, %v932_v12 }
 0x18d   :  { %v955_v56 = vpop.f32.mrf.mxu2 }
 0x18e   :  { %v1003_v48 = vadd.f32 %v7104_v25, %v955_v56  ;;  %1030 = vst [vmem:[#allocation8 + $0x98] sm:$0xff] %v994_v41  ;;  %2910 = vmatmul.bf16.gmra.mxu0 %v6247_v26  ;;  %v2462_v5 = vpop.f32.mrf.mxu3  ;;  %v1730_v41 = vsel %vm1646_vm1, %v1725_v21, %v1729_v19  ;;  %v977_v26 = vadd.f32 %v7104_v25, %v7120_v55 }
 0x190   :  { %1039 = vst [vmem:[#allocation8 + $0xe0] sm:$0xff] %v1003_v48 }
 0x193   :  { %v7167_v34 = vpop.f32.mrf.mxu0  ;;  %v1301_v63 = vpop.f32.mrf.mxu1  ;;  %2504 = vmatmul.bf16.gmra.mxu3 %v2312_v38  ;;  %v7189_v38 = vld [vmem:[#allocation2 + $0x5c] sm:$0xff] }
 0x194   :  { %v1391_v13 = vadd.f32 %v1301_v63, %v975_v20  ;;  %v6365_v63 = vld [vmem:[#allocation6 + $0x218] sm:$0xff]  ;;  %v1735_v27 = vshll.u32 %v7189_v38, 16  ;;  %v6227_v20 = vld [vmem:[#allocation2 + $0x70] sm:$0xff] }
 0x195   :  { %v957_v6 = vpop.f32.mrf.mxu2  ;;  %5013 = vmatpush.bf16.msra.mxu0 %v6365_v63 }
 0x196   :  { %v1004_v1 = vadd.f32 %v7104_v25, %v957_v6  ;;  %1340 = vmatmul.bf16.gmra.mxu1 %v6170_v43  ;;  %v7171_v50 = vpop.f32.mrf.mxu3  ;;  %v2329_v6 = vor.u32 %v2328_v4, %v2325_v57  ;;  %v1737_v16 = vrot.slane %v1735_v27, 1  ;;  %v6228_v4 = vld [vmem:[#allocation2 + $0x78] sm:$0xff] }
 0x198   :  { %1040 = vst [vmem:[#allocation8 + $0xe8] sm:$0xff] %v1004_v1  ;;  %v978_v1 = vadd.f32 %v7104_v25, %v7128_v10 }
 0x19a   :  { %1909 = vmatmul.bf16.gmra.mxu2 %v1722_v28  ;;  %v2330_v28 = vsel %vm639_vm13, %v2320_v35, %v2329_v6 }
 0x19b   :  { %v1303_v54 = vpop.f32.mrf.mxu1  ;;  %v2876_v9 = vpop.f32.mrf.mxu0 }
 0x19c   :  { %v1392_v40 = vadd.f32 %v1303_v54, %v976_v23  ;;  %v6172_v54 = vld [vmem:[#allocation2 + $0x54] sm:$0xff] }
 0x19d   :  { %v1870_v18 = vpop.f32.mrf.mxu2 }
 0x19e   :  { %v1960_v30 = vadd.f32 %v1870_v18, %v1391_v13  ;;  %2915 = vmatmul.bf16.gmra.mxu0 %v6248_v24  ;;  %v7178_v17 = vpop.f32.mrf.mxu3  ;;  %v2332_v18 = vshrl.u32 %v6227_v20, 16 }
 0x1a0   :  { %v2550_v59 = vadd.f32 %v2460_v45, %v1960_v30  ;;  %v2335_v30 = vshll.u32 %v6227_v20, 16 }
 0x1a2   :  { %v2966_v32 = vadd.f32 %v2876_v9, %v2550_v59  ;;  %v6312_v9 = vld [vmem:[#allocation6 + $0x190] sm:$0xff] }
 0x1a3   :  { %v1306_v11 = vpop.f32.mrf.mxu1  ;;  %v2878_v31 = vpop.f32.mrf.mxu0  ;;  %2509 = vmatmul.bf16.gmra.mxu3 %v2321_v44  ;;  %4030 = vmatpush.bf16.msra.mxu2 %v6312_v9  ;;  %v6338_v44 = vld [vmem:[#allocation6 + $0x1d0] sm:$0xff] }
 0x1a4   :  { %3002 = vst [vmem:[#allocation8] sm:$0xff] %v2966_v32  ;;  %v1393_v61 = vadd.f32 %v1306_v11, %v977_v26  ;;  %v2334_v32 = vrot.slane %v2332_v18, 3  ;;  %4446 = vmatpush.bf16.msra.mxu3 %v6338_v44 }
 0x1a5   :  { %v1872_v46 = vpop.f32.mrf.mxu2 }
 0x1a6   :  { %v1961_v45 = vadd.f32 %v1872_v46, %v1392_v40  ;;  %1345 = vmatmul.bf16.gmra.mxu1 %v6171_v42  ;;  %v7184_v12 = vpop.f32.mrf.mxu3  ;;  %v2337_v42 = vrot.slane %v2335_v30, 4  ;;  %v7207_v46 = vld [vmem:[#allocation2 + $0x64] sm:$0xff] }
 0x1a7   :  { %v6229_v30 = vld [vmem:[#allocation2 + $0x80] sm:$0xff] }
 0x1a8   :  { %v2551_v60 = vadd.f32 %v2462_v5, %v1961_v45  ;;  %v6286_v5 = vld [vmem:[#allocation6 + $0x150] sm:$0xff]  ;;  %v2338_v21 = vor.u32 %v2337_v42, %v2334_v32  ;;  %v2350_v42 = vshrl.u32 %v6229_v30, 16 }
 0x1a9   :  { %3440 = vmatpush.bf16.msra.mxu1 %v6286_v5 }
 0x1aa   :  { %v2967_v52 = vadd.f32 %v2878_v31, %v2551_v60  ;;  %1914 = vmatmul.bf16.gmra.mxu2 %v1730_v41  ;;  %v6250_v31 = vld [vmem:[#allocation2 + $0x5c] sm:$0xff]  ;;  %v1739_v60 = vshrl.u32 %v7189_v38, 16  ;;  %v1743_v41 = vshll.u32 %v7207_v46, 16  ;;  %v2339_v26 = vsel %vm639_vm13, %v2329_v6, %v2338_v21 }
 0x1ab   :  { %v1308_v56 = vpop.f32.mrf.mxu1  ;;  %v2881_v48 = vpop.f32.mrf.mxu0  ;;  %v2344_v38 = vshll.u32 %v6228_v4, 16 }
 0x1ac   :  { %3003 = vst [vmem:[#allocation8 + $0x8] sm:$0xff] %v2967_v52  ;;  %v1394_v24 = vadd.f32 %v1308_v56, %v978_v1  ;;  %v6173_v56 = vld [vmem:[#allocation2 + $0x5c] sm:$0xff]  ;;  %v1741_v57 = vor.u32 %v1739_v60, %v1737_v16  ;;  %v6251_v1 = vld [vmem:[#allocation2 + $0x64] sm:$0xff]  ;;  %v6202_v60 = vld [vmem:[#allocation2 + $0x74] sm:$0xff] }
 0x1ad   :  { %v1875_v0 = vpop.f32.mrf.mxu2 }
 0x1ae   :  { %v1962_v2 = vadd.f32 %v1875_v0, %v1393_v61  ;;  %2920 = vmatmul.bf16.gmra.mxu0 %v6249_v62  ;;  %v7191_v43 = vpop.f32.mrf.mxu3  ;;  %v1745_v61 = vrot.slane %v1743_v41, 1  ;;  %v2341_v0 = vshrl.u32 %v6228_v4, 16 }
 0x1b0   :  { %v2552_v55 = vadd.f32 %v7171_v50, %v1962_v2  ;;  %v1731_v50 = vshrl.u32 %v7176_v39, 16  ;;  %v1746_v63 = vsel %vm1646_vm1, %v1741_v57, %v1745_v61  ;;  %v981_v2 = vadd.f32 %v7104_v25, %v7151_v15 }
 0x1b2   :  { %v2968_v7 = vadd.f32 %v2881_v48, %v2552_v55  ;;  %v1733_v22 = vor.u32 %v1731_v50, %v1729_v19  ;;  %v980_v19 = vadd.f32 %v7104_v25, %v7142_v58 }
 0x1b3   :  { %v1311_v8 = vpop.f32.mrf.mxu1  ;;  %v2883_v53 = vpop.f32.mrf.mxu0  ;;  %2514 = vmatmul.bf16.gmra.mxu3 %v2330_v28  ;;  %v2343_v28 = vrot.slane %v2341_v0, 3  ;;  %v6175_v0 = vld [vmem:[#allocation2 + $0x6c] sm:$0xff] }
 0x1b4   :  { %3004 = vst [vmem:[#allocation8 + $0x10] sm:$0xff] %v2968_v7  ;;  %v1738_v59 = vsel %vm1646_vm1, %v1733_v22, %v1737_v16  ;;  %v1395_v11 = vadd.f32 %v1311_v8, %v979_v37  ;;  %v6364_v7 = vld [vmem:[#allocation6 + $0x210] sm:$0xff]  ;;  %v1747_v22 = vshrl.u32 %v7207_v46, 16  ;;  %v6285_v37 = vld [vmem:[#allocation6 + $0x148] sm:$0xff] }
 0x1b5   :  { %v1877_v29 = vpop.f32.mrf.mxu2  ;;  %5014 = vmatpush.bf16.msra.mxu0 %v6364_v7  ;;  %3441 = vmatpush.bf16.msra.mxu1 %v6285_v37 }
 0x1b6   :  { %v1963_v13 = vadd.f32 %v1877_v29, %v1394_v24  ;;  %1350 = vmatmul.bf16.gmra.mxu1 %v6172_v54  ;;  %v7199_v10 = vpop.f32.mrf.mxu3  ;;  %v982_v29 = vadd.f32 %v7104_v25, %v7156_v36  ;;  %v1749_v32 = vor.u32 %v1747_v22, %v1745_v61  ;;  %v1763_v22 = vshrl.u32 %v6202_v60, 16 }
 0x1b8   :  { %v2553_v35 = vadd.f32 %v7178_v17, %v1963_v13 }
 0x1ba   :  { %v2969_v51 = vadd.f32 %v2883_v53, %v2553_v35  ;;  %1919 = vmatmul.bf16.gmra.mxu2 %v1738_v59  ;;  %v7221_v53 = vld [vmem:[#allocation2 + $0x6c] sm:$0xff]  ;;  %v6174_v59 = vld [vmem:[#allocation2 + $0x64] sm:$0xff] }
 0x1bb   :  { %v1313_v23 = vpop.f32.mrf.mxu1  ;;  %v2886_v39 = vpop.f32.mrf.mxu0  ;;  %v1751_v54 = vshll.u32 %v7221_v53, 16 }
 0x1bc   :  { %3005 = vst [vmem:[#allocation8 + $0x18] sm:$0xff] %v2969_v51  ;;  %v1396_v52 = vadd.f32 %v1313_v23, %v980_v19 }
 0x1bd   :  { %v1880_v14 = vpop.f32.mrf.mxu2  ;;  %v1753_v51 = vrot.slane %v1751_v54, 1  ;;  %v6253_v54 = vld [vmem:[#allocation2 + $0x74] sm:$0xff] }
 0x1be   :  { %v1964_v40 = vadd.f32 %v1880_v14, %v1395_v11  ;;  %2925 = vmatmul.bf16.gmra.mxu0 %v6250_v31  ;;  %v7205_v17 = vpop.f32.mrf.mxu3  ;;  %v2353_v11 = vshll.u32 %v6229_v30, 16  ;;  %v983_v14 = vadd.f32 %v7104_v25, %v7163_v49  ;;  %v984_v49 = vadd.f32 %v7104_v25, %v7167_v34  ;;  %v1094_v30 = vld [vmem:[#allocation8 + $0x58] sm:$0xff] }
 0x1bf   :  { %v1754_v44 = vsel %vm1646_vm1, %v1749_v32, %v1753_v51  ;;  %v6363_v32 = vld [vmem:[#allocation6 + $0x208] sm:$0xff] }
 0x1c0   :  { %v2554_v47 = vadd.f32 %v7184_v12, %v1964_v40  ;;  %v2355_v19 = vrot.slane %v2353_v11, 4  ;;  %5015 = vmatpush.bf16.msra.mxu0 %v6363_v32 }
 0x1c2   :  { %v2970_v45 = vadd.f32 %v2886_v39, %v2554_v47  ;;  %v6311_v39 = vld [vmem:[#allocation6 + $0x188] sm:$0xff]  ;;  %v2352_v47 = vrot.slane %v2350_v42, 3 }
 0x1c3   :  { %v1316_v33 = vpop.f32.mrf.mxu1  ;;  %v2888_v3 = vpop.f32.mrf.mxu0  ;;  %2519 = vmatmul.bf16.gmra.mxu3 %v2339_v26  ;;  %4031 = vmatpush.bf16.msra.mxu2 %v6311_v39  ;;  %v6176_v39 = vld [vmem:[#allocation2 + $0x74] sm:$0xff] }
 0x1c4   :  { %3006 = vst [vmem:[#allocation8 + $0x20] sm:$0xff] %v2970_v45  ;;  %v1397_v27 = vadd.f32 %v1316_v33, %v981_v2  ;;  %v6252_v33 = vld [vmem:[#allocation2 + $0x6c] sm:$0xff]  ;;  %v2356_v26 = vor.u32 %v2355_v19, %v2352_v47 }
 0x1c5   :  { %v1882_v48 = vpop.f32.mrf.mxu2 }
 0x1c6   :  { %v1965_v12 = vadd.f32 %v1882_v48, %v1396_v52  ;;  %1355 = vmatmul.bf16.gmra.mxu1 %v6173_v56  ;;  %v7215_v58 = vpop.f32.mrf.mxu3  ;;  %v1759_v56 = vshll.u32 %v6202_v60, 16 }
 0x1c8   :  { %v2555_v62 = vadd.f32 %v7191_v43, %v1965_v12  ;;  %v2346_v43 = vrot.slane %v2344_v38, 4  ;;  %v1755_v12 = vshrl.u32 %v7221_v53, 16  ;;  %v6337_v38 = vld [vmem:[#allocation6 + $0x1c8] sm:$0xff] }
 0x1c9   :  { %4447 = vmatpush.bf16.msra.mxu3 %v6337_v38 }
 0x1ca   :  { %v2971_v5 = vadd.f32 %v2888_v3, %v2555_v62  ;;  %1924 = vmatmul.bf16.gmra.mxu2 %v1746_v63  ;;  %v2347_v9 = vor.u32 %v2346_v43, %v2343_v28  ;;  %v6230_v62 = vld [vmem:[#allocation2 + $0x88] sm:$0xff] }
 0x1cb   :  { %v1318_v6 = vpop.f32.mrf.mxu1  ;;  %v2891_v55 = vpop.f32.mrf.mxu0  ;;  %v2359_v34 = vshrl.u32 %v6230_v62, 16 }
 0x1cc   :  { %3007 = vst [vmem:[#allocation8 + $0x28] sm:$0xff] %v2971_v5  ;;  %v2348_v18 = vsel %vm639_vm13, %v2338_v21, %v2347_v9  ;;  %v1398_v35 = vadd.f32 %v1318_v6, %v982_v29  ;;  %v2357_v61 = vsel %vm639_vm13, %v2347_v9, %v2356_v26  ;;  %v1761_v5 = vrot.slane %v1759_v56, 1  ;;  %v2068_v56 = vld [vmem:[#allocation2 + $0x98] sm:$0xf] }
 0x1cd   :  { %v1885_v8 = vpop.f32.mrf.mxu2  ;;  %v1757_v6 = vor.u32 %v1755_v12, %v1753_v51  ;;  %v2361_v43 = vrot.slane %v2359_v34, 3  ;;  %v6231_v51 = vld [vmem:[#allocation2 + $0x90] sm:$0xff]  ;;  %v7261_v12 = vld [vmem:[#allocation2 + $0x84] sm:$0xff] }
 0x1ce   :  { %v1966_v20 = vadd.f32 %v1885_v8, %v1397_v27  ;;  %2930 = vmatmul.bf16.gmra.mxu0 %v6251_v1  ;;  %v7223_v24 = vpop.f32.mrf.mxu3  ;;  %v1093_v8 = vld [vmem:[#allocation8 + $0x50] sm:$0xff]  ;;  %v1765_v11 = vor.u32 %v1763_v22, %v1761_v5 }
 0x1cf   :  { %v1762_v1 = vsel %vm1646_vm1, %v1757_v6, %v1761_v5  ;;  %v1775_v6 = vshll.u32 %v7261_v12, 16 }
 0x1d0   :  { %v2556_v15 = vadd.f32 %v7199_v10, %v1966_v20 }
 0x1d2   :  { %v2972_v50 = vadd.f32 %v2891_v55, %v2556_v15  ;;  %v2362_v55 = vshll.u32 %v6230_v62, 16 }
 0x1d3   :  { %v1321_v16 = vpop.f32.mrf.mxu1  ;;  %v2893_v13 = vpop.f32.mrf.mxu0  ;;  %2524 = vmatmul.bf16.gmra.mxu3 %v2348_v18 }
 0x1d4   :  { %3008 = vst [vmem:[#allocation8 + $0x30] sm:$0xff] %v2972_v50  ;;  %v1399_v45 = vadd.f32 %v1321_v16, %v983_v14  ;;  %v2364_v20 = vrot.slane %v2362_v55, 4  ;;  %v7250_v16 = vld [vmem:[#allocation2 + $0x7c] sm:$0xff] }
 0x1d5   :  { %v1887_v10 = vpop.f32.mrf.mxu2  ;;  %v1767_v37 = vshll.u32 %v7250_v16, 16 }
 0x1d6   :  { %v1967_v23 = vadd.f32 %v1887_v10, %v1398_v35  ;;  %1360 = vmatmul.bf16.gmra.mxu1 %v6174_v59  ;;  %v7231_v36 = vpop.f32.mrf.mxu3 }
 0x1d8   :  { %v2557_v31 = vadd.f32 %v7205_v17, %v1967_v23 }
 0x1da   :  { %v2973_v40 = vadd.f32 %v2893_v13, %v2557_v31  ;;  %1929 = vmatmul.bf16.gmra.mxu2 %v1754_v44  ;;  %v1769_v44 = vrot.slane %v1767_v37, 1 }
 0x1db   :  { %v1323_v46 = vpop.f32.mrf.mxu1  ;;  %v2896_v21 = vpop.f32.mrf.mxu0 }
 0x1dc   :  { %3009 = vst [vmem:[#allocation8 + $0x38] sm:$0xff] %v2973_v40  ;;  %v1400_v63 = vadd.f32 %v1323_v46, %v984_v49  ;;  %v2368_v40 = vshrl.u32 %v6231_v51, 16  ;;  %v2371_v46 = vshll.u32 %v6231_v51, 16  ;;  %v1770_v47 = vsel %vm1646_vm1, %v1765_v11, %v1769_v44  ;;  %v6310_v49 = vld [vmem:[#allocation6 + $0x180] sm:$0xff] }
 0x1dd   :  { %v1890_v3 = vpop.f32.mrf.mxu2  ;;  %4032 = vmatpush.bf16.msra.mxu2 %v6310_v49 }
 0x1de   :  { %v1968_v41 = vadd.f32 %v1890_v3, %v1399_v45  ;;  %2935 = vmatmul.bf16.gmra.mxu0 %v6252_v33  ;;  %v7237_v17 = vpop.f32.mrf.mxu3  ;;  %v1095_v45 = vld [vmem:[#allocation8 + $0x60] sm:$0xff]  ;;  %v2370_v60 = vrot.slane %v2368_v40, 3 }
 0x1df   :  { %v6178_v40 = vld [vmem:[#allocation2 + $0x84] sm:$0xff] }
 0x1e0   :  { %v2558_v52 = vadd.f32 %v7215_v58, %v1968_v41  ;;  %v2373_v41 = vrot.slane %v2371_v46, 4  ;;  %v6362_v46 = vld [vmem:[#allocation6 + $0x200] sm:$0xff] }
 0x1e1   :  { %5016 = vmatpush.bf16.msra.mxu0 %v6362_v46 }
 0x1e2   :  { %v2974_v48 = vadd.f32 %v2896_v21, %v2558_v52  ;;  %v6254_v52 = vld [vmem:[#allocation2 + $0x7c] sm:$0xff] }
 0x1e3   :  { %v1326_v57 = vpop.f32.mrf.mxu1  ;;  %v2898_v4 = vpop.f32.mrf.mxu0  ;;  %2529 = vmatmul.bf16.gmra.mxu3 %v2357_v61  ;;  %v2374_v61 = vor.u32 %v2373_v41, %v2370_v60 }
 0x1e4   :  { %3010 = vst [vmem:[#allocation8 + $0x40] sm:$0xff] %v2974_v48  ;;  %v1401_v15 = vadd.f32 %v1326_v57, %v1093_v8  ;;  %v2195_v57 = vunpack.c.l.b16 %v2068_v56 }
 0x1e5   :  { %v1892_v2 = vpop.f32.mrf.mxu2 }
 0x1e6   :  { %v1969_v58 = vadd.f32 %v1892_v2, %v1400_v63  ;;  %1365 = vmatmul.bf16.gmra.mxu1 %v6175_v0  ;;  %v7244_v25 = vpop.f32.mrf.mxu3  ;;  %v1771_v63 = vshrl.u32 %v7250_v16, 16  ;;  %v2214_v0 = vpack.c.b16 %v2195_v57, %v2195_v57  ;;  %v1096_v2 = vld [vmem:[#allocation8 + $0x68] sm:$0xff] }
 0x1e7   :  { %v6256_v57 = vld [vmem:[#allocation2 + $0x8c] sm:$0xff] }
 0x1e8   :  { %v2559_v27 = vadd.f32 %v7223_v24, %v1969_v58  ;;  %v2365_v24 = vor.u32 %v2364_v20, %v2361_v43  ;;  %v1773_v8 = vor.u32 %v1771_v63, %v1769_v44  ;;  %v1777_v43 = vrot.slane %v1775_v6, 1 }
 0x1ea   :  { %v2975_v7 = vadd.f32 %v2898_v4, %v2559_v27  ;;  %1934 = vmatmul.bf16.gmra.mxu2 %v1762_v1  ;;  %v2366_v10 = vsel %vm639_vm13, %v2356_v26, %v2365_v24  ;;  %v2375_v34 = vsel %vm639_vm13, %v2365_v24, %v2374_v61  ;;  %v6177_v27 = vld [vmem:[#allocation2 + $0x7c] sm:$0xff]  ;;  %v6336_v1 = vld [vmem:[#allocation6 + $0x1c0] sm:$0xff] }
 0x1eb   :  { %v1328_v53 = vpop.f32.mrf.mxu1  ;;  %v2901_v28 = vpop.f32.mrf.mxu0  ;;  %4448 = vmatpush.bf16.msra.mxu3 %v6336_v1  ;;  %v1097_v24 = vld [vmem:[#allocation8 + $0x70] sm:$0xff] }
 0x1ec   :  { %3011 = vst [vmem:[#allocation8 + $0x48] sm:$0xff] %v2975_v7  ;;  %v1402_v23 = vadd.f32 %v1328_v53, %v1094_v30  ;;  %v2377_v53 = vshrl.u32 %v2214_v0, 16  ;;  %v6255_v30 = vld [vmem:[#allocation2 + $0x84] sm:$0xff] }
 0x1ed   :  { %v1895_v9 = vpop.f32.mrf.mxu2 }
 0x1ee   :  { %v1970_v29 = vadd.f32 %v1895_v9, %v1401_v15  ;;  %2940 = vmatmul.bf16.gmra.mxu0 %v6253_v54  ;;  %v7248_v50 = vpop.f32.mrf.mxu3  ;;  %v1778_v54 = vsel %vm1646_vm1, %v1773_v8, %v1777_v43  ;;  %v2379_v9 = vrot.slane %v2377_v53, 3 }
 0x1f0   :  { %v2560_v13 = vadd.f32 %v7231_v36, %v1970_v29  ;;  %v6284_v36 = vld [vmem:[#allocation6 + $0x140] sm:$0xff] }
 0x1f1   :  { %3442 = vmatpush.bf16.msra.mxu1 %v6284_v36  ;;  %v1779_v36 = vshrl.u32 %v7261_v12, 16 }
 0x1f2   :  { %v2976_v18 = vadd.f32 %v2901_v28, %v2560_v13 }
 0x1f3   :  { %v1331_v35 = vpop.f32.mrf.mxu1  ;;  %v2903_v59 = vpop.f32.mrf.mxu0  ;;  %2534 = vmatmul.bf16.gmra.mxu3 %v2366_v10 }
 0x1f4   :  { %3012 = vst [vmem:[#allocation8 + $0x50] sm:$0xff] %v2976_v18  ;;  %v1403_v26 = vadd.f32 %v1331_v35, %v1095_v45  ;;  %v1499_v45 = vld [vmem:[#allocation2 + $0x94] sm:$0x1] }
 0x1f5   :  { %v1897_v42 = vpop.f32.mrf.mxu2  ;;  %v1626_v41 = vunpack.c.l.b16 %v1499_v45  ;;  %v1102_v45 = vld [vmem:[#allocation8 + $0x98] sm:$0xff] }
 0x1f6   :  { %v1971_v31 = vadd.f32 %v1897_v42, %v1402_v23  ;;  %1370 = vmatmul.bf16.gmra.mxu1 %v6176_v39  ;;  %v7255_v14 = vpop.f32.mrf.mxu3  ;;  %v1098_v42 = vld [vmem:[#allocation8 + $0x78] sm:$0xff] }
 0x1f7   :  { %v1645_v12 = vpack.c.b16 %v1626_v41, %v1626_v41 }
 0x1f8   :  { %v2561_v21 = vadd.f32 %v7237_v17, %v1971_v31 }
 0x1fa   :  { %v2977_v19 = vadd.f32 %v2903_v59, %v2561_v21  ;;  %1939 = vmatmul.bf16.gmra.mxu2 %v1770_v47  ;;  %v6205_v59 = vld [vmem:[#allocation2 + $0x8c] sm:$0xff] }
 0x1fb   :  { %v1333_v33 = vpop.f32.mrf.mxu1  ;;  %v2906_v3 = vpop.f32.mrf.mxu0  ;;  %v1783_v23 = vshll.u32 %v6205_v59, 16 }
 0x1fc   :  { %3013 = vst [vmem:[#allocation8 + $0x58] sm:$0xff] %v2977_v19  ;;  %v1404_v55 = vadd.f32 %v1333_v33, %v1096_v2  ;;  %v6318_v2 = vld [vmem:[#allocation2 + $0x14] sm:$0xff] }
 0x1fd   :  { %v1900_v48 = vpop.f32.mrf.mxu2  ;;  %v1785_v47 = vrot.slane %v1783_v23, 1 }
 0x1fe   :  { %v1972_v4 = vadd.f32 %v1900_v48, %v1403_v26  ;;  %2945 = vmatmul.bf16.gmra.mxu0 %v6254_v52  ;;  %v7259_v17 = vpop.f32.mrf.mxu3  ;;  %v1099_v52 = vld [vmem:[#allocation8 + $0x80] sm:$0xff] }
 0x200   :  { %v2562_v62 = vadd.f32 %v7244_v25, %v1972_v4  ;;  %v2380_v25 = vshll.u32 %v2214_v0, 16  ;;  %v1787_v0 = vshrl.u32 %v6205_v59, 16 }
 0x202   :  { %v2978_v38 = vadd.f32 %v2906_v3, %v2562_v62  ;;  %v2382_v29 = vrot.slane %v2380_v25, 4  ;;  %v1789_v1 = vor.u32 %v1787_v0, %v1785_v47  ;;  %v6266_v25 = vld [vmem:[#allocation2 + $0xc] sm:$0xff] }
 0x203   :  { %v1336_v5 = vpop.f32.mrf.mxu1  ;;  %v2908_v58 = vpop.f32.mrf.mxu0  ;;  %2539 = vmatmul.bf16.gmra.mxu3 %v2375_v34 }
 0x204   :  { %3014 = vst [vmem:[#allocation8 + $0x60] sm:$0xff] %v2978_v38  ;;  %v1405_v18 = vadd.f32 %v1336_v5, %v1097_v24  ;;  %v2383_v37 = vor.u32 %v2382_v29, %v2379_v9  ;;  %v1100_v5 = vld [vmem:[#allocation8 + $0x88] sm:$0xff]  ;;  %v6293_v9 = vld [vmem:[#allocation2 + $0x18] sm:$0xff] }
 0x205   :  { %v1902_v7 = vpop.f32.mrf.mxu2  ;;  %v1101_v24 = vld [vmem:[#allocation8 + $0x90] sm:$0xff] }
 0x206   :  { %v1973_v28 = vadd.f32 %v1902_v7, %v1404_v55  ;;  %1375 = vmatmul.bf16.gmra.mxu1 %v6177_v27  ;;  %v2500_v20 = vpop.f32.mrf.mxu3  ;;  %v2384_v39 = vsel %vm639_vm13, %v2374_v61, %v2383_v37  ;;  %v6179_v55 = vld [vmem:[#allocation2 + $0x8c] sm:$0xff] }
 0x208   :  { %v2563_v15 = vadd.f32 %v7248_v50, %v1973_v28 }
 0x20a   :  { %v2979_v16 = vadd.f32 %v2908_v58, %v2563_v15  ;;  %1944 = vmatmul.bf16.gmra.mxu2 %v1778_v54  ;;  %v7281_v54 = vld [vmem:[#allocation2 + $0x14] sm:$0xff] }
 0x20b   :  { %v1338_v13 = vpop.f32.mrf.mxu1  ;;  %v2911_v22 = vpop.f32.mrf.mxu0  ;;  %v3229_v37 = vshll.u32 %v7281_v54, 16 }
 0x20c   :  { %3015 = vst [vmem:[#allocation8 + $0x68] sm:$0xff] %v2979_v16  ;;  %v1406_v44 = vadd.f32 %v1338_v13, %v1098_v42  ;;  %v6257_v16 = vld [vmem:[#allocation2 + $0x94] sm:$0xff] }
 0x20d   :  { %v1905_v35 = vpop.f32.mrf.mxu2 }
 0x20e   :  { %v1974_v10 = vadd.f32 %v1905_v35, %v1405_v18  ;;  %2950 = vmatmul.bf16.gmra.mxu0 %v6255_v30  ;;  %v2502_v51 = vpop.f32.mrf.mxu3  ;;  %v3224_v18 = vshll.u32 %v6266_v25, 16 }
 0x210   :  { %v2564_v50 = vadd.f32 %v7255_v14, %v1974_v10  ;;  %v1781_v14 = vor.u32 %v1779_v36, %v1777_v43  ;;  %v5826_v43 = vld [vmem:[#allocation2 + $0x10] sm:$0x8]  ;;  %v3798_v10 = vshrl.u32 %v6293_v9, 16  ;;  %v3222_v36 = vshrl.u32 %v6266_v25, 16 }
 0x212   :  { %v2980_v32 = vadd.f32 %v2911_v22, %v2564_v50  ;;  %v1786_v60 = vsel %vm1646_vm1, %v1781_v14, %v1785_v47 }
 0x213   :  { %v1341_v11 = vpop.f32.mrf.mxu1  ;;  %v2913_v31 = vpop.f32.mrf.mxu0  ;;  %2544 = vmatmul.bf16.gmra.mxu3 %v2384_v39  ;;  %v3226_v39 = vrot.slane %v3224_v18, 1 }
 0x214   :  { %3016 = vst [vmem:[#allocation8 + $0x70] sm:$0xff] %v2980_v32  ;;  %v1407_v48 = vadd.f32 %v1341_v11, %v1099_v52  ;;  %v6344_v11 = vld [vmem:[#allocation2 + $0x14] sm:$0xff] }
 0x215   :  { %v1907_v21 = vpop.f32.mrf.mxu2  ;;  %v4798_v52 = vshll.u32 %v6344_v11, 16 }
 0x216   :  { %v1975_v19 = vadd.f32 %v1907_v21, %v1406_v44  ;;  %1380 = vmatmul.bf16.gmra.mxu1 %v6178_v40  ;;  %v7272_v33 = vpop.f32.mrf.mxu3  ;;  %v3231_v44 = vrot.slane %v3229_v37, 1  ;;  %v3800_v40 = vrot.slane %v3798_v10, 3  ;;  %v7287_v21 = vld [vmem:[#allocation2 + $0x1c] sm:$0xff] }
 0x218   :  { %v2565_v3 = vadd.f32 %v7259_v17, %v1975_v19  ;;  %v1791_v17 = vshll.u32 %v1645_v12, 16  ;;  %v6319_v19 = vld [vmem:[#allocation2 + $0x1c] sm:$0xff] }
 0x21a   :  { %v2981_v26 = vadd.f32 %v2913_v31, %v2565_v3  ;;  %1949 = vmatmul.bf16.gmra.mxu2 %v1786_v60  ;;  %v1793_v7 = vrot.slane %v1791_v17, 1  ;;  %v3227_v60 = vor.u32 %v3226_v39, %v3222_v36 }
 0x21b   :  { %v1343_v56 = vpop.f32.mrf.mxu1  ;;  %v2916_v49 = vpop.f32.mrf.mxu0 }
 0x21c   :  { %3017 = vst [vmem:[#allocation8 + $0x78] sm:$0xff] %v2981_v26  ;;  %v1408_v34 = vadd.f32 %v1343_v56, %v1100_v5  ;;  %v1794_v15 = vsel %vm1646_vm1, %v1789_v1, %v1793_v7  ;;  %v7295_v5 = vld [vmem:[#allocation2 + $0x1c] sm:$0xff] }
 0x21d   :  { %v1910_v4 = vpop.f32.mrf.mxu2 }
 0x21e   :  { %v1976_v61 = vadd.f32 %v1910_v4, %v1407_v48  ;;  %2955 = vmatmul.bf16.gmra.mxu0 %v6256_v57  ;;  %v7276_v62 = vpop.f32.mrf.mxu3  ;;  %v4803_v57 = vshll.u32 %v7287_v21, 16 }
 0x220   :  { %v2566_v63 = vadd.f32 %v2500_v20, %v1976_v61  ;;  %v6292_v20 = vld [vmem:[#allocation2 + $0x10] sm:$0xf0] }
 0x221   :  { %v5827_v30 = vor.u32 %v6292_v20, %v5826_v43 }
 0x222   :  { %v2982_v38 = vadd.f32 %v2916_v49, %v2566_v63  ;;  %v4800_v63 = vrot.slane %v4798_v52, 1 }
 0x223   :  { %v1346_v58 = vpop.f32.mrf.mxu1  ;;  %v2918_v6 = vpop.f32.mrf.mxu0  ;;  %4449 = vmatmul.bf16.vlgmr.msra.gmra.mxu3 %v6318_v2  ;;  %v3790_v32 = vshrl.u32 %v5827_v30, 16  ;;  %v3793_v42 = vshll.u32 %v5827_v30, 16  ;;  %v4805_v2 = vrot.slane %v4803_v57, 1  ;;  %v6320_v30 = vld [vmem:[#allocation2 + $0x24] sm:$0xff] }
 0x224   :  { %3018 = vst [vmem:[#allocation8 + $0x80] sm:$0xff] %v2982_v38  ;;  %v1409_v35 = vadd.f32 %v1346_v58, %v1101_v24  ;;  %v4796_v38 = vshrl.u32 %v6344_v11, 16  ;;  %v6294_v58 = vld [vmem:[#allocation2 + $0x20] sm:$0xff]  ;;  %v4807_v11 = vshrl.u32 %v7287_v21, 16 }
 0x225   :  { %v1912_v27 = vpop.f32.mrf.mxu2  ;;  %v3792_v41 = vrot.slane %v3790_v32, 3  ;;  %v3795_v26 = vrot.slane %v3793_v42, 4  ;;  %v3810_v43 = vshll.u32 %v6294_v58, 16 }
 0x226   :  { %v1977_v8 = vadd.f32 %v1912_v27, %v1408_v34  ;;  %1385 = vmatmul.bf16.gmra.mxu1 %v6179_v55  ;;  %v7278_v53 = vpop.f32.mrf.mxu3  ;;  %v1103_v34 = vld [vmem:[#allocation8 + $0xa0] sm:$0xff]  ;;  %v4801_v1 = vor.u32 %v4800_v63, %v4796_v38  ;;  %v1106_v63 = vld [vmem:[#allocation8 + $0xb8] sm:$0xff] }
 0x227   :  { %v3796_v12 = vor.u32 %v3795_v26, %v3792_v41 }
 0x228   :  { %v2567_v28 = vadd.f32 %v2502_v51, %v1977_v8  ;;  %v3801_v51 = vshll.u32 %v6293_v9, 16  ;;  %v4806_v25 = vsel %vm1646_vm1, %v4801_v1, %v4805_v2 }
 0x22a   :  { %v2983_v29 = vadd.f32 %v2918_v6, %v2567_v28  ;;  %1954 = vmatmul.bf16.gmra.mxu2 %v1794_v15  ;;  %v3803_v46 = vrot.slane %v3801_v51, 4  ;;  %v3807_v28 = vshrl.u32 %v6294_v58, 16 }
 0x22b   :  { %v1348_v13 = vpop.f32.mrf.mxu1  ;;  %v2921_v22 = vpop.f32.mrf.mxu0 }
 0x22c   :  { %3019 = vst [vmem:[#allocation8 + $0x88] sm:$0xff] %v2983_v29  ;;  %v1410_v56 = vadd.f32 %v1348_v13, %v1102_v45  ;;  %v3804_v48 = vor.u32 %v3803_v46, %v3800_v40  ;;  %v3233_v29 = vshrl.u32 %v7281_v54, 16  ;;  %v3809_v24 = vrot.slane %v3807_v28, 3  ;;  %v7312_v40 = vld [vmem:[#allocation2 + $0x24] sm:$0xff] }
 0x22d   :  { %v1915_v59 = vpop.f32.mrf.mxu2  ;;  %v3812_v13 = vrot.slane %v3810_v43, 4  ;;  %v3245_v21 = vshll.u32 %v7312_v40, 16  ;;  %v6296_v43 = vld [vmem:[#allocation2 + $0x30] sm:$0xff] }
 0x22e   :  { %v1978_v50 = vadd.f32 %v1915_v59, %v1409_v35  ;;  %2960 = vmatmul.bf16.gmra.mxu0 %v6257_v16  ;;  %v7284_v23 = vpop.f32.mrf.mxu3  ;;  %v3805_v17 = vsel %vm639_vm13, %v3796_v12, %v3804_v48  ;;  %v1104_v35 = vld [vmem:[#allocation8 + $0xa8] sm:$0xff]  ;;  %v3235_v10 = vor.u32 %v3233_v29, %v3231_v44 }
 0x22f   :  { %v3247_v57 = vrot.slane %v3245_v21, 1  ;;  %v6321_v12 = vld [vmem:[#allocation2 + $0x2c] sm:$0xff] }
 0x230   :  { %v2568_v31 = vadd.f32 %v7272_v33, %v1978_v50  ;;  %v3232_v33 = vsel %vm1646_vm1, %v3227_v60, %v3231_v44 }
 0x232   :  { %v2984_v47 = vadd.f32 %v2921_v22, %v2568_v31  ;;  %v7303_v22 = vld [vmem:[#allocation2 + $0x24] sm:$0xff] }
 0x233   :  { %v1351_v14 = vpop.f32.mrf.mxu1  ;;  %v2923_v3 = vpop.f32.mrf.mxu0  ;;  %4454 = vmatmul.bf16.gmra.mxu3 %v6319_v19  ;;  %v4811_v54 = vshll.u32 %v7303_v22, 16 }
 0x234   :  { %3020 = vst [vmem:[#allocation8 + $0x90] sm:$0xff] %v2984_v47  ;;  %v1411_v7 = vadd.f32 %v1351_v14, %v1103_v34  ;;  %v1105_v47 = vld [vmem:[#allocation8 + $0xb0] sm:$0xff]  ;;  %v4809_v14 = vor.u32 %v4807_v11, %v4805_v2 }
 0x235   :  { %v1917_v49 = vpop.f32.mrf.mxu2  ;;  %v4813_v44 = vrot.slane %v4811_v54, 1 }
 0x236   :  { %v1979_v4 = vadd.f32 %v1917_v49, %v1410_v56  ;;  %3443 = vmatmul.bf16.vlgmr.msra.gmra.mxu1 %v3232_v33  ;;  %v7291_v61 = vpop.f32.mrf.mxu3  ;;  %v3241_v56 = vshrl.u32 %v7295_v5, 16 }
 0x237   :  { %v4814_v26 = vsel %vm1646_vm1, %v4809_v14, %v4813_v44 }
 0x238   :  { %v2569_v0 = vadd.f32 %v7276_v62, %v1979_v4  ;;  %v3237_v62 = vshll.u32 %v7295_v5, 16 }
 0x23a   :  { %v2985_v6 = vadd.f32 %v2923_v3, %v2569_v0  ;;  %4033 = vmatmul.bf16.vlgmr.msra.gmra.mxu2 %v3805_v17  ;;  %v3239_v16 = vrot.slane %v3237_v62, 1  ;;  %v6295_v3 = vld [vmem:[#allocation2 + $0x28] sm:$0xff] }
 0x23b   :  { %v1353_v55 = vpop.f32.mrf.mxu1  ;;  %v2926_v27 = vpop.f32.mrf.mxu0  ;;  %v3816_v49 = vshrl.u32 %v6295_v3, 16  ;;  %v3819_v33 = vshll.u32 %v6295_v3, 16 }
 0x23c   :  { %3021 = vst [vmem:[#allocation8 + $0x98] sm:$0xff] %v2985_v6  ;;  %v1412_v51 = vadd.f32 %v1353_v55, %v1104_v35  ;;  %v3240_v39 = vsel %vm1646_vm1, %v3235_v10, %v3239_v16  ;;  %v3243_v38 = vor.u32 %v3241_v56, %v3239_v16  ;;  %v7320_v6 = vld [vmem:[#allocation2 + $0x2c] sm:$0xff]  ;;  %v3249_v35 = vshrl.u32 %v7312_v40, 16  ;;  %v7346_v56 = vld [vmem:[#allocation2 + $0x34] sm:$0xff] }
 0x23d   :  { %v1920_v8 = vpop.f32.mrf.mxu2  ;;  %v3818_v2 = vrot.slane %v3816_v49, 3  ;;  %v3821_v58 = vrot.slane %v3819_v33, 4  ;;  %v4823_v21 = vshrl.u32 %v7320_v6, 16  ;;  %v1109_v33 = vld [vmem:[#allocation8 + $0xd0] sm:$0xff] }
 0x23e   :  { %v1980_v20 = vadd.f32 %v1920_v8, %v1411_v7  ;;  %5017 = vmatmul.bf16.vlgmr.msra.gmra.mxu0 %v4806_v25  ;;  %v7299_v15 = vpop.f32.mrf.mxu3  ;;  %v3248_v5 = vsel %vm1646_vm1, %v3243_v38, %v3247_v57  ;;  %v4819_v8 = vshll.u32 %v7320_v6, 16 }
 0x23f   :  { %v3822_v1 = vor.u32 %v3821_v58, %v3818_v2 }
 0x240   :  { %v2570_v9 = vadd.f32 %v7278_v53, %v1980_v20  ;;  %v3813_v53 = vor.u32 %v3812_v13, %v3809_v24  ;;  %v4821_v24 = vrot.slane %v4819_v8, 1  ;;  %v7329_v13 = vld [vmem:[#allocation2 + $0x2c] sm:$0xff] }
 0x242   :  { %v2986_v18 = vadd.f32 %v2926_v27, %v2570_v9  ;;  %v3814_v36 = vsel %vm639_vm13, %v3804_v48, %v3813_v53  ;;  %v4815_v27 = vshrl.u32 %v7303_v22, 16  ;;  %v3823_v62 = vsel %vm639_vm13, %v3813_v53, %v3822_v1  ;;  %v1107_v9 = vld [vmem:[#allocation8 + $0xc0] sm:$0xff] }
 0x243   :  { %v1356_v59 = vpop.f32.mrf.mxu1  ;;  %v2928_v37 = vpop.f32.mrf.mxu0  ;;  %4459 = vmatmul.bf16.gmra.mxu3 %v6320_v30 }
 0x244   :  { %3022 = vst [vmem:[#allocation8 + $0xa0] sm:$0xff] %v2986_v18  ;;  %v1413_v60 = vadd.f32 %v1356_v59, %v1105_v47  ;;  %v4817_v28 = vor.u32 %v4815_v27, %v4813_v44  ;;  %v3828_v59 = vshll.u32 %v6296_v43, 16 }
 0x245   :  { %v1922_v50 = vpop.f32.mrf.mxu2 }
 0x246   :  { %v1981_v32 = vadd.f32 %v1922_v50, %v1412_v51  ;;  %3448 = vmatmul.bf16.gmra.mxu1 %v3240_v39  ;;  %v7307_v42 = vpop.f32.mrf.mxu3  ;;  %v4822_v30 = vsel %vm1646_vm1, %v4817_v28, %v4821_v24  ;;  %v3253_v51 = vshll.u32 %v7329_v13, 16  ;;  %v3251_v39 = vor.u32 %v3249_v35, %v3247_v57 }
 0x247   :  { %v3830_v54 = vrot.slane %v3828_v59, 4  ;;  %v6298_v59 = vld [vmem:[#allocation2 + $0x40] sm:$0xff] }
 0x248   :  { %v2571_v31 = vadd.f32 %v7284_v23, %v1981_v32  ;;  %v7337_v32 = vld [vmem:[#allocation2 + $0x34] sm:$0xff] }
 0x24a   :  { %v2987_v46 = vadd.f32 %v2928_v37, %v2571_v31  ;;  %4038 = vmatmul.bf16.gmra.mxu2 %v3814_v36  ;;  %v6322_v31 = vld [vmem:[#allocation2 + $0x34] sm:$0xff] }
 0x24b   :  { %v1358_v19 = vpop.f32.mrf.mxu1  ;;  %v2931_v45 = vpop.f32.mrf.mxu0  ;;  %v1108_v36 = vld [vmem:[#allocation8 + $0xc8] sm:$0xff] }
 0x24c   :  { %3023 = vst [vmem:[#allocation8 + $0xa8] sm:$0xff] %v2987_v46  ;;  %v1414_v34 = vadd.f32 %v1358_v19, %v1106_v63  ;;  %v3255_v46 = vrot.slane %v3253_v51, 1  ;;  %v1111_v51 = vld [vmem:[#allocation8 + $0xe0] sm:$0xff] }
 0x24d   :  { %v1925_v41 = vpop.f32.mrf.mxu2 }
 0x24e   :  { %v1982_v23 = vadd.f32 %v1925_v41, %v1413_v60  ;;  %5022 = vmatmul.bf16.gmra.mxu0 %v4814_v26  ;;  %v7316_v52 = vpop.f32.mrf.mxu3 }
 0x250   :  { %v2572_v48 = vadd.f32 %v7291_v61, %v1982_v23 }
 0x252   :  { %v2988_v4 = vadd.f32 %v2931_v45, %v2572_v48  ;;  %v3256_v45 = vsel %vm1646_vm1, %v3251_v39, %v3255_v46 }
 0x253   :  { %v1361_v0 = vpop.f32.mrf.mxu1  ;;  %v2933_v17 = vpop.f32.mrf.mxu0  ;;  %4464 = vmatmul.bf16.gmra.mxu3 %v6321_v12  ;;  %v6297_v12 = vld [vmem:[#allocation2 + $0x38] sm:$0xff] }
 0x254   :  { %3024 = vst [vmem:[#allocation8 + $0xb0] sm:$0xff] %v2988_v4  ;;  %v1415_v22 = vadd.f32 %v1361_v0, %v1107_v9  ;;  %v4825_v4 = vor.u32 %v4823_v21, %v4821_v24  ;;  %v3834_v58 = vshrl.u32 %v6297_v12, 16  ;;  %v3837_v6 = vshll.u32 %v6297_v12, 16  ;;  %v1112_v21 = vld [vmem:[#allocation8 + $0xe8] sm:$0xff] }
 0x255   :  { %v1927_v55 = vpop.f32.mrf.mxu2 }
 0x256   :  { %v1983_v61 = vadd.f32 %v1927_v55, %v1414_v34  ;;  %3453 = vmatmul.bf16.gmra.mxu1 %v3248_v5  ;;  %v7324_v7 = vpop.f32.mrf.mxu3  ;;  %v3257_v55 = vshrl.u32 %v7329_v13, 16  ;;  %v3836_v28 = vrot.slane %v3834_v58, 3  ;;  %v7380_v58 = vld [vmem:[#allocation2 + $0x44] sm:$0xff] }
 0x258   :  { %v2573_v25 = vadd.f32 %v7299_v15, %v1983_v61  ;;  %v3825_v15 = vshrl.u32 %v6296_v43, 16  ;;  %v6323_v61 = vld [vmem:[#allocation2 + $0x3c] sm:$0xff]  ;;  %v3839_v43 = vrot.slane %v3837_v6, 4 }
 0x25a   :  { %v2989_v20 = vadd.f32 %v2933_v17, %v2573_v25  ;;  %4043 = vmatmul.bf16.gmra.mxu2 %v3823_v62  ;;  %v3827_v53 = vrot.slane %v3825_v15, 3  ;;  %v3259_v62 = vor.u32 %v3257_v55, %v3255_v46  ;;  %v3840_v24 = vor.u32 %v3839_v43, %v3836_v28 }
 0x25b   :  { %v1363_v29 = vpop.f32.mrf.mxu1  ;;  %v2936_v16 = vpop.f32.mrf.mxu0  ;;  %v3265_v46 = vshrl.u32 %v7346_v56, 16 }
 0x25c   :  { %3025 = vst [vmem:[#allocation8 + $0xb8] sm:$0xff] %v2989_v20  ;;  %v1416_v47 = vadd.f32 %v1363_v29, %v1108_v36  ;;  %v3831_v14 = vor.u32 %v3830_v54, %v3827_v53  ;;  %v7354_v20 = vld [vmem:[#allocation2 + $0x3c] sm:$0xff]  ;;  %v3843_v36 = vshrl.u32 %v6298_v59, 16 }
 0x25d   :  { %v1930_v18 = vpop.f32.mrf.mxu2  ;;  %v7363_v54 = vld [vmem:[#allocation2 + $0x3c] sm:$0xff] }
 0x25e   :  { %v1984_v37 = vadd.f32 %v1930_v18, %v1415_v22  ;;  %5027 = vmatmul.bf16.gmra.mxu0 %v4822_v30  ;;  %v7333_v10 = vpop.f32.mrf.mxu3  ;;  %v3832_v26 = vsel %vm639_vm13, %v3822_v1, %v3831_v14  ;;  %v1110_v1 = vld [vmem:[#allocation8 + $0xd8] sm:$0xff]  ;;  %v4831_v22 = vshrl.u32 %v7337_v32, 16  ;;  %v4835_v18 = vshll.u32 %v7354_v20, 16 }
 0x25f   :  { %v3841_v35 = vsel %vm639_vm13, %v3831_v14, %v3840_v24  ;;  %v3845_v14 = vrot.slane %v3843_v36, 3  ;;  %v3273_v43 = vshrl.u32 %v7363_v54, 16 }
 0x260   :  { %v2574_v50 = vadd.f32 %v7307_v42, %v1984_v37  ;;  %v4827_v42 = vshll.u32 %v7337_v32, 16  ;;  %v4837_v53 = vrot.slane %v4835_v18, 1 }
 0x262   :  { %v2990_v11 = vadd.f32 %v2936_v16, %v2574_v50  ;;  %v4829_v23 = vrot.slane %v4827_v42, 1 }
 0x263   :  { %v1366_v44 = vpop.f32.mrf.mxu1  ;;  %v2938_v40 = vpop.f32.mrf.mxu0  ;;  %4469 = vmatmul.bf16.gmra.mxu3 %v6322_v31 }
 0x264   :  { %3026 = vst [vmem:[#allocation8 + $0xc0] sm:$0xff] %v2990_v11  ;;  %v1417_v63 = vadd.f32 %v1366_v44, %v1109_v33  ;;  %v4830_v17 = vsel %vm1646_vm1, %v4825_v4, %v4829_v23  ;;  %v4833_v15 = vor.u32 %v4831_v22, %v4829_v23  ;;  %v3846_v44 = vshll.u32 %v6298_v59, 16  ;;  %v1114_v22 = vld [vmem:[#allocation8 + $0xf8] sm:$0xff] }
 0x265   :  { %v1932_v19 = vpop.f32.mrf.mxu2 }
 0x266   :  { %v1985_v3 = vadd.f32 %v1932_v19, %v1416_v47  ;;  %3458 = vmatmul.bf16.gmra.mxu1 %v3256_v45  ;;  %v7341_v60 = vpop.f32.mrf.mxu3  ;;  %v4838_v32 = vsel %vm1646_vm1, %v4833_v15, %v4837_v53  ;;  %v3269_v47 = vshll.u32 %v7363_v54, 16  ;;  %v3848_v42 = vrot.slane %v3846_v44, 4 }
 0x268   :  { %v2575_v41 = vadd.f32 %v7316_v52, %v1985_v3  ;;  %v3261_v52 = vshll.u32 %v7346_v56, 16  ;;  %v7371_v3 = vld [vmem:[#allocation2 + $0x44] sm:$0xff]  ;;  %v3271_v33 = vrot.slane %v3269_v47, 1  ;;  %v3849_v4 = vor.u32 %v3848_v42, %v3845_v14  ;;  %v6274_v42 = vld [vmem:[#allocation2 + $0x4c] sm:$0xff] }
 0x269   :  { %v1115_v47 = vld [vmem:[#allocation8 + $0x100] sm:$0xff] }
 0x26a   :  { %v2991_v49 = vadd.f32 %v2938_v40, %v2575_v41  ;;  %4048 = vmatmul.bf16.gmra.mxu2 %v3832_v26  ;;  %v3263_v5 = vrot.slane %v3261_v52, 1  ;;  %v6324_v26 = vld [vmem:[#allocation2 + $0x44] sm:$0xff]  ;;  %v3850_v52 = vsel %vm639_vm13, %v3840_v24, %v3849_v4 }
 0x26b   :  { %v1368_v48 = vpop.f32.mrf.mxu1  ;;  %v2941_v57 = vpop.f32.mrf.mxu0 }
 0x26c   :  { %3027 = vst [vmem:[#allocation8 + $0xc8] sm:$0xff] %v2991_v49  ;;  %v1418_v9 = vadd.f32 %v1368_v48, %v1110_v1  ;;  %v3264_v16 = vsel %vm1646_vm1, %v3259_v62, %v3263_v5  ;;  %v3267_v45 = vor.u32 %v3265_v46, %v3263_v5  ;;  %v3277_v62 = vshll.u32 %v7380_v58, 16 }
 0x26d   :  { %v1935_v0 = vpop.f32.mrf.mxu2 }
 0x26e   :  { %v1986_v38 = vadd.f32 %v1935_v0, %v1417_v63  ;;  %5032 = vmatmul.bf16.gmra.mxu0 %v4830_v17  ;;  %v7350_v2 = vpop.f32.mrf.mxu3  ;;  %v3272_v56 = vsel %vm1646_vm1, %v3267_v45, %v3271_v33  ;;  %v4839_v0 = vshrl.u32 %v7354_v20, 16 }
 0x270   :  { %v2576_v34 = vadd.f32 %v7324_v7, %v1986_v38 }
 0x272   :  { %v2992_v27 = vadd.f32 %v2941_v57, %v2576_v34  ;;  %v1113_v34 = vld [vmem:[#allocation8 + $0xf0] sm:$0xff] }
 0x273   :  { %v1371_v8 = vpop.f32.mrf.mxu1  ;;  %v2943_v25 = vpop.f32.mrf.mxu0  ;;  %4474 = vmatmul.bf16.gmra.mxu3 %v6323_v61  ;;  %v6299_v61 = vld [vmem:[#allocation2 + $0x48] sm:$0xff] }
 0x274   :  { %3028 = vst [vmem:[#allocation8 + $0xd0] sm:$0xff] %v2992_v27  ;;  %v1419_v11 = vadd.f32 %v1371_v8, %v1111_v51  ;;  %v4841_v27 = vor.u32 %v4839_v0, %v4837_v53  ;;  %v3852_v20 = vshrl.u32 %v6299_v61, 16  ;;  %v4847_v53 = vshrl.u32 %v7371_v3, 16 }
 0x275   :  { %v1937_v29 = vpop.f32.mrf.mxu2 }
 0x276   :  { %v1987_v7 = vadd.f32 %v1937_v29, %v1418_v9  ;;  %3463 = vmatmul.bf16.gmra.mxu1 %v3264_v16  ;;  %v7357_v13 = vpop.f32.mrf.mxu3  ;;  %v3855_v9 = vshll.u32 %v6299_v61, 16  ;;  %v6325_v16 = vld [vmem:[#allocation2 + $0x4c] sm:$0xff]  ;;  %v3854_v15 = vrot.slane %v3852_v20, 3  ;;  %v7407_v20 = vld [vmem:[#allocation2 + $0x54] sm:$0xff] }
 0x278   :  { %v2577_v30 = vadd.f32 %v7333_v10, %v1987_v7  ;;  %v3279_v7 = vrot.slane %v3277_v62, 1  ;;  %v3857_v59 = vrot.slane %v3855_v9, 4  ;;  %v6301_v9 = vld [vmem:[#allocation2 + $0x58] sm:$0xff] }
 0x27a   :  { %v2993_v37 = vadd.f32 %v2943_v25, %v2577_v30  ;;  %4053 = vmatmul.bf16.gmra.mxu2 %v3841_v35  ;;  %v3275_v35 = vor.u32 %v3273_v43, %v3271_v33 }
 0x27b   :  { %v1373_v50 = vpop.f32.mrf.mxu1  ;;  %v2946_v39 = vpop.f32.mrf.mxu0 }
 0x27c   :  { %3029 = vst [vmem:[#allocation8 + $0xd8] sm:$0xff] %v2993_v37  ;;  %v1420_v48 = vadd.f32 %v1373_v50, %v1112_v21  ;;  %v6351_v37 = vld [vmem:[#allocation2 + $0x4c] sm:$0xff]  ;;  %v3281_v21 = vshrl.u32 %v7380_v58, 16 }
 0x27d   :  { %v1940_v31 = vpop.f32.mrf.mxu2  ;;  %v4855_v61 = vshrl.u32 %v6351_v37, 16 }
 0x27e   :  { %v1988_v10 = vadd.f32 %v1940_v31, %v1419_v11  ;;  %5037 = vmatmul.bf16.gmra.mxu0 %v4838_v32  ;;  %v7366_v40 = vpop.f32.mrf.mxu3  ;;  %v4851_v31 = vshll.u32 %v6351_v37, 16 }
 0x280   :  { %v2578_v19 = vadd.f32 %v7341_v60, %v1988_v10  ;;  %v4843_v60 = vshll.u32 %v7371_v3, 16  ;;  %v6300_v10 = vld [vmem:[#allocation2 + $0x50] sm:$0xff]  ;;  %v4853_v14 = vrot.slane %v4851_v31, 1  ;;  %v7414_v31 = vld [vmem:[#allocation2 + $0x5c] sm:$0xff] }
 0x282   :  { %v2994_v41 = vadd.f32 %v2946_v39, %v2578_v19  ;;  %v4845_v38 = vrot.slane %v4843_v60, 1  ;;  %v3280_v39 = vsel %vm1646_vm1, %v3275_v35, %v3279_v7 }
 0x283   :  { %v1376_v23 = vpop.f32.mrf.mxu1  ;;  %v2948_v49 = vpop.f32.mrf.mxu0  ;;  %4479 = vmatmul.bf16.gmra.mxu3 %v6324_v26 }
 0x284   :  { %3030 = vst [vmem:[#allocation8 + $0xe0] sm:$0xff] %v2994_v41  ;;  %v1421_v1 = vadd.f32 %v1376_v23, %v1113_v34  ;;  %v4846_v25 = vsel %vm1646_vm1, %v4841_v27, %v4845_v38  ;;  %v4849_v44 = vor.u32 %v4847_v53, %v4845_v38  ;;  %v3861_v23 = vshrl.u32 %v6300_v10, 16 }
 0x285   :  { %v1942_v57 = vpop.f32.mrf.mxu2 }
 0x286   :  { %v1989_v12 = vadd.f32 %v1942_v57, %v1420_v48  ;;  %3468 = vmatmul.bf16.gmra.mxu1 %v3272_v56  ;;  %v7375_v63 = vpop.f32.mrf.mxu3  ;;  %v4854_v26 = vsel %vm1646_vm1, %v4849_v44, %v4853_v14  ;;  %v3285_v48 = vshll.u32 %v6274_v42, 16  ;;  %v3283_v56 = vor.u32 %v3281_v21, %v3279_v7  ;;  %v1118_v44 = vld [vmem:[#allocation8 + $0x118] sm:$0xff] }
 0x288   :  { %v2579_v17 = vadd.f32 %v7350_v2, %v1989_v12  ;;  %v7399_v12 = vld [vmem:[#allocation2 + $0x54] sm:$0xff]  ;;  %v3287_v58 = vrot.slane %v3285_v48, 1 }
 0x289   :  { %v4863_v21 = vshrl.u32 %v7399_v12, 16 }
 0x28a   :  { %v2995_v6 = vadd.f32 %v2948_v49, %v2579_v17  ;;  %4058 = vmatmul.bf16.gmra.mxu2 %v3850_v52  ;;  %v6326_v17 = vld [vmem:[#allocation2 + $0x54] sm:$0xff] }
 0x28b   :  { %v1378_v55 = vpop.f32.mrf.mxu1  ;;  %v2951_v5 = vpop.f32.mrf.mxu0  ;;  %v1116_v52 = vld [vmem:[#allocation8 + $0x108] sm:$0xff] }
 0x28c   :  { %3031 = vst [vmem:[#allocation8 + $0xe8] sm:$0xff] %v2995_v6  ;;  %v1422_v51 = vadd.f32 %v1378_v55, %v1114_v22 }
 0x28d   :  { %v1945_v8 = vpop.f32.mrf.mxu2 }
 0x28e   :  { %v1990_v2 = vadd.f32 %v1945_v8, %v1421_v1  ;;  %5042 = vmatmul.bf16.gmra.mxu0 %v4846_v25  ;;  %v7384_v28 = vpop.f32.mrf.mxu3 }
 0x290   :  { %v2580_v29 = vadd.f32 %v7357_v13, %v1990_v2  ;;  %v3858_v13 = vor.u32 %v3857_v59, %v3854_v15  ;;  %v4857_v2 = vor.u32 %v4855_v61, %v4853_v14  ;;  %v3870_v15 = vshrl.u32 %v6301_v9, 16 }
 0x291   :  { %v3873_v59 = vshll.u32 %v6301_v9, 16  ;;  %v7431_v9 = vld [vmem:[#allocation2 + $0x64] sm:$0xff] }
 0x292   :  { %v2996_v24 = vadd.f32 %v2951_v5, %v2580_v29  ;;  %v3859_v36 = vsel %vm639_vm13, %v3849_v4, %v3858_v13  ;;  %v3863_v4 = vrot.slane %v3861_v23, 3  ;;  %v3288_v5 = vsel %vm1646_vm1, %v3283_v56, %v3287_v58 }
 0x293   :  { %v1381_v18 = vpop.f32.mrf.mxu1  ;;  %v2953_v30 = vpop.f32.mrf.mxu0  ;;  %4484 = vmatmul.bf16.gmra.mxu3 %v6325_v16  ;;  %v1117_v16 = vld [vmem:[#allocation8 + $0x110] sm:$0xff] }
 0x294   :  { %3032 = vst [vmem:[#allocation8 + $0xf0] sm:$0xff] %v2996_v24  ;;  %v1423_v3 = vadd.f32 %v1381_v18, %v1115_v47  ;;  %v3289_v18 = vshrl.u32 %v6274_v42, 16 }
 0x295   :  { %v1947_v50 = vpop.f32.mrf.mxu2 }
 0x296   :  { %v1991_v54 = vadd.f32 %v1947_v50, %v1422_v51  ;;  %3473 = vmatmul.bf16.gmra.mxu1 %v3280_v39  ;;  %v7390_v11 = vpop.f32.mrf.mxu3  ;;  %v3291_v39 = vor.u32 %v3289_v18, %v3287_v58  ;;  %v4875_v18 = vshll.u32 %v7431_v9, 16 }
 0x298   :  { %v2581_v32 = vadd.f32 %v7366_v40, %v1991_v54  ;;  %v3864_v40 = vshll.u32 %v6300_v10, 16  ;;  %v3872_v54 = vrot.slane %v3870_v15, 3  ;;  %v6303_v15 = vld [vmem:[#allocation2 + $0x68] sm:$0xff] }
 0x29a   :  { %v2997_v46 = vadd.f32 %v2953_v30, %v2581_v32  ;;  %4063 = vmatmul.bf16.gmra.mxu2 %v3859_v36  ;;  %v3866_v60 = vrot.slane %v3864_v40, 4  ;;  %v6327_v36 = vld [vmem:[#allocation2 + $0x5c] sm:$0xff] }
 0x29b   :  { %v1383_v19 = vpop.f32.mrf.mxu1  ;;  %v2956_v45 = vpop.f32.mrf.mxu0  ;;  %v7423_v40 = vld [vmem:[#allocation2 + $0x5c] sm:$0xff] }
 0x29c   :  { %3033 = vst [vmem:[#allocation8 + $0xf8] sm:$0xff] %v2997_v46  ;;  %v1424_v34 = vadd.f32 %v1383_v19, %v1116_v52  ;;  %v3867_v27 = vor.u32 %v3866_v60, %v3863_v4 }
 0x29d   :  { %v1950_v41 = vpop.f32.mrf.mxu2 }
 0x29e   :  { %v1992_v49 = vadd.f32 %v1950_v41, %v1423_v3  ;;  %5047 = vmatmul.bf16.gmra.mxu0 %v4854_v26  ;;  %v7396_v33 = vpop.f32.mrf.mxu3  ;;  %v3868_v62 = vsel %vm639_vm13, %v3858_v13, %v3867_v27  ;;  %v3875_v13 = vrot.slane %v3873_v59, 4 }
 0x2a0   :  { %v2582_v57 = vadd.f32 %v7375_v63, %v1992_v49  ;;  %v4859_v63 = vshll.u32 %v7399_v12, 16  ;;  %v3876_v14 = vor.u32 %v3875_v13, %v3872_v54  ;;  %v6302_v49 = vld [vmem:[#allocation2 + $0x60] sm:$0xff] }
 0x2a1   :  { %v7440_v54 = vld [vmem:[#allocation2 + $0x64] sm:$0xff] }
 0x2a2   :  { %v2998_v0 = vadd.f32 %v2956_v45, %v2582_v57  ;;  %v4861_v43 = vrot.slane %v4859_v63, 1  ;;  %v3877_v26 = vsel %vm639_vm13, %v3867_v27, %v3876_v14  ;;  %v3075_v57 = vld [vmem:[#allocation8] sm:$0xff] }
 0x2a3   :  { %v1386_v38 = vpop.f32.mrf.mxu1  ;;  %v2958_v6 = vpop.f32.mrf.mxu0  ;;  %4489 = vmatmul.bf16.gmra.mxu3 %v6326_v17 }
 0x2a4   :  { %3034 = vst [vmem:[#allocation8 + $0x100] sm:$0xff] %v2998_v0  ;;  %v1425_v22 = vadd.f32 %v1386_v38, %v1117_v16  ;;  %v4862_v35 = vsel %vm1646_vm1, %v4857_v2, %v4861_v43  ;;  %v4865_v60 = vor.u32 %v4863_v21, %v4861_v43  ;;  %v3879_v38 = vshrl.u32 %v6302_v49, 16  ;;  %v3078_v21 = vld [vmem:[#allocation8 + $0x18] sm:$0xff] }
 0x2a5   :  { %v1952_v55 = vpop.f32.mrf.mxu2 }
 0x2a6   :  { %v1993_v1 = vadd.f32 %v1952_v55, %v1424_v34  ;;  %3478 = vmatmul.bf16.gmra.mxu1 %v3288_v5  ;;  %v7403_v8 = vpop.f32.mrf.mxu3  ;;  %v3297_v55 = vshrl.u32 %v7407_v20, 16  ;;  %v3881_v27 = vrot.slane %v3879_v38, 3 }
 0x2a8   :  { %v2583_v25 = vadd.f32 %v7384_v28, %v1993_v1  ;;  %v3293_v28 = vshll.u32 %v7407_v20, 16  ;;  %v6328_v1 = vld [vmem:[#allocation2 + $0x64] sm:$0xff] }
 0x2aa   :  { %v2999_v29 = vadd.f32 %v2958_v6, %v2583_v25  ;;  %4068 = vmatmul.bf16.gmra.mxu2 %v3868_v62  ;;  %v3295_v53 = vrot.slane %v3293_v28, 1  ;;  %v3882_v6 = vshll.u32 %v6302_v49, 16  ;;  %v3076_v25 = vld [vmem:[#allocation8 + $0x8] sm:$0xff] }
 0x2ab   :  { %v1388_v7 = vpop.f32.mrf.mxu1  ;;  %v2961_v24 = vpop.f32.mrf.mxu0 }
 0x2ac   :  { %3035 = vst [vmem:[#allocation8 + $0x108] sm:$0xff] %v2999_v29  ;;  %v1426_v47 = vadd.f32 %v1388_v7, %v1118_v44  ;;  %v3296_v45 = vsel %vm1646_vm1, %v3291_v39, %v3295_v53  ;;  %v3884_v61 = vrot.slane %v3882_v6, 4  ;;  %v3299_v43 = vor.u32 %v3297_v55, %v3295_v53  ;;  %v7457_v6 = vld [vmem:[#allocation2 + $0x6c] sm:$0xff] }
 0x2ad   :  { %v1955_v30 = vpop.f32.mrf.mxu2  ;;  %v4877_v53 = vrot.slane %v4875_v18, 1  ;;  %v3891_v44 = vshll.u32 %v6303_v15, 16  ;;  %v3079_v55 = vld [vmem:[#allocation8 + $0x20] sm:$0xff] }
 0x2ae   :  { %v1994_v37 = vadd.f32 %v1955_v30, %v1425_v22  ;;  %5052 = vmatmul.bf16.gmra.mxu0 %v4862_v35  ;;  %v7411_v51 = vpop.f32.mrf.mxu3  ;;  %v4871_v22 = vshrl.u32 %v7414_v31, 16 }
 0x2b0   :  { %v2584_v50 = vadd.f32 %v7390_v11, %v1994_v37  ;;  %v4867_v11 = vshll.u32 %v7414_v31, 16  ;;  %v3077_v37 = vld [vmem:[#allocation8 + $0x10] sm:$0xff] }
 0x2b2   :  { %v3000_v32 = vadd.f32 %v2961_v24, %v2584_v50  ;;  %v4869_v23 = vrot.slane %v4867_v11, 1  ;;  %v3893_v11 = vrot.slane %v3891_v44, 4 }
 0x2b3   :  { %v2963_v10 = vpop.f32.mrf.mxu0  ;;  %v3444_v46 = vpop.f32.mrf.mxu1  ;;  %4494 = vmatmul.bf16.gmra.mxu3 %v6327_v36  ;;  %v3888_v36 = vshrl.u32 %v6303_v15, 16 }
 0x2b4   :  { %3036 = vst [vmem:[#allocation8 + $0x110] sm:$0xff] %v3000_v32  ;;  %v3534_v0 = vadd.f32 %v3444_v46, %v3075_v57  ;;  %v4870_v52 = vsel %vm1646_vm1, %v4865_v60, %v4869_v23  ;;  %v4873_v28 = vor.u32 %v4871_v22, %v4869_v23  ;;  %v3305_v46 = vshrl.u32 %v7423_v40, 16  ;;  %v7465_v22 = vld [vmem:[#allocation2 + $0x74] sm:$0xff] }
 0x2b5   :  { %v1957_v19 = vpop.f32.mrf.mxu2 }
 0x2b6   :  { %v1995_v42 = vadd.f32 %v1957_v19, %v1426_v47  ;;  %3483 = vmatmul.bf16.gmra.mxu1 %v3296_v45  ;;  %v7418_v3 = vpop.f32.mrf.mxu3  ;;  %v4878_v31 = vsel %vm1646_vm1, %v4873_v28, %v4877_v53  ;;  %v3309_v47 = vshll.u32 %v7440_v54, 16 }
 0x2b8   :  { %v2585_v41 = vadd.f32 %v7396_v33, %v1995_v42  ;;  %v3301_v33 = vshll.u32 %v7423_v40, 16  ;;  %v7448_v42 = vld [vmem:[#allocation2 + $0x6c] sm:$0xff] }
 0x2ba   :  { %v3001_v48 = vadd.f32 %v2963_v10, %v2585_v41  ;;  %4073 = vmatmul.bf16.gmra.mxu2 %v3877_v26  ;;  %v3303_v5 = vrot.slane %v3301_v33, 1  ;;  %v6329_v26 = vld [vmem:[#allocation2 + $0x6c] sm:$0xff] }
 0x2bb   :  { %v3446_v56 = vpop.f32.mrf.mxu1  ;;  %v5018_v4 = vpop.f32.mrf.mxu0 }
 0x2bc   :  { %3037 = vst [vmem:[#allocation8 + $0x118] sm:$0xff] %v3001_v48  ;;  %v3535_v29 = vadd.f32 %v3446_v56, %v3076_v25  ;;  %v3304_v7 = vsel %vm1646_vm1, %v3299_v43, %v3303_v5  ;;  %v3307_v45 = vor.u32 %v3305_v46, %v3303_v5  ;;  %v3311_v48 = vrot.slane %v3309_v47, 1  ;;  %v3081_v47 = vld [vmem:[#allocation8 + $0x30] sm:$0xff] }
 0x2bd   :  { %v4034_v17 = vpop.f32.mrf.mxu2 }
 0x2be   :  { %v4124_v12 = vadd.f32 %v4034_v17, %v3534_v0  ;;  %5057 = vmatmul.bf16.gmra.mxu0 %v4870_v52  ;;  %v7427_v58 = vpop.f32.mrf.mxu3  ;;  %v3312_v40 = vsel %vm1646_vm1, %v3307_v45, %v3311_v48  ;;  %v4879_v17 = vshrl.u32 %v7431_v9, 16 }
 0x2c0   :  { %v4540_v34 = vadd.f32 %v7403_v8, %v4124_v12  ;;  %v3885_v8 = vor.u32 %v3884_v61, %v3881_v27  ;;  %v6304_v12 = vld [vmem:[#allocation2 + $0x70] sm:$0xff]  ;;  %v4881_v61 = vor.u32 %v4879_v17, %v4877_v53 }
 0x2c2   :  { %v5108_v63 = vadd.f32 %v5018_v4, %v4540_v34  ;;  %v3886_v35 = vsel %vm639_vm13, %v3876_v14, %v3885_v8  ;;  %v3890_v14 = vrot.slane %v3888_v36, 3 }
 0x2c3   :  { %v3449_v62 = vpop.f32.mrf.mxu1  ;;  %v5020_v2 = vpop.f32.mrf.mxu0  ;;  %4499 = vmatmul.bf16.gmra.mxu3 %v6328_v1 }
 0x2c4   :  { %5144 = vst [vmem:[#allocation8] sm:$0xff] %v5108_v63  ;;  %v3536_v13 = vadd.f32 %v3449_v62, %v3077_v37  ;;  %v3894_v4 = vor.u32 %v3893_v11, %v3890_v14  ;;  %v3317_v62 = vshll.u32 %v7457_v6, 16  ;;  %v6305_v11 = vld [vmem:[#allocation2 + $0x78] sm:$0xff] }
 0x2c5   :  { %v4036_v16 = vpop.f32.mrf.mxu2 }
 0x2c6   :  { %v4125_v24 = vadd.f32 %v4036_v16, %v3535_v29  ;;  %3488 = vmatmul.bf16.gmra.mxu1 %v3304_v7  ;;  %v7434_v20 = vpop.f32.mrf.mxu3  ;;  %v3895_v33 = vsel %vm639_vm13, %v3885_v8, %v3894_v4  ;;  %v3313_v29 = vshrl.u32 %v7440_v54, 16  ;;  %v3319_v7 = vrot.slane %v3317_v62, 1 }
 0x2c8   :  { %v4541_v30 = vadd.f32 %v7411_v51, %v4125_v24 }
 0x2ca   :  { %v5109_v59 = vadd.f32 %v5020_v2, %v4541_v30  ;;  %4078 = vmatmul.bf16.gmra.mxu2 %v3886_v35  ;;  %v3900_v2 = vshll.u32 %v6304_v12, 16  ;;  %v6330_v30 = vld [vmem:[#allocation2 + $0x74] sm:$0xff] }
 0x2cb   :  { %v3451_v50 = vpop.f32.mrf.mxu1  ;;  %v5023_v39 = vpop.f32.mrf.mxu0  ;;  %v3080_v35 = vld [vmem:[#allocation8 + $0x28] sm:$0xff] }
 0x2cc   :  { %5145 = vst [vmem:[#allocation8 + $0x8] sm:$0xff] %v5109_v59  ;;  %v3537_v57 = vadd.f32 %v3451_v50, %v3078_v21  ;;  %v3902_v24 = vrot.slane %v3900_v2, 4  ;;  %v3315_v59 = vor.u32 %v3313_v29, %v3311_v48  ;;  %v3906_v48 = vshrl.u32 %v6305_v11, 16  ;;  %v6306_v2 = vld [vmem:[#allocation2 + $0x80] sm:$0xff]  ;;  %v3083_v29 = vld [vmem:[#allocation8 + $0x40] sm:$0xff] }
 0x2cd   :  { %v4039_v32 = vpop.f32.mrf.mxu2 }
 0x2ce   :  { %v4126_v51 = vadd.f32 %v4039_v32, %v3536_v13  ;;  %5062 = vmatmul.bf16.gmra.mxu0 %v4878_v31  ;;  %v7443_v10 = vpop.f32.mrf.mxu3  ;;  %v4887_v32 = vshrl.u32 %v7448_v42, 16 }
 0x2d0   :  { %v4542_v19 = vadd.f32 %v7418_v3, %v4126_v51  ;;  %v4883_v3 = vshll.u32 %v7448_v42, 16  ;;  %v7474_v51 = vld [vmem:[#allocation2 + $0x74] sm:$0xff] }
 0x2d1   :  { %v3325_v42 = vshll.u32 %v7474_v51, 16 }
 0x2d2   :  { %v5110_v41 = vadd.f32 %v5023_v39, %v4542_v19  ;;  %v4885_v38 = vrot.slane %v4883_v3, 1  ;;  %v3320_v39 = vsel %vm1646_vm1, %v3315_v59, %v3319_v7  ;;  %v6331_v3 = vld [vmem:[#allocation2 + $0x7c] sm:$0xff] }
 0x2d3   :  { %v3454_v23 = vpop.f32.mrf.mxu1  ;;  %v5025_v49 = vpop.f32.mrf.mxu0  ;;  %4504 = vmatmul.bf16.gmra.mxu3 %v6329_v26 }
 0x2d4   :  { %5146 = vst [vmem:[#allocation8 + $0x10] sm:$0xff] %v5110_v41  ;;  %v3538_v63 = vadd.f32 %v3454_v23, %v3079_v55  ;;  %v4886_v25 = vsel %vm1646_vm1, %v4881_v61, %v4885_v38  ;;  %v4889_v14 = vor.u32 %v4887_v32, %v4885_v38  ;;  %v3908_v38 = vrot.slane %v3906_v48, 3  ;;  %v6332_v32 = vld [vmem:[#allocation2 + $0x84] sm:$0xff] }
 0x2d5   :  { %v4041_v56 = vpop.f32.mrf.mxu2 }
 0x2d6   :  { %v4127_v60 = vadd.f32 %v4041_v56, %v3537_v57  ;;  %3493 = vmatmul.bf16.gmra.mxu1 %v3312_v40  ;;  %v7452_v0 = vpop.f32.mrf.mxu3  ;;  %v3909_v57 = vshll.u32 %v6305_v11, 16  ;;  %v3327_v40 = vrot.slane %v3325_v42, 1 }
 0x2d8   :  { %v4543_v52 = vadd.f32 %v7427_v58, %v4127_v60  ;;  %v3897_v58 = vshrl.u32 %v6304_v12, 16  ;;  %v3082_v60 = vld [vmem:[#allocation8 + $0x38] sm:$0xff]  ;;  %v3911_v12 = vrot.slane %v3909_v57, 4  ;;  %v3085_v57 = vld [vmem:[#allocation8 + $0x50] sm:$0xff] }
 0x2da   :  { %v5111_v34 = vadd.f32 %v5025_v49, %v4543_v52  ;;  %4083 = vmatmul.bf16.gmra.mxu2 %v3895_v33  ;;  %v3899_v8 = vrot.slane %v3897_v58, 3  ;;  %v3321_v49 = vshrl.u32 %v7457_v6, 16 }
 0x2db   :  { %v3456_v5 = vpop.f32.mrf.mxu1  ;;  %v5028_v27 = vpop.f32.mrf.mxu0 }
 0x2dc   :  { %5147 = vst [vmem:[#allocation8 + $0x18] sm:$0xff] %v5111_v34  ;;  %v3539_v37 = vadd.f32 %v3456_v5, %v3080_v35  ;;  %v3903_v53 = vor.u32 %v3902_v24, %v3899_v8  ;;  %v3323_v33 = vor.u32 %v3321_v49, %v3319_v7  ;;  %v6357_v34 = vld [vmem:[#allocation2 + $0x7c] sm:$0xff]  ;;  %v3329_v35 = vshrl.u32 %v7474_v51, 16  ;;  %v6307_v49 = vld [vmem:[#allocation2 + $0x88] sm:$0xff] }
 0x2dd   :  { %v4044_v1 = vpop.f32.mrf.mxu2  ;;  %v6280_v24 = vld [vmem:[#allocation2 + $0x7c] sm:$0xff]  ;;  %v4903_v11 = vshrl.u32 %v6357_v34, 16 }
 0x2de   :  { %v4128_v43 = vadd.f32 %v4044_v1, %v3538_v63  ;;  %5067 = vmatmul.bf16.gmra.mxu0 %v4886_v25  ;;  %v7461_v9 = vpop.f32.mrf.mxu3  ;;  %v3904_v36 = vsel %vm639_vm13, %v3894_v4, %v3903_v53  ;;  %v3328_v6 = vsel %vm1646_vm1, %v3323_v33, %v3327_v40  ;;  %v4899_v1 = vshll.u32 %v6357_v34, 16 }
 0x2df   :  { %v3337_v33 = vshrl.u32 %v6280_v24, 16 }
 0x2e0   :  { %v4544_v16 = vadd.f32 %v7434_v20, %v4128_v43  ;;  %v4891_v20 = vshll.u32 %v7465_v22, 16  ;;  %v4901_v8 = vrot.slane %v4899_v1, 1 }
 0x2e2   :  { %v5112_v18 = vadd.f32 %v5028_v27, %v4544_v16  ;;  %v4893_v44 = vrot.slane %v4891_v20, 1  ;;  %v4895_v27 = vshrl.u32 %v7465_v22, 16 }
 0x2e3   :  { %v3459_v28 = vpop.f32.mrf.mxu1  ;;  %v5030_v15 = vpop.f32.mrf.mxu0  ;;  %4509 = vmatmul.bf16.gmra.mxu3 %v6330_v30 }
 0x2e4   :  { %5148 = vst [vmem:[#allocation8 + $0x20] sm:$0xff] %v5112_v18  ;;  %v3540_v41 = vadd.f32 %v3459_v28, %v3081_v47  ;;  %v4894_v21 = vsel %vm1646_vm1, %v4889_v14, %v4893_v44  ;;  %v4897_v58 = vor.u32 %v4895_v27, %v4893_v44  ;;  %v3915_v28 = vshrl.u32 %v6306_v2, 16  ;;  %v7493_v47 = vld [vmem:[#allocation2 + $0x84] sm:$0xff] }
 0x2e5   :  { %v4046_v50 = vpop.f32.mrf.mxu2 }
 0x2e6   :  { %v4129_v54 = vadd.f32 %v4046_v50, %v3539_v37  ;;  %3498 = vmatmul.bf16.gmra.mxu1 %v3320_v39  ;;  %v7469_v13 = vpop.f32.mrf.mxu3  ;;  %v4902_v30 = vsel %vm1646_vm1, %v4897_v58, %v4901_v8  ;;  %v3333_v37 = vshll.u32 %v6280_v24, 16  ;;  %v3331_v39 = vor.u32 %v3329_v35, %v3327_v40 }
 0x2e8   :  { %v4545_v31 = vadd.f32 %v7443_v10, %v4129_v54 }
 0x2ea   :  { %v5113_v46 = vadd.f32 %v5030_v15, %v4545_v31  ;;  %4088 = vmatmul.bf16.gmra.mxu2 %v3904_v36  ;;  %v3084_v31 = vld [vmem:[#allocation8 + $0x48] sm:$0xff] }
 0x2eb   :  { %v3461_v19 = vpop.f32.mrf.mxu1  ;;  %v5033_v45 = vpop.f32.mrf.mxu0 }
 0x2ec   :  { %5149 = vst [vmem:[#allocation8 + $0x28] sm:$0xff] %v5113_v46  ;;  %v3541_v55 = vadd.f32 %v3461_v19, %v3082_v60  ;;  %v3335_v46 = vrot.slane %v3333_v37, 1 }
 0x2ed   :  { %v4049_v26 = vpop.f32.mrf.mxu2 }
 0x2ee   :  { %v4130_v10 = vadd.f32 %v4049_v26, %v3540_v41  ;;  %5072 = vmatmul.bf16.gmra.mxu0 %v4894_v21  ;;  %v7478_v23 = vpop.f32.mrf.mxu3  ;;  %v4907_v26 = vshll.u32 %v7493_v47, 16 }
 0x2f0   :  { %v4546_v56 = vadd.f32 %v7452_v0, %v4130_v10  ;;  %v3912_v0 = vor.u32 %v3911_v12, %v3908_v38  ;;  %v4905_v10 = vor.u32 %v4903_v11, %v4901_v8  ;;  %v3924_v38 = vshrl.u32 %v6307_v49, 16 }
 0x2f2   :  { %v5114_v4 = vadd.f32 %v5033_v45, %v4546_v56  ;;  %v3913_v62 = vsel %vm639_vm13, %v3903_v53, %v3912_v0  ;;  %v3917_v53 = vrot.slane %v3915_v28, 3  ;;  %v3336_v45 = vsel %vm1646_vm1, %v3331_v39, %v3335_v46 }
 0x2f3   :  { %v3464_v17 = vpop.f32.mrf.mxu1  ;;  %v5035_v52 = vpop.f32.mrf.mxu0  ;;  %4514 = vmatmul.bf16.gmra.mxu3 %v6331_v3  ;;  %v7501_v3 = vld [vmem:[#allocation2 + $0x84] sm:$0xff]  ;;  %v3926_v27 = vrot.slane %v3924_v38, 3 }
 0x2f4   :  { %5150 = vst [vmem:[#allocation8 + $0x30] sm:$0xff] %v5114_v4  ;;  %v3542_v22 = vadd.f32 %v3464_v17, %v3083_v29  ;;  %v4909_v4 = vrot.slane %v4907_v26, 1 }
 0x2f5   :  { %v4051_v5 = vpop.f32.mrf.mxu2 }
 0x2f6   :  { %v4131_v61 = vadd.f32 %v4051_v5, %v3541_v55  ;;  %3503 = vmatmul.bf16.gmra.mxu1 %v3328_v6  ;;  %v7484_v63 = vpop.f32.mrf.mxu3  ;;  %v3341_v55 = vshll.u32 %v7501_v3, 16  ;;  %v3339_v6 = vor.u32 %v3337_v33, %v3335_v46 }
 0x2f8   :  { %v4547_v25 = vadd.f32 %v7461_v9, %v4131_v61  ;;  %v3918_v9 = vshll.u32 %v6306_v2, 16 }
 0x2fa   :  { %v5115_v43 = vadd.f32 %v5035_v52, %v4547_v25  ;;  %4093 = vmatmul.bf16.gmra.mxu2 %v3913_v62  ;;  %v3920_v20 = vrot.slane %v3918_v9, 4  ;;  %v4910_v52 = vsel %vm1646_vm1, %v4905_v10, %v4909_v4  ;;  %v6333_v25 = vld [vmem:[#allocation2 + $0x8c] sm:$0xff]  ;;  %v3086_v62 = vld [vmem:[#allocation8 + $0x58] sm:$0xff] }
 0x2fb   :  { %v3466_v16 = vpop.f32.mrf.mxu1  ;;  %v5038_v7 = vpop.f32.mrf.mxu0  ;;  %v7517_v9 = vld [vmem:[#allocation2 + $0x8c] sm:$0xff] }
 0x2fc   :  { %5151 = vst [vmem:[#allocation8 + $0x38] sm:$0xff] %v5115_v43  ;;  %v3543_v51 = vadd.f32 %v3466_v16, %v3084_v31  ;;  %v3921_v14 = vor.u32 %v3920_v20, %v3917_v53  ;;  %v3343_v43 = vrot.slane %v3341_v55, 1  ;;  %v7534_v55 = vld [vmem:[#allocation2 + $0x94] sm:$0xff] }
 0x2fd   :  { %v4054_v18 = vpop.f32.mrf.mxu2 }
 0x2fe   :  { %v4132_v15 = vadd.f32 %v4054_v18, %v3542_v22  ;;  %5077 = vmatmul.bf16.gmra.mxu0 %v4902_v30  ;;  %v7490_v59 = vpop.f32.mrf.mxu3  ;;  %v3922_v42 = vsel %vm639_vm13, %v3912_v0, %v3921_v14  ;;  %v7508_v0 = vld [vmem:[#allocation2 + $0x8c] sm:$0xff]  ;;  %v4911_v18 = vshrl.u32 %v7493_v47, 16 }
 0x300   :  { %v4548_v50 = vadd.f32 %v7469_v13, %v4132_v15  ;;  %v6308_v15 = vld [vmem:[#allocation2 + $0x90] sm:$0xff]  ;;  %v4913_v20 = vor.u32 %v4911_v18, %v4909_v4 }
 0x302   :  { %v5116_v54 = vadd.f32 %v5038_v7, %v4548_v50  ;;  %v3344_v7 = vsel %vm1646_vm1, %v3339_v6, %v3343_v43  ;;  %v3087_v50 = vld [vmem:[#allocation8 + $0x60] sm:$0xff]  ;;  %v3089_v6 = vld [vmem:[#allocation8 + $0x70] sm:$0xff] }
 0x303   :  { %v3469_v36 = vpop.f32.mrf.mxu1  ;;  %v5040_v44 = vpop.f32.mrf.mxu0  ;;  %4519 = vmatmul.bf16.gmra.mxu3 %v6332_v32 }
 0x304   :  { %5152 = vst [vmem:[#allocation8 + $0x40] sm:$0xff] %v5116_v54  ;;  %v3544_v60 = vadd.f32 %v3469_v36, %v3085_v57  ;;  %v3349_v36 = vshll.u32 %v7517_v9, 16  ;;  %v6334_v57 = vld [vmem:[#allocation2 + $0x94] sm:$0xff] }
 0x305   :  { %v4056_v19 = vpop.f32.mrf.mxu2 }
 0x306   :  { %v4133_v13 = vadd.f32 %v4056_v19, %v3543_v51  ;;  %3508 = vmatmul.bf16.gmra.mxu1 %v3336_v45  ;;  %v7496_v41 = vpop.f32.mrf.mxu3  ;;  %v3345_v51 = vshrl.u32 %v7501_v3, 16  ;;  %v3351_v45 = vrot.slane %v3349_v36, 1  ;;  %v4919_v3 = vshrl.u32 %v7508_v0, 16 }
 0x308   :  { %v4549_v21 = vadd.f32 %v7478_v23, %v4133_v13  ;;  %v3927_v23 = vshll.u32 %v6307_v49, 16  ;;  %v7525_v13 = vld [vmem:[#allocation2 + $0x94] sm:$0xff]  ;;  %v3347_v49 = vor.u32 %v3345_v51, %v3343_v43 }
 0x30a   :  { %v5117_v48 = vadd.f32 %v5040_v44, %v4549_v21  ;;  %4098 = vmatmul.bf16.gmra.mxu2 %v3922_v42  ;;  %v3929_v61 = vrot.slane %v3927_v23, 4  ;;  %v3936_v44 = vshll.u32 %v6308_v15, 16  ;;  %v3088_v21 = vld [vmem:[#allocation8 + $0x68] sm:$0xff] }
 0x30b   :  { %v3471_v56 = vpop.f32.mrf.mxu1  ;;  %v5043_v40 = vpop.f32.mrf.mxu0 }
 0x30c   :  { %5153 = vst [vmem:[#allocation8 + $0x48] sm:$0xff] %v5117_v48  ;;  %v3545_v29 = vadd.f32 %v3471_v56, %v3086_v62  ;;  %v3930_v8 = vor.u32 %v3929_v61, %v3926_v27  ;;  %v3938_v11 = vrot.slane %v3936_v44, 4 }
 0x30d   :  { %v4059_v17 = vpop.f32.mrf.mxu2 }
 0x30e   :  { %v4134_v12 = vadd.f32 %v4059_v17, %v3544_v60  ;;  %5082 = vmatmul.bf16.gmra.mxu0 %v4910_v52  ;;  %v7504_v34 = vpop.f32.mrf.mxu3  ;;  %v3931_v35 = vsel %vm639_vm13, %v3921_v14, %v3930_v8  ;;  %v6309_v52 = vld [vmem:[#allocation2 + $0x98] sm:$0xff] }
 0x310   :  { %v4550_v5 = vadd.f32 %v7484_v63, %v4134_v12  ;;  %v4915_v63 = vshll.u32 %v7508_v0, 16  ;;  %v3942_v0 = vshrl.u32 %v6309_v52, 16 }
 0x312   :  { %v5118_v1 = vadd.f32 %v5043_v40, %v4550_v5  ;;  %v4917_v28 = vrot.slane %v4915_v63, 1  ;;  %v3352_v40 = vsel %vm1646_vm1, %v3347_v49, %v3351_v45  ;;  %v3074_v63 = vld [vmem:[#allocation2 + $0x9c] sm:$0x1] }
 0x313   :  { %v3474_v58 = vpop.f32.mrf.mxu1  ;;  %v5045_v2 = vpop.f32.mrf.mxu0  ;;  %4524 = vmatmul.bf16.gmra.mxu3 %v6333_v25 }
 0x314   :  { %5154 = vst [vmem:[#allocation8 + $0x50] sm:$0xff] %v5118_v1  ;;  %v3546_v54 = vadd.f32 %v3474_v58, %v3087_v50  ;;  %v4918_v31 = vsel %vm1646_vm1, %v4913_v20, %v4917_v28  ;;  %v4921_v23 = vor.u32 %v4919_v3, %v4917_v28  ;;  %v3945_v1 = vshll.u32 %v6309_v52, 16  ;;  %v3090_v28 = vld [vmem:[#allocation8 + $0x78] sm:$0xff] }
 0x315   :  { %v4061_v16 = vpop.f32.mrf.mxu2  ;;  %v6335_v20 = vld [vmem:[#allocation2 + $0x9c] sm:$0xff] }
 0x316   :  { %v4135_v24 = vadd.f32 %v4061_v16, %v3545_v29  ;;  %3513 = vmatmul.bf16.gmra.mxu1 %v3344_v7  ;;  %v7512_v22 = vpop.f32.mrf.mxu3  ;;  %v3944_v16 = vrot.slane %v3942_v0, 3  ;;  %v3947_v7 = vrot.slane %v3945_v1, 4  ;;  %v4648_v0 = vld [vmem:[#allocation2 + $0xa4] sm:$0x1] }
 0x318   :  { %v4551_v30 = vadd.f32 %v7490_v59, %v4135_v24  ;;  %v3933_v59 = vshrl.u32 %v6308_v15, 16  ;;  %v3642_v24 = vld [vmem:[#allocation2 + $0xa0] sm:$0xf]  ;;  %v3948_v50 = vor.u32 %v3947_v7, %v3944_v16 }
 0x31a   :  { %v5119_v37 = vadd.f32 %v5045_v2, %v4551_v30  ;;  %4103 = vmatmul.bf16.gmra.mxu2 %v3931_v35  ;;  %v3935_v14 = vrot.slane %v3933_v59, 3  ;;  %v3357_v2 = vshll.u32 %v7534_v55, 16 }
 0x31b   :  { %v3476_v39 = vpop.f32.mrf.mxu1  ;;  %v5048_v53 = vpop.f32.mrf.mxu0 }
 0x31c   :  { %5155 = vst [vmem:[#allocation8 + $0x58] sm:$0xff] %v5119_v37  ;;  %v3547_v48 = vadd.f32 %v3476_v39, %v3088_v21  ;;  %v3939_v4 = vor.u32 %v3938_v11, %v3935_v14  ;;  %v3359_v30 = vrot.slane %v3357_v2, 1  ;;  %v3769_v39 = vunpack.c.l.b16 %v3642_v24  ;;  %v3091_v21 = vld [vmem:[#allocation8 + $0x80] sm:$0xff] }
 0x31d   :  { %v4064_v32 = vpop.f32.mrf.mxu2 }
 0x31e   :  { %v4136_v46 = vadd.f32 %v4064_v32, %v3546_v54  ;;  %5087 = vmatmul.bf16.gmra.mxu0 %v4918_v31  ;;  %v7521_v47 = vpop.f32.mrf.mxu3  ;;  %v3940_v38 = vsel %vm639_vm13, %v3930_v8, %v3939_v4  ;;  %v6361_v54 = vld [vmem:[#allocation2 + $0x9c] sm:$0xff]  ;;  %v4927_v32 = vshrl.u32 %v7525_v13, 16  ;;  %v3949_v44 = vsel %vm639_vm13, %v3939_v4, %v3948_v50 }
 0x31f   :  { %v4931_v59 = vshll.u32 %v6361_v54, 16 }
 0x320   :  { %v4552_v19 = vadd.f32 %v7496_v41, %v4136_v46  ;;  %v4923_v41 = vshll.u32 %v7525_v13, 16  ;;  %v3361_v13 = vshrl.u32 %v7534_v55, 16 }
 0x321   :  { %v4933_v11 = vrot.slane %v4931_v59, 1 }
 0x322   :  { %v5120_v26 = vadd.f32 %v5048_v53, %v4552_v19  ;;  %v4925_v12 = vrot.slane %v4923_v41, 1  ;;  %v3788_v19 = vpack.c.b16 %v3769_v39, %v3769_v39 }
 0x323   :  { %v3479_v42 = vpop.f32.mrf.mxu1  ;;  %v5050_v10 = vpop.f32.mrf.mxu0  ;;  %4529 = vmatmul.bf16.gmra.mxu3 %v6334_v57 }
 0x324   :  { %5156 = vst [vmem:[#allocation8 + $0x60] sm:$0xff] %v5120_v26  ;;  %v3548_v25 = vadd.f32 %v3479_v42, %v3089_v6  ;;  %v4926_v58 = vsel %vm1646_vm1, %v4921_v23, %v4925_v12  ;;  %v3954_v57 = vshll.u32 %v3788_v19, 16 }
 0x325   :  { %v4066_v56 = vpop.f32.mrf.mxu2 }
 0x326   :  { %v4137_v60 = vadd.f32 %v4066_v56, %v3547_v48  ;;  %3518 = vmatmul.bf16.gmra.mxu1 %v3352_v40  ;;  %v7530_v17 = vpop.f32.mrf.mxu3  ;;  %v3951_v48 = vshrl.u32 %v3788_v19, 16 }
 0x328   :  { %v4553_v33 = vadd.f32 %v7504_v34, %v4137_v60  ;;  %v3353_v34 = vshrl.u32 %v7517_v9, 16  ;;  %v3201_v9 = vunpack.c.l.b16 %v3074_v63  ;;  %v3953_v52 = vrot.slane %v3951_v48, 3  ;;  %v3093_v63 = vld [vmem:[#allocation8 + $0x90] sm:$0xff] }
 0x32a   :  { %v5121_v5 = vadd.f32 %v5050_v10, %v4553_v33  ;;  %4108 = vmatmul.bf16.gmra.mxu2 %v3940_v38  ;;  %v3355_v18 = vor.u32 %v3353_v34, %v3351_v45  ;;  %v3220_v51 = vpack.c.b16 %v3201_v9, %v3201_v9  ;;  %v4929_v45 = vor.u32 %v4927_v32, %v4925_v12  ;;  %v3092_v12 = vld [vmem:[#allocation8 + $0x88] sm:$0xff] }
 0x32b   :  { %v3481_v27 = vpop.f32.mrf.mxu1  ;;  %v5053_v61 = vpop.f32.mrf.mxu0  ;;  %v3956_v33 = vrot.slane %v3954_v57, 4 }
 0x32c   :  { %5157 = vst [vmem:[#allocation8 + $0x68] sm:$0xff] %v5121_v5  ;;  %v3549_v53 = vadd.f32 %v3481_v27, %v3090_v28  ;;  %v3365_v49 = vshll.u32 %v3220_v51, 16  ;;  %v4934_v56 = vsel %vm1646_vm1, %v4929_v45, %v4933_v11 }
 0x32d   :  { %v4069_v62 = vpop.f32.mrf.mxu2  ;;  %v3957_v27 = vor.u32 %v3956_v33, %v3953_v52 }
 0x32e   :  { %v4138_v43 = vadd.f32 %v4069_v62, %v3548_v25  ;;  %5092 = vmatmul.bf16.gmra.mxu0 %v4926_v58  ;;  %v7539_v29 = vpop.f32.mrf.mxu3  ;;  %v3367_v60 = vrot.slane %v3365_v49, 1  ;;  %v4775_v25 = vunpack.c.l.b16 %v4648_v0  ;;  %v4935_v62 = vshrl.u32 %v6361_v54, 16 }
 0x32f   :  { %v3958_v34 = vsel %vm639_vm13, %v3948_v50, %v3957_v27 }
 0x330   :  { %v4554_v8 = vadd.f32 %v7512_v22, %v4138_v43  ;;  %v3360_v22 = vsel %vm1646_vm1, %v3355_v18, %v3359_v30  ;;  %v4794_v43 = vpack.c.b16 %v4775_v25, %v4775_v25  ;;  %v4937_v16 = vor.u32 %v4935_v62, %v4933_v11  ;;  %v3099_v62 = vld [vmem:[#allocation8 + $0xc0] sm:$0xff] }
 0x332   :  { %v5122_v35 = vadd.f32 %v5053_v61, %v4554_v8  ;;  %v4939_v7 = vshll.u32 %v4794_v43, 16 }
 0x333   :  { %v3484_v15 = vpop.f32.mrf.mxu1  ;;  %v5055_v37 = vpop.f32.mrf.mxu0  ;;  %4534 = vmatmul.bf16.gmra.mxu3 %v6335_v20 }
 0x334   :  { %5158 = vst [vmem:[#allocation8 + $0x70] sm:$0xff] %v5122_v35  ;;  %v3550_v40 = vadd.f32 %v3484_v15, %v3091_v21  ;;  %v3096_v21 = vld [vmem:[#allocation8 + $0xa8] sm:$0xff] }
 0x335   :  { %v4071_v31 = vpop.f32.mrf.mxu2 }
 0x336   :  { %v4139_v36 = vadd.f32 %v4071_v31, %v3549_v53  ;;  %3523 = vmatmul.bf16.gmra.mxu1 %v3360_v22  ;;  %v4495_v46 = vpop.f32.mrf.mxu3  ;;  %v3094_v53 = vld [vmem:[#allocation8 + $0x98] sm:$0xff] }
 0x338   :  { %v4555_v14 = vadd.f32 %v7521_v47, %v4139_v36  ;;  %v3363_v47 = vor.u32 %v3361_v13, %v3359_v30  ;;  %v4941_v30 = vrot.slane %v4939_v7, 1 }
 0x33a   :  { %v5123_v26 = vadd.f32 %v5055_v37, %v4555_v14  ;;  %4113 = vmatmul.bf16.gmra.mxu2 %v3949_v44  ;;  %v3368_v6 = vsel %vm1646_vm1, %v3363_v47, %v3367_v60  ;;  %v4942_v15 = vsel %vm1646_vm1, %v4937_v16, %v4941_v30  ;;  %v3095_v44 = vld [vmem:[#allocation8 + $0xa0] sm:$0xff] }
 0x33b   :  { %v3486_v42 = vpop.f32.mrf.mxu1  ;;  %v5058_v10 = vpop.f32.mrf.mxu0 }
 0x33c   :  { %5159 = vst [vmem:[#allocation8 + $0x78] sm:$0xff] %v5123_v26  ;;  %v3551_v61 = vadd.f32 %v3486_v42, %v3092_v12  ;;  %v3098_v12 = vld [vmem:[#allocation8 + $0xb8] sm:$0xff] }
 0x33d   :  { %v4074_v4 = vpop.f32.mrf.mxu2 }
 0x33e   :  { %v4140_v3 = vadd.f32 %v4074_v4, %v3550_v40  ;;  %5097 = vmatmul.bf16.gmra.mxu0 %v4934_v56  ;;  %v4497_v41 = vpop.f32.mrf.mxu3 }
 0x340   :  { %v4556_v38 = vadd.f32 %v7530_v17, %v4140_v3  ;;  %v3097_v3 = vld [vmem:[#allocation8 + $0xb0] sm:$0xff] }
 0x342   :  { %v5124_v23 = vadd.f32 %v5058_v10, %v4556_v38 }
 0x343   :  { %v3489_v55 = vpop.f32.mrf.mxu1  ;;  %v5060_v5 = vpop.f32.mrf.mxu0 }
 0x344   :  { %5160 = vst [vmem:[#allocation8 + $0x80] sm:$0xff] %v5124_v23  ;;  %v3552_v35 = vadd.f32 %v3489_v55, %v3093_v63  ;;  %v3100_v63 = vld [vmem:[#allocation8 + $0xc8] sm:$0xff] }
 0x345   :  { %v4076_v1 = vpop.f32.mrf.mxu2 }
 0x346   :  { %v4141_v58 = vadd.f32 %v4076_v1, %v3551_v61  ;;  %3528 = vmatmul.bf16.gmra.mxu1 %v3368_v6  ;;  %v4500_v2 = vpop.f32.mrf.mxu3 }
 0x348   :  { %v4557_v17 = vadd.f32 %v7539_v29, %v4141_v58 }
 0x34a   :  { %v5125_v8 = vadd.f32 %v5060_v5, %v4557_v17  ;;  %4118 = vmatmul.bf16.gmra.mxu2 %v3958_v34 }
 0x34b   :  { %v3491_v24 = vpop.f32.mrf.mxu1  ;;  %v5063_v18 = vpop.f32.mrf.mxu0 }
 0x34c   :  { %5161 = vst [vmem:[#allocation8 + $0x88] sm:$0xff] %v5125_v8  ;;  %v3553_v54 = vadd.f32 %v3491_v24, %v3094_v53 }
 0x34d   :  { %v4079_v28 = vpop.f32.mrf.mxu2 }
 0x34e   :  { %v4142_v37 = vadd.f32 %v4079_v28, %v3552_v35  ;;  %5102 = vmatmul.bf16.gmra.mxu0 %v4942_v15  ;;  %v4502_v50 = vpop.f32.mrf.mxu3 }
 0x350   :  { %v4558_v9 = vadd.f32 %v4495_v46, %v4142_v37 }
 0x352   :  { %v5126_v39 = vadd.f32 %v5063_v18, %v4558_v9  ;;  %v3101_v9 = vld [vmem:[#allocation8 + $0xd0] sm:$0xff] }
 0x353   :  { %v3494_v29 = vpop.f32.mrf.mxu1  ;;  %v5065_v20 = vpop.f32.mrf.mxu0 }
 0x354   :  { %5162 = vst [vmem:[#allocation8 + $0x90] sm:$0xff] %v5126_v39  ;;  %v3554_v45 = vadd.f32 %v3494_v29, %v3095_v44 }
 0x355   :  { %v4081_v32 = vpop.f32.mrf.mxu2 }
 0x356   :  { %v4143_v31 = vadd.f32 %v4081_v32, %v3553_v54  ;;  %v4505_v22 = vpop.f32.mrf.mxu3 }
 0x358   :  { %v4559_v36 = vadd.f32 %v4497_v41, %v4143_v31 }
 0x35a   :  { %v5127_v59 = vadd.f32 %v5065_v20, %v4559_v36  ;;  %v3102_v36 = vld [vmem:[#allocation8 + $0xd8] sm:$0xff] }
 0x35b   :  { %v3496_v51 = vpop.f32.mrf.mxu1  ;;  %v5068_v19 = vpop.f32.mrf.mxu0 }
 0x35c   :  { %5163 = vst [vmem:[#allocation8 + $0x98] sm:$0xff] %v5127_v59  ;;  %v3555_v49 = vadd.f32 %v3496_v51, %v3096_v21 }
 0x35d   :  { %v4084_v14 = vpop.f32.mrf.mxu2 }
 0x35e   :  { %v4144_v11 = vadd.f32 %v4084_v14, %v3554_v45  ;;  %v4507_v46 = vpop.f32.mrf.mxu3 }
 0x360   :  { %v4560_v26 = vadd.f32 %v4500_v2, %v4144_v11 }
 0x362   :  { %v5128_v13 = vadd.f32 %v5068_v19, %v4560_v26  ;;  %v3103_v26 = vld [vmem:[#allocation8 + $0xe0] sm:$0xff] }
 0x363   :  { %v3499_v42 = vpop.f32.mrf.mxu1  ;;  %v5070_v10 = vpop.f32.mrf.mxu0 }
 0x364   :  { %5164 = vst [vmem:[#allocation8 + $0xa0] sm:$0xff] %v5128_v13  ;;  %v3556_v60 = vadd.f32 %v3499_v42, %v3097_v3 }
 0x365   :  { %v4086_v48 = vpop.f32.mrf.mxu2 }
 0x366   :  { %v4145_v57 = vadd.f32 %v4086_v48, %v3555_v49  ;;  %v4510_v4 = vpop.f32.mrf.mxu3 }
 0x368   :  { %v4561_v56 = vadd.f32 %v4502_v50, %v4145_v57 }
 0x36a   :  { %v5129_v40 = vadd.f32 %v5070_v10, %v4561_v56  ;;  %v3104_v56 = vld [vmem:[#allocation8 + $0xe8] sm:$0xff] }
 0x36b   :  { %v3501_v41 = vpop.f32.mrf.mxu1  ;;  %v5073_v47 = vpop.f32.mrf.mxu0 }
 0x36c   :  { %5165 = vst [vmem:[#allocation8 + $0xa8] sm:$0xff] %v5129_v40  ;;  %v3557_v6 = vadd.f32 %v3501_v41, %v3098_v12 }
 0x36d   :  { %v4089_v52 = vpop.f32.mrf.mxu2 }
 0x36e   :  { %v4146_v33 = vadd.f32 %v4089_v52, %v3556_v60  ;;  %v4512_v27 = vpop.f32.mrf.mxu3 }
 0x370   :  { %v4562_v38 = vadd.f32 %v4505_v22, %v4146_v33 }
 0x372   :  { %v5130_v23 = vadd.f32 %v5073_v47, %v4562_v38  ;;  %v3105_v38 = vld [vmem:[#allocation8 + $0xf0] sm:$0xff] }
 0x373   :  { %v3504_v55 = vpop.f32.mrf.mxu1  ;;  %v5075_v5 = vpop.f32.mrf.mxu0 }
 0x374   :  { %5166 = vst [vmem:[#allocation8 + $0xb0] sm:$0xff] %v5130_v23  ;;  %v3558_v2 = vadd.f32 %v3504_v55, %v3099_v62 }
 0x375   :  { %v4091_v61 = vpop.f32.mrf.mxu2 }
 0x376   :  { %v4147_v0 = vadd.f32 %v4091_v61, %v3557_v6  ;;  %v4515_v16 = vpop.f32.mrf.mxu3 }
 0x378   :  { %v4563_v1 = vadd.f32 %v4507_v46, %v4147_v0 }
 0x37a   :  { %v5131_v25 = vadd.f32 %v5075_v5, %v4563_v1  ;;  %v3106_v1 = vld [vmem:[#allocation8 + $0xf8] sm:$0xff] }
 0x37b   :  { %v3506_v58 = vpop.f32.mrf.mxu1  ;;  %v5078_v34 = vpop.f32.mrf.mxu0 }
 0x37c   :  { %5167 = vst [vmem:[#allocation8 + $0xb8] sm:$0xff] %v5131_v25  ;;  %v3559_v30 = vadd.f32 %v3506_v58, %v3100_v63 }
 0x37d   :  { %v4094_v43 = vpop.f32.mrf.mxu2 }
 0x37e   :  { %v4148_v17 = vadd.f32 %v4094_v43, %v3558_v2  ;;  %v4517_v15 = vpop.f32.mrf.mxu3 }
 0x380   :  { %v4564_v7 = vadd.f32 %v4510_v4, %v4148_v17 }
 0x382   :  { %v5132_v8 = vadd.f32 %v5078_v34, %v4564_v7  ;;  %v3107_v7 = vld [vmem:[#allocation8 + $0x100] sm:$0xff] }
 0x383   :  { %v3509_v24 = vpop.f32.mrf.mxu1  ;;  %v5080_v18 = vpop.f32.mrf.mxu0 }
 0x384   :  { %5168 = vst [vmem:[#allocation8 + $0xc0] sm:$0xff] %v5132_v8  ;;  %v3560_v29 = vadd.f32 %v3509_v24, %v3101_v9 }
 0x385   :  { %v4096_v35 = vpop.f32.mrf.mxu2 }
 0x386   :  { %v4149_v28 = vadd.f32 %v4096_v35, %v3559_v30  ;;  %v4520_v31 = vpop.f32.mrf.mxu3 }
 0x388   :  { %v4565_v37 = vadd.f32 %v4512_v27, %v4149_v28 }
 0x38a   :  { %v5133_v50 = vadd.f32 %v5080_v18, %v4565_v37 }
 0x38b   :  { %v3511_v39 = vpop.f32.mrf.mxu1  ;;  %v5083_v53 = vpop.f32.mrf.mxu0 }
 0x38c   :  { %5169 = vst [vmem:[#allocation8 + $0xc8] sm:$0xff] %v5133_v50  ;;  %v3561_v51 = vadd.f32 %v3511_v39, %v3102_v36 }
 0x38d   :  { %v4099_v20 = vpop.f32.mrf.mxu2 }
 0x38e   :  { %v4150_v54 = vadd.f32 %v4099_v20, %v3560_v29  ;;  %v4522_v42 = vpop.f32.mrf.mxu3 }
 0x390   :  { %v4566_v32 = vadd.f32 %v4515_v16, %v4150_v54 }
 0x392   :  { %v5134_v22 = vadd.f32 %v5083_v53, %v4566_v32  ;;  %v3109_v32 = vld [vmem:[#allocation8 + $0x110] sm:$0xff] }
 0x393   :  { %v3514_v59 = vpop.f32.mrf.mxu1  ;;  %v5085_v44 = vpop.f32.mrf.mxu0 }
 0x394   :  { %5170 = vst [vmem:[#allocation8 + $0xd0] sm:$0xff] %v5134_v22  ;;  %v3562_v21 = vadd.f32 %v3514_v59, %v3103_v26 }
 0x395   :  { %v4101_v19 = vpop.f32.mrf.mxu2 }
 0x396   :  { %v4151_v45 = vadd.f32 %v4101_v19, %v3561_v51  ;;  %v4525_v60 = vpop.f32.mrf.mxu3 }
 0x398   :  { %v4567_v14 = vadd.f32 %v4517_v15, %v4151_v45  ;;  %v3108_v15 = vld [vmem:[#allocation8 + $0x108] sm:$0xff] }
 0x39a   :  { %v5135_v11 = vadd.f32 %v5085_v44, %v4567_v14  ;;  %v3110_v14 = vld [vmem:[#allocation8 + $0x118] sm:$0xff] }
 0x39b   :  { %v3516_v46 = vpop.f32.mrf.mxu1  ;;  %v5088_v13 = vpop.f32.mrf.mxu0 }
 0x39c   :  { %5171 = vst [vmem:[#allocation8 + $0xd8] sm:$0xff] %v5135_v11  ;;  %v3563_v3 = vadd.f32 %v3516_v46, %v3104_v56 }
 0x39d   :  { %v4104_v10 = vpop.f32.mrf.mxu2 }
 0x39e   :  { %v4152_v49 = vadd.f32 %v4104_v10, %v3562_v21  ;;  %v4527_v61 = vpop.f32.mrf.mxu3 }
 0x3a0   :  { %v4568_v48 = vadd.f32 %v4520_v31, %v4152_v49 }
 0x3a2   :  { %v5136_v57 = vadd.f32 %v5088_v13, %v4568_v48 }
 0x3a3   :  { %v3519_v40 = vpop.f32.mrf.mxu1  ;;  %v5090_v4 = vpop.f32.mrf.mxu0 }
 0x3a4   :  { %5172 = vst [vmem:[#allocation8 + $0xe0] sm:$0xff] %v5136_v57  ;;  %v3564_v55 = vadd.f32 %v3519_v40, %v3105_v38 }
 0x3a5   :  { %v4106_v41 = vpop.f32.mrf.mxu2 }
 0x3a6   :  { %v4153_v47 = vadd.f32 %v4106_v41, %v3563_v3  ;;  %v4530_v17 = vpop.f32.mrf.mxu3 }
 0x3a8   :  { %v4569_v52 = vadd.f32 %v4522_v42, %v4153_v47 }
 0x3aa   :  { %v5137_v33 = vadd.f32 %v5090_v4, %v4569_v52 }
 0x3ab   :  { %v3521_v23 = vpop.f32.mrf.mxu1  ;;  %v5093_v12 = vpop.f32.mrf.mxu0 }
 0x3ac   :  { %5173 = vst [vmem:[#allocation8 + $0xe8] sm:$0xff] %v5137_v33  ;;  %v3565_v58 = vadd.f32 %v3521_v23, %v3106_v1 }
 0x3ad   :  { %v4109_v5 = vpop.f32.mrf.mxu2 }
 0x3ae   :  { %v4154_v6 = vadd.f32 %v4109_v5, %v3564_v55  ;;  %v4532_v37 = vpop.f32.mrf.mxu3 }
 0x3b0   :  { %v4570_v27 = vadd.f32 %v4525_v60, %v4154_v6 }
 0x3b2   :  { %v5138_v0 = vadd.f32 %v5093_v12, %v4570_v27 }
 0x3b3   :  { %v3524_v25 = vpop.f32.mrf.mxu1  ;;  %v5095_v62 = vpop.f32.mrf.mxu0 }
 0x3b4   :  { %5174 = vst [vmem:[#allocation8 + $0xf0] sm:$0xff] %v5138_v0  ;;  %v3566_v63 = vadd.f32 %v3524_v25, %v3107_v7 }
 0x3b5   :  { %v4111_v34 = vpop.f32.mrf.mxu2 }
 0x3b6   :  { %v4155_v2 = vadd.f32 %v4111_v34, %v3565_v58  ;;  %v4535_v36 = vpop.f32.mrf.mxu3 }
 0x3b8   :  { %v4571_v43 = vadd.f32 %v4527_v61, %v4155_v2 }
 0x3ba   :  { %v5139_v16 = vadd.f32 %v5095_v62, %v4571_v43 }
 0x3bb   :  { %v5098_v8 = vpop.f32.mrf.mxu0  ;;  %v3526_v18 = vpop.f32.mrf.mxu1 }
 0x3bc   :  { %5175 = vst [vmem:[#allocation8 + $0xf8] sm:$0xff] %v5139_v16  ;;  %v3567_v50 = vadd.f32 %v3526_v18, %v3108_v15 }
 0x3bd   :  { %v4114_v24 = vpop.f32.mrf.mxu2 }
 0x3be   :  { %v4156_v30 = vadd.f32 %v4114_v24, %v3566_v63  ;;  %v4537_v13 = vpop.f32.mrf.mxu3 }
 0x3c0   :  { %v4572_v35 = vadd.f32 %v4530_v17, %v4156_v30 }
 0x3c2   :  { %v5140_v28 = vadd.f32 %v5098_v8, %v4572_v35 }
 0x3c3   :  { %v5100_v39 = vpop.f32.mrf.mxu0  ;;  %v3529_v29 = vpop.f32.mrf.mxu1 }
 0x3c4   :  { %5176 = vst [vmem:[#allocation8 + $0x100] sm:$0xff] %v5140_v28  ;;  %v3568_v31 = vadd.f32 %v3529_v29, %v3109_v32 }
 0x3c5   :  { %v4116_v9 = vpop.f32.mrf.mxu2 }
 0x3c6   :  { %v4157_v53 = vadd.f32 %v4116_v9, %v3567_v50 }
 0x3c8   :  { %v4573_v20 = vadd.f32 %v4532_v37, %v4157_v53 }
 0x3ca   :  { %v5141_v54 = vadd.f32 %v5100_v39, %v4573_v20 }
 0x3cb   :  { %v5103_v44 = vpop.f32.mrf.mxu0  ;;  %v3531_v19 = vpop.f32.mrf.mxu1 }
 0x3cc   :  { %5177 = vst [vmem:[#allocation8 + $0x108] sm:$0xff] %v5141_v54  ;;  %v3569_v11 = vadd.f32 %v3531_v19, %v3110_v14 }
 0x3cd   :  { %v4119_v22 = vpop.f32.mrf.mxu2 }
 0x3ce   :  { %v4158_v59 = vadd.f32 %v4119_v22, %v3568_v31 }
 0x3d0   :  { %v4574_v51 = vadd.f32 %v4535_v36, %v4158_v59 }
 0x3d2   :  { %v5142_v45 = vadd.f32 %v5103_v44, %v4574_v51 }
 0x3d3   :  { %v5105_v42 = vpop.f32.mrf.mxu0 }
 0x3d4   :  { %5178 = vst [vmem:[#allocation8 + $0x110] sm:$0xff] %v5142_v45 }
 0x3d5   :  { %v4121_v26 = vpop.f32.mrf.mxu2 }
 0x3d6   :  { %v4159_v46 = vadd.f32 %v4121_v26, %v3569_v11 }
 0x3d8   :  { %v4575_v21 = vadd.f32 %v4537_v13, %v4159_v46 }
 0x3da   :  { %v5143_v10 = vadd.f32 %v5105_v42, %v4575_v21 }
 0x3dc   :  { %5179 = vst [vmem:[#allocation8 + $0x118] sm:$0xff] %v5143_v10 }
 0x3dd   :  { %5192 = dma.vmem_to_hbm [thread:$0]  %s5185_s28, 4608, %s5187_s5, [#allocation5], %s6559_s6, %s6559_s6, %s6560_s7  }
 0x3de   :  { %6551 = dma.done.wait [#allocation5], 4608  }
 0x3df   :  { %6552 = vsyncadd [#allocation5], 4294962688 }
 0x3e0   :  { %5197 = vsyncpa [#allocation4], 1 }
 0x3e1   :  { %5198 = vsyncpa [#allocation7], 1 }
 0x3e2   :  { %5199 = vsyncpa [#allocation5], 1 }

</bundles_post_ra>
